<compile_context>
chip_gen: v7x
topology: tpu7x:2x2x1
jax: 0.10.0
libtpu: 0.0.40
codegen_flags: <defaults>
</compile_context>

<pallas_src>
import functools

import jax
import jax.numpy as jnp
from jax.experimental import pallas as pl
from jax.experimental.pallas import tpu as pltpu


def _round_up(x, m):
    return ((x + m - 1) // m) * m


# ----------------------------------------------------------------------------
# Fused Pallas kernel:
#   [optional SiLU on x] -> x @ w (bf16 in, f32 acc on MXU)
#   -> [optional +bias] -> [optional BatchNorm w/ masked batch stats]
#   -> [optional LeakyReLU] -> store
# Whole operand set lives in VMEM (single grid step).
# ----------------------------------------------------------------------------
def _fused_layer_kernel(x_ref, w_ref, p_ref, o_ref, *,
                        m_valid, fuse_silu, has_bias, has_bn, has_act,
                        alpha, eps):
    xv = x_ref[...]
    if fuse_silu:
        xf = xv.astype(jnp.float32)
        xv = (xf * (1.0 / (1.0 + jnp.exp(-xf)))).astype(jnp.bfloat16)
    y = jnp.dot(xv, w_ref[...], preferred_element_type=jnp.float32)
    if has_bias:
        y = y + p_ref[0:1, :]                       # bias row, (1, Np) bcast
    if has_bn:
        # Training-mode BatchNorm batch statistics over the valid rows only
        # (padded rows are zero but excluded explicitly via the mask).
        rows = jax.lax.broadcasted_iota(jnp.int32, y.shape, 0)
        valid = rows < m_valid
        inv_m = 1.0 / float(m_valid)
        ym = jnp.where(valid, y, 0.0)
        mean = jnp.sum(ym, axis=0, keepdims=True) * inv_m
        d = jnp.where(valid, y - mean, 0.0)
        var = jnp.sum(d * d, axis=0, keepdims=True) * inv_m
        scale = p_ref[1:2, :] * jax.lax.rsqrt(var + eps)   # gamma row
        shift = p_ref[2:3, :] - mean * scale                # beta row
        y = y * scale + shift
    if has_act:
        y = jnp.where(y > 0, y, alpha * y)          # LeakyReLU(alpha)
    o_ref[...] = y.astype(o_ref.dtype)


def pallas_fused_layer(x, w, params, *, m_valid, fuse_silu=False,
                       has_bias=False, has_bn=False, has_act=False,
                       alpha=0.2, eps=1e-5, out_dtype=jnp.float32):
    """x: (Mp, K) bf16, w: (K, Np) bf16, params: (8, Np) f32
    rows of `params`: 0 = bias, 1 = gamma, 2 = beta (unused rows are zero)."""
    Mp, K = x.shape
    K2, Np = w.shape
    assert K == K2 and Mp % 8 == 0 and Np % 128 == 0
    assert Mp <= 512, "single-block kernel; add M tiling for larger inputs"
    kernel = functools.partial(
        _fused_layer_kernel, m_valid=m_valid, fuse_silu=fuse_silu,
        has_bias=has_bias, has_bn=has_bn, has_act=has_act,
        alpha=alpha, eps=eps)
    return pl.pallas_call(
        kernel,
        out_shape=jax.ShapeDtypeStruct((Mp, Np), out_dtype),
        grid=(1,),
        in_specs=[
            pl.BlockSpec((Mp, K), lambda i: (0, 0)),
            pl.BlockSpec((K, Np), lambda i: (0, 0)),
            pl.BlockSpec((8, Np), lambda i: (0, 0)),
        ],
        out_specs=pl.BlockSpec((Mp, Np), lambda i: (0, 0)),
        compiler_params=pltpu.CompilerParams(
            dimension_semantics=("arbitrary",)),
    )(x, w, params)


# ----------------------------------------------------------------------------
# Glue (embedding, im2col, parameter packing) in plain JAX
# ----------------------------------------------------------------------------
def get_position_embedding(t, t_emb_dim):
    half = t_emb_dim // 2
    factor = 10000.0 ** (jnp.arange(half, dtype=jnp.float32) / half)
    args = t.astype(jnp.float32)[:, None] / factor[None, :]
    return jnp.concatenate([jnp.sin(args), jnp.cos(args)], axis=-1)


def _im2col_nhwc(x, ksize, stride, pad):
    N, H, W, C = x.shape
    Ho = (H + 2 * pad - ksize) // stride + 1
    Wo = (W + 2 * pad - ksize) // stride + 1
    xp = jnp.pad(x, ((0, 0), (pad, pad), (pad, pad), (0, 0)))
    cols = []
    for di in range(ksize):
        for dj in range(ksize):
            cols.append(xp[:, di:di + stride * Ho:stride,
                            dj:dj + stride * Wo:stride, :])
    patches = jnp.concatenate(cols, axis=-1)               # (N,Ho,Wo,kh*kw*C)
    return patches.reshape(N * Ho * Wo, ksize * ksize * C), (N, Ho, Wo)


def init_params(key, img_channels, conv_channels=(64, 128, 256),
                t_emb_dim=512, ksize=4):
    layers_dim = [img_channels] + list(conv_channels) + [1]
    n = len(layers_dim) - 1
    keys = jax.random.split(key, 3 * n)
    params = []
    for i in range(n):
        cin, cout = layers_dim[i], layers_dim[i + 1]
        p = {
            "conv_w": 0.05 * jax.random.normal(
                keys[3 * i], (cout, cin, ksize, ksize), jnp.float32),   # OIHW
            "conv_b": (0.05 * jax.random.normal(keys[3 * i + 1], (cout,),
                                                jnp.float32)
                       if i == 0 else jnp.zeros((cout,), jnp.float32)),
            "t_w": 0.05 * jax.random.normal(
                keys[3 * i + 2], (cin, t_emb_dim), jnp.float32),
            "t_b": jnp.zeros((cin,), jnp.float32),
        }
        if (i != 0) and (i != n - 1):                       # BN layers
            p["bn_gamma"] = jnp.ones((cout,), jnp.float32)
            p["bn_beta"] = jnp.zeros((cout,), jnp.float32)
        params.append(p)
    return params


@functools.partial(jax.jit, static_argnames=("ksize", "stride", "pad",
                                             "t_emb_dim", "alpha", "bn_eps"))
def forward(params, x_nchw, t=None, *, ksize=4, stride=2, pad=1,
            t_emb_dim=512, alpha=0.2, bn_eps=1e-5):
    n_layers = len(params)
    x = jnp.transpose(x_nchw, (0, 2, 3, 1)).astype(jnp.float32)   # -> NHWC
    B = x.shape[0]

    # --- all timestep-embedding Linears batched into one lane-dense matmul ---
    projs = None
    if t is not None:
        t_emb = get_position_embedding(jnp.asarray(t), t_emb_dim)   # (B, 512)
        cins = [p["conv_w"].shape[1] for p in params]
        offs = [0]
        for c in cins:
            offs.append(offs[-1] + c)
        Np = _round_up(offs[-1], 128)
        w_cat = jnp.zeros((t_emb_dim, Np), jnp.float32)
        b_cat = jnp.zeros((Np,), jnp.float32)
        for i, p in enumerate(params):
            w_cat = w_cat.at[:, offs[i]:offs[i + 1]].set(p["t_w"].T)
            b_cat = b_cat.at[offs[i]:offs[i + 1]].set(p["t_b"])
        Mp = _round_up(B, 8)
        x_t = jnp.zeros((Mp, t_emb_dim), jnp.bfloat16).at[:B].set(
            t_emb.astype(jnp.bfloat16))
        pk = jnp.zeros((8, Np), jnp.float32).at[0].set(b_cat)
        proj_all = pallas_fused_layer(
            x_t, w_cat.astype(jnp.bfloat16), pk,
            m_valid=B, fuse_silu=True, has_bias=True,
            out_dtype=jnp.float32)[:B]
        projs = [proj_all[:, offs[i]:offs[i + 1]] for i in range(n_layers)]

    # --- conv / BN / act layers: one fused Pallas kernel each ---
    for i, p in enumerate(params):
        has_bias = (i == 0)
        has_bn = (i != 0) and (i != n_layers - 1)
        has_act = (i != n_layers - 1)

        if projs is not None:
            x = x + projs[i][:, None, None, :]

        patches, (N, Ho, Wo) = _im2col_nhwc(
            x.astype(jnp.bfloat16), ksize, stride, pad)
        M, K = patches.shape
        cout = p["conv_w"].shape[0]
        Np = _round_up(cout, 128)
        Mp = _round_up(M, 8)
        if Mp != M:
            patches = jnp.pad(patches, ((0, Mp - M), (0, 0)))

        w2d = jnp.transpose(p["conv_w"], (2, 3, 1, 0)).reshape(-1, cout)
        w2d = jnp.pad(w2d, ((0, 0), (0, Np - cout))).astype(jnp.bfloat16)

        pk = jnp.zeros((8, Np), jnp.float32)
        if has_bias:
            pk = pk.at[0, :cout].set(p["conv_b"])
        if has_bn:
            pk = pk.at[1, :cout].set(p["bn_gamma"])
            pk = pk.at[2, :cout].set(p["bn_beta"])

        out_dtype = jnp.float32 if i == n_layers - 1 else jnp.bfloat16
        y = pallas_fused_layer(patches, w2d, pk,
                               m_valid=M, has_bias=has_bias, has_bn=has_bn,
                               has_act=has_act, alpha=alpha, eps=bn_eps,
                               out_dtype=out_dtype)
        x = y[:M, :cout].reshape(N, Ho, Wo, cout)

    return jnp.transpose(x, (0, 3, 1, 2)).astype(jnp.float32)     # -> NCHW


# ----------------------------------------------------------------------------
# Pure-JAX reference (correctness check only)
# ----------------------------------------------------------------------------
def reference_forward(params, x_nchw, t, *, ksize=4, stride=2, pad=1,
                      t_emb_dim=512, alpha=0.2, bn_eps=1e-5):
    n = len(params)
    x = x_nchw.astype(jnp.float32)
    t_emb = get_position_embedding(jnp.asarray(t), t_emb_dim)
    for i, p in enumerate(params):
        proj = jax.nn.silu(t_emb) @ p["t_w"].T + p["t_b"]
        x = x + proj[:, :, None, None]
        y = jax.lax.conv_general_dilated(
            x, p["conv_w"], window_strides=(stride, stride),
            padding=((pad, pad), (pad, pad)),
            dimension_numbers=("NCHW", "OIHW", "NCHW"),
            precision=jax.lax.Precision.HIGHEST)
        y = y + p["conv_b"][None, :, None, None]
        if (i != 0) and (i != n - 1):
            mean = jnp.mean(y, axis=(0, 2, 3), keepdims=True)
            var = jnp.mean((y - mean) ** 2, axis=(0, 2, 3), keepdims=True)
            y = (y - mean) / jnp.sqrt(var + bn_eps)
            y = (y * p["bn_gamma"][None, :, None, None]
                 + p["bn_beta"][None, :, None, None])
        if i != n - 1:
            y = jnp.where(y > 0, y, alpha * y)
        x = y
    return x


if __name__ == "__main__":
    key = jax.random.PRNGKey(0)
    kp, kx = jax.random.split(key)

    B, C, HW = 2, 4, 16                       # x: (2, 4, 16, 16) NCHW
    params = init_params(kp, img_channels=C)
    x = jax.random.normal(kx, (B, C, HW, HW), jnp.float32)
    t = jnp.array([3, 17], dtype=jnp.int32)   # per-sample diffusion timesteps

    out = forward(params, x, t)
    out = jax.block_until_ready(out)
    assert out.shape == (B, 1, 1, 1), out.shape

    ref = reference_forward(params, x, t)
    # bf16 MXU inputs (f32 accumulation) -> loosened tolerance vs HIGHEST ref.
    if not jnp.allclose(out, ref, rtol=5e-2, atol=1e-1):
        err = float(jnp.max(jnp.abs(out - ref)))
        raise AssertionError(
            f"Pallas output does not match JAX reference (max abs err {err})")

    print("KERNEL_OK")
</pallas_src>

<mosaic_0001>
module attributes {stable_mosaic.version = 11 : i64} {
  func.func @_fused_layer_kernel(%arg0: i32, %arg1: memref<8x512xbf16, #tpu.memory_space<vmem>>, %arg2: memref<512x512xbf16, #tpu.memory_space<vmem>>, %arg3: memref<8x512xf32, #tpu.memory_space<vmem>>, %arg4: memref<8x512xf32, #tpu.memory_space<vmem>>) attributes {dimension_semantics = [#tpu.dimension_semantics<arbitrary>], iteration_bounds = array<i64: 1>, scalar_prefetch = 0 : i64, scratch_operands = 0 : i64, tpu.core_type = #tpu.core_type<tc>, window_params = [{pipeline_mode = #tpu.pipeline_mode<synchronous>, transform_indices = @transform_0, window_bounds = array<i64: 8, 512>}, {pipeline_mode = #tpu.pipeline_mode<synchronous>, transform_indices = @transform_1, window_bounds = array<i64: 512, 512>}, {pipeline_mode = #tpu.pipeline_mode<synchronous>, transform_indices = @transform_2, window_bounds = array<i64: 8, 512>}, {pipeline_mode = #tpu.pipeline_mode<synchronous>, transform_indices = @transform_3, window_bounds = array<i64: 8, 512>}]} {
    %c0 = arith.constant 0 : index
    %c0_0 = arith.constant 0 : index
    %0 = vector.load %arg1[%c0, %c0_0] : memref<8x512xbf16, #tpu.memory_space<vmem>>, vector<8x512xbf16>
    %1 = arith.extf %0 : vector<8x512xbf16> to vector<8x512xf32>
    %cst = arith.constant 0.000000e+00 : f32
    %2 = vector.broadcast %cst : f32 to vector<8x512xf32>
    %3 = arith.subf %2, %1 : vector<8x512xf32>
    %4 = math.exp %3 : vector<8x512xf32>
    %cst_1 = arith.constant 1.000000e+00 : f32
    %5 = vector.broadcast %cst_1 : f32 to vector<8x512xf32>
    %6 = arith.addf %5, %4 : vector<8x512xf32>
    %cst_2 = arith.constant 1.000000e+00 : f32
    %7 = vector.broadcast %cst_2 : f32 to vector<8x512xf32>
    %8 = arith.divf %7, %6 : vector<8x512xf32>
    %9 = arith.mulf %1, %8 : vector<8x512xf32>
    %10 = arith.truncf %9 : vector<8x512xf32> to vector<8x512xbf16>
    %c0_3 = arith.constant 0 : index
    %c0_4 = arith.constant 0 : index
    %11 = vector.load %arg2[%c0_3, %c0_4] : memref<512x512xbf16, #tpu.memory_space<vmem>>, vector<512x512xbf16>
    %cst_5 = arith.constant dense<0.000000e+00> : vector<8x512xf32>
    %12 = tpu.matmul %10, %11, %cst_5 {dimension_numbers = #tpu.dot_dimension_numbers<[1], [0], [0], [1], [0, 0, 1, 1], [], []>} : vector<8x512xbf16>, vector<512x512xbf16>, vector<8x512xf32> -> vector<8x512xf32>
    %c0_6 = arith.constant 0 : index
    %c0_7 = arith.constant 0 : index
    %13 = vector.load %arg3[%c0_6, %c0_7] : memref<8x512xf32, #tpu.memory_space<vmem>>, vector<1x512xf32>
    %14 = vector.broadcast %13 : vector<1x512xf32> to vector<8x512xf32>
    %15 = arith.addf %12, %14 : vector<8x512xf32>
    %c0_8 = arith.constant 0 : index
    %c0_9 = arith.constant 0 : index
    %16 = vector.load %arg4[%c0_8, %c0_9] : memref<8x512xf32, #tpu.memory_space<vmem>>, vector<8x512xf32>
    tpu.vector_store %arg4[%c0_8, %c0_9], %15 {strides = array<i32>} : memref<8x512xf32, #tpu.memory_space<vmem>>, vector<8x512xf32>,
    return
  }
  func.func @transform_0(%arg0: i32) -> (i32, i32) {
    %c0_i32 = arith.constant 0 : i32
    %c0_i32_0 = arith.constant 0 : i32
    %c0_i32_1 = arith.constant 0 : i32
    return %c0_i32, %c0_i32_0 : i32, i32
  }
  func.func @transform_1(%arg0: i32) -> (i32, i32) {
    %c0_i32 = arith.constant 0 : i32
    %c0_i32_0 = arith.constant 0 : i32
    %c0_i32_1 = arith.constant 0 : i32
    return %c0_i32, %c0_i32_0 : i32, i32
  }
  func.func @transform_2(%arg0: i32) -> (i32, i32) {
    %c0_i32 = arith.constant 0 : i32
    %c0_i32_0 = arith.constant 0 : i32
    %c0_i32_1 = arith.constant 0 : i32
    return %c0_i32, %c0_i32_0 : i32, i32
  }
  func.func @transform_3(%arg0: i32) -> (i32, i32) {
    %c0_i32 = arith.constant 0 : i32
    %c0_i32_0 = arith.constant 0 : i32
    %c0_i32_1 = arith.constant 0 : i32
    return %c0_i32, %c0_i32_0 : i32, i32
  }
}

module attributes {stable_mosaic.version = 11 : i64} {
  func.func @_fused_layer_kernel(%arg0: i32, %arg1: memref<128x64xbf16, #tpu.memory_space<vmem>>, %arg2: memref<64x128xbf16, #tpu.memory_space<vmem>>, %arg3: memref<8x128xf32, #tpu.memory_space<vmem>>, %arg4: memref<128x128xbf16, #tpu.memory_space<vmem>>) attributes {dimension_semantics = [#tpu.dimension_semantics<arbitrary>], iteration_bounds = array<i64: 1>, scalar_prefetch = 0 : i64, scratch_operands = 0 : i64, tpu.core_type = #tpu.core_type<tc>, window_params = [{pipeline_mode = #tpu.pipeline_mode<synchronous>, transform_indices = @transform_0, window_bounds = array<i64: 128, 64>}, {pipeline_mode = #tpu.pipeline_mode<synchronous>, transform_indices = @transform_1, window_bounds = array<i64: 64, 128>}, {pipeline_mode = #tpu.pipeline_mode<synchronous>, transform_indices = @transform_2, window_bounds = array<i64: 8, 128>}, {pipeline_mode = #tpu.pipeline_mode<synchronous>, transform_indices = @transform_3, window_bounds = array<i64: 128, 128>}]} {
    %c0 = arith.constant 0 : index
    %c0_0 = arith.constant 0 : index
    %0 = vector.load %arg1[%c0, %c0_0] : memref<128x64xbf16, #tpu.memory_space<vmem>>, vector<128x64xbf16>
    %c0_1 = arith.constant 0 : index
    %c0_2 = arith.constant 0 : index
    %1 = vector.load %arg2[%c0_1, %c0_2] : memref<64x128xbf16, #tpu.memory_space<vmem>>, vector<64x128xbf16>
    %cst = arith.constant dense<0.000000e+00> : vector<128x128xf32>
    %2 = tpu.matmul %0, %1, %cst {dimension_numbers = #tpu.dot_dimension_numbers<[1], [0], [0], [1], [0, 0, 1, 1], [], []>} : vector<128x64xbf16>, vector<64x128xbf16>, vector<128x128xf32> -> vector<128x128xf32>
    %c0_3 = arith.constant 0 : index
    %c0_4 = arith.constant 0 : index
    %3 = vector.load %arg3[%c0_3, %c0_4] : memref<8x128xf32, #tpu.memory_space<vmem>>, vector<1x128xf32>
    %4 = vector.broadcast %3 : vector<1x128xf32> to vector<128x128xf32>
    %5 = arith.addf %2, %4 : vector<128x128xf32>
    %cst_5 = arith.constant 0.000000e+00 : f32
    %6 = vector.broadcast %cst_5 : f32 to vector<128x128xf32>
    %7 = arith.cmpf ogt, %5, %6 : vector<128x128xf32>
    %cst_6 = arith.constant 2.000000e-01 : f32
    %8 = vector.broadcast %cst_6 : f32 to vector<128x128xf32>
    %9 = arith.mulf %8, %5 : vector<128x128xf32>
    %10 = arith.select %7, %5, %9 : vector<128x128xi1>, vector<128x128xf32>
    %11 = arith.truncf %10 : vector<128x128xf32> to vector<128x128xbf16>
    %c0_7 = arith.constant 0 : index
    %c0_8 = arith.constant 0 : index
    %12 = vector.load %arg4[%c0_7, %c0_8] : memref<128x128xbf16, #tpu.memory_space<vmem>>, vector<128x128xbf16>
    tpu.vector_store %arg4[%c0_7, %c0_8], %11 {strides = array<i32>} : memref<128x128xbf16, #tpu.memory_space<vmem>>, vector<128x128xbf16>,
    return
  }
  func.func @transform_0(%arg0: i32) -> (i32, i32) {
    %c0_i32 = arith.constant 0 : i32
    %c0_i32_0 = arith.constant 0 : i32
    %c0_i32_1 = arith.constant 0 : i32
    return %c0_i32, %c0_i32_0 : i32, i32
  }
  func.func @transform_1(%arg0: i32) -> (i32, i32) {
    %c0_i32 = arith.constant 0 : i32
    %c0_i32_0 = arith.constant 0 : i32
    %c0_i32_1 = arith.constant 0 : i32
    return %c0_i32, %c0_i32_0 : i32, i32
  }
  func.func @transform_2(%arg0: i32) -> (i32, i32) {
    %c0_i32 = arith.constant 0 : i32
    %c0_i32_0 = arith.constant 0 : i32
    %c0_i32_1 = arith.constant 0 : i32
    return %c0_i32, %c0_i32_0 : i32, i32
  }
  func.func @transform_3(%arg0: i32) -> (i32, i32) {
    %c0_i32 = arith.constant 0 : i32
    %c0_i32_0 = arith.constant 0 : i32
    %c0_i32_1 = arith.constant 0 : i32
    return %c0_i32, %c0_i32_0 : i32, i32
  }
}

module attributes {stable_mosaic.version = 11 : i64} {
  func.func @_fused_layer_kernel(%arg0: i32, %arg1: memref<32x1024xbf16, #tpu.memory_space<vmem>>, %arg2: memref<1024x128xbf16, #tpu.memory_space<vmem>>, %arg3: memref<8x128xf32, #tpu.memory_space<vmem>>, %arg4: memref<32x128xbf16, #tpu.memory_space<vmem>>) attributes {dimension_semantics = [#tpu.dimension_semantics<arbitrary>], iteration_bounds = array<i64: 1>, scalar_prefetch = 0 : i64, scratch_operands = 0 : i64, tpu.core_type = #tpu.core_type<tc>, window_params = [{pipeline_mode = #tpu.pipeline_mode<synchronous>, transform_indices = @transform_0, window_bounds = array<i64: 32, 1024>}, {pipeline_mode = #tpu.pipeline_mode<synchronous>, transform_indices = @transform_1, window_bounds = array<i64: 1024, 128>}, {pipeline_mode = #tpu.pipeline_mode<synchronous>, transform_indices = @transform_2, window_bounds = array<i64: 8, 128>}, {pipeline_mode = #tpu.pipeline_mode<synchronous>, transform_indices = @transform_3, window_bounds = array<i64: 32, 128>}]} {
    %c0 = arith.constant 0 : index
    %c0_0 = arith.constant 0 : index
    %0 = vector.load %arg1[%c0, %c0_0] : memref<32x1024xbf16, #tpu.memory_space<vmem>>, vector<32x1024xbf16>
    %c0_1 = arith.constant 0 : index
    %c0_2 = arith.constant 0 : index
    %1 = vector.load %arg2[%c0_1, %c0_2] : memref<1024x128xbf16, #tpu.memory_space<vmem>>, vector<1024x128xbf16>
    %cst = arith.constant dense<0.000000e+00> : vector<32x128xf32>
    %2 = tpu.matmul %0, %1, %cst {dimension_numbers = #tpu.dot_dimension_numbers<[1], [0], [0], [1], [0, 0, 1, 1], [], []>} : vector<32x1024xbf16>, vector<1024x128xbf16>, vector<32x128xf32> -> vector<32x128xf32>
    %3 = tpu.iota {dimensions = array<i32: 0>} : vector<32x128xi32>
    %c32_i32 = arith.constant 32 : i32
    %4 = vector.broadcast %c32_i32 : i32 to vector<32x128xi32>
    %5 = arith.cmpi slt, %3, %4 : vector<32x128xi32>
    %cst_3 = arith.constant 0.000000e+00 : f32
    %6 = vector.broadcast %cst_3 : f32 to vector<32x128xf32>
    %7 = arith.select %5, %2, %6 : vector<32x128xi1>, vector<32x128xf32>
    %cst_4 = arith.constant dense<0.000000e+00> : vector<128xf32>
    %8 = vector.multi_reduction <add>, %7, %cst_4 [0] : vector<32x128xf32> to vector<128xf32>
    %9 = vector.shape_cast %8 : vector<128xf32> to vector<1x128xf32>
    %cst_5 = arith.constant 3.125000e-02 : f32
    %10 = vector.broadcast %cst_5 : f32 to vector<1x128xf32>
    %11 = arith.mulf %9, %10 : vector<1x128xf32>
    %12 = vector.broadcast %11 : vector<1x128xf32> to vector<32x128xf32>
    %13 = arith.subf %2, %12 : vector<32x128xf32>
    %cst_6 = arith.constant 0.000000e+00 : f32
    %14 = vector.broadcast %cst_6 : f32 to vector<32x128xf32>
    %15 = arith.select %5, %13, %14 : vector<32x128xi1>, vector<32x128xf32>
    %16 = arith.mulf %15, %15 : vector<32x128xf32>
    %cst_7 = arith.constant dense<0.000000e+00> : vector<128xf32>
    %17 = vector.multi_reduction <add>, %16, %cst_7 [0] : vector<32x128xf32> to vector<128xf32>
    %18 = vector.shape_cast %17 : vector<128xf32> to vector<1x128xf32>
    %cst_8 = arith.constant 3.125000e-02 : f32
    %19 = vector.broadcast %cst_8 : f32 to vector<1x128xf32>
    %20 = arith.mulf %18, %19 : vector<1x128xf32>
    %c1 = arith.constant 1 : index
    %c0_9 = arith.constant 0 : index
    %21 = vector.load %arg3[%c1, %c0_9] : memref<8x128xf32, #tpu.memory_space<vmem>>, vector<1x128xf32>
    %cst_10 = arith.constant 9.99999974E-6 : f32
    %22 = vector.broadcast %cst_10 : f32 to vector<1x128xf32>
    %23 = arith.addf %20, %22 : vector<1x128xf32>
    %24 = math.rsqrt %23 : vector<1x128xf32>
    %25 = arith.mulf %21, %24 : vector<1x128xf32>
    %c2 = arith.constant 2 : index
    %c0_11 = arith.constant 0 : index
    %26 = vector.load %arg3[%c2, %c0_11] : memref<8x128xf32, #tpu.memory_space<vmem>>, vector<1x128xf32>
    %27 = arith.mulf %11, %25 : vector<1x128xf32>
    %28 = arith.subf %26, %27 : vector<1x128xf32>
    %29 = vector.broadcast %25 : vector<1x128xf32> to vector<32x128xf32>
    %30 = arith.mulf %2, %29 : vector<32x128xf32>
    %31 = vector.broadcast %28 : vector<1x128xf32> to vector<32x128xf32>
    %32 = arith.addf %30, %31 : vector<32x128xf32>
    %cst_12 = arith.constant 0.000000e+00 : f32
    %33 = vector.broadcast %cst_12 : f32 to vector<32x128xf32>
    %34 = arith.cmpf ogt, %32, %33 : vector<32x128xf32>
    %cst_13 = arith.constant 2.000000e-01 : f32
    %35 = vector.broadcast %cst_13 : f32 to vector<32x128xf32>
    %36 = arith.mulf %35, %32 : vector<32x128xf32>
    %37 = arith.select %34, %32, %36 : vector<32x128xi1>, vector<32x128xf32>
    %38 = arith.truncf %37 : vector<32x128xf32> to vector<32x128xbf16>
    %c0_14 = arith.constant 0 : index
    %c0_15 = arith.constant 0 : index
    %39 = vector.load %arg4[%c0_14, %c0_15] : memref<32x128xbf16, #tpu.memory_space<vmem>>, vector<32x128xbf16>
    tpu.vector_store %arg4[%c0_14, %c0_15], %38 {strides = array<i32>} : memref<32x128xbf16, #tpu.memory_space<vmem>>, vector<32x128xbf16>,
    return
  }
  func.func @transform_0(%arg0: i32) -> (i32, i32) {
    %c0_i32 = arith.constant 0 : i32
    %c0_i32_0 = arith.constant 0 : i32
    %c0_i32_1 = arith.constant 0 : i32
    return %c0_i32, %c0_i32_0 : i32, i32
  }
  func.func @transform_1(%arg0: i32) -> (i32, i32) {
    %c0_i32 = arith.constant 0 : i32
    %c0_i32_0 = arith.constant 0 : i32
    %c0_i32_1 = arith.constant 0 : i32
    return %c0_i32, %c0_i32_0 : i32, i32
  }
  func.func @transform_2(%arg0: i32) -> (i32, i32) {
    %c0_i32 = arith.constant 0 : i32
    %c0_i32_0 = arith.constant 0 : i32
    %c0_i32_1 = arith.constant 0 : i32
    return %c0_i32, %c0_i32_0 : i32, i32
  }
  func.func @transform_3(%arg0: i32) -> (i32, i32) {
    %c0_i32 = arith.constant 0 : i32
    %c0_i32_0 = arith.constant 0 : i32
    %c0_i32_1 = arith.constant 0 : i32
    return %c0_i32, %c0_i32_0 : i32, i32
  }
}

module attributes {stable_mosaic.version = 11 : i64} {
  func.func @_fused_layer_kernel(%arg0: i32, %arg1: memref<8x2048xbf16, #tpu.memory_space<vmem>>, %arg2: memref<2048x256xbf16, #tpu.memory_space<vmem>>, %arg3: memref<8x256xf32, #tpu.memory_space<vmem>>, %arg4: memref<8x256xbf16, #tpu.memory_space<vmem>>) attributes {dimension_semantics = [#tpu.dimension_semantics<arbitrary>], iteration_bounds = array<i64: 1>, scalar_prefetch = 0 : i64, scratch_operands = 0 : i64, tpu.core_type = #tpu.core_type<tc>, window_params = [{pipeline_mode = #tpu.pipeline_mode<synchronous>, transform_indices = @transform_0, window_bounds = array<i64: 8, 2048>}, {pipeline_mode = #tpu.pipeline_mode<synchronous>, transform_indices = @transform_1, window_bounds = array<i64: 2048, 256>}, {pipeline_mode = #tpu.pipeline_mode<synchronous>, transform_indices = @transform_2, window_bounds = array<i64: 8, 256>}, {pipeline_mode = #tpu.pipeline_mode<synchronous>, transform_indices = @transform_3, window_bounds = array<i64: 8, 256>}]} {
    %c0 = arith.constant 0 : index
    %c0_0 = arith.constant 0 : index
    %0 = vector.load %arg1[%c0, %c0_0] : memref<8x2048xbf16, #tpu.memory_space<vmem>>, vector<8x2048xbf16>
    %c0_1 = arith.constant 0 : index
    %c0_2 = arith.constant 0 : index
    %1 = vector.load %arg2[%c0_1, %c0_2] : memref<2048x256xbf16, #tpu.memory_space<vmem>>, vector<2048x256xbf16>
    %cst = arith.constant dense<0.000000e+00> : vector<8x256xf32>
    %2 = tpu.matmul %0, %1, %cst {dimension_numbers = #tpu.dot_dimension_numbers<[1], [0], [0], [1], [0, 0, 1, 1], [], []>} : vector<8x2048xbf16>, vector<2048x256xbf16>, vector<8x256xf32> -> vector<8x256xf32>
    %3 = tpu.iota {dimensions = array<i32: 0>} : vector<8x256xi32>
    %c8_i32 = arith.constant 8 : i32
    %4 = vector.broadcast %c8_i32 : i32 to vector<8x256xi32>
    %5 = arith.cmpi slt, %3, %4 : vector<8x256xi32>
    %cst_3 = arith.constant 0.000000e+00 : f32
    %6 = vector.broadcast %cst_3 : f32 to vector<8x256xf32>
    %7 = arith.select %5, %2, %6 : vector<8x256xi1>, vector<8x256xf32>
    %cst_4 = arith.constant dense<0.000000e+00> : vector<256xf32>
    %8 = vector.multi_reduction <add>, %7, %cst_4 [0] : vector<8x256xf32> to vector<256xf32>
    %9 = vector.shape_cast %8 : vector<256xf32> to vector<1x256xf32>
    %cst_5 = arith.constant 1.250000e-01 : f32
    %10 = vector.broadcast %cst_5 : f32 to vector<1x256xf32>
    %11 = arith.mulf %9, %10 : vector<1x256xf32>
    %12 = vector.broadcast %11 : vector<1x256xf32> to vector<8x256xf32>
    %13 = arith.subf %2, %12 : vector<8x256xf32>
    %cst_6 = arith.constant 0.000000e+00 : f32
    %14 = vector.broadcast %cst_6 : f32 to vector<8x256xf32>
    %15 = arith.select %5, %13, %14 : vector<8x256xi1>, vector<8x256xf32>
    %16 = arith.mulf %15, %15 : vector<8x256xf32>
    %cst_7 = arith.constant dense<0.000000e+00> : vector<256xf32>
    %17 = vector.multi_reduction <add>, %16, %cst_7 [0] : vector<8x256xf32> to vector<256xf32>
    %18 = vector.shape_cast %17 : vector<256xf32> to vector<1x256xf32>
    %cst_8 = arith.constant 1.250000e-01 : f32
    %19 = vector.broadcast %cst_8 : f32 to vector<1x256xf32>
    %20 = arith.mulf %18, %19 : vector<1x256xf32>
    %c1 = arith.constant 1 : index
    %c0_9 = arith.constant 0 : index
    %21 = vector.load %arg3[%c1, %c0_9] : memref<8x256xf32, #tpu.memory_space<vmem>>, vector<1x256xf32>
    %cst_10 = arith.constant 9.99999974E-6 : f32
    %22 = vector.broadcast %cst_10 : f32 to vector<1x256xf32>
    %23 = arith.addf %20, %22 : vector<1x256xf32>
    %24 = math.rsqrt %23 : vector<1x256xf32>
    %25 = arith.mulf %21, %24 : vector<1x256xf32>
    %c2 = arith.constant 2 : index
    %c0_11 = arith.constant 0 : index
    %26 = vector.load %arg3[%c2, %c0_11] : memref<8x256xf32, #tpu.memory_space<vmem>>, vector<1x256xf32>
    %27 = arith.mulf %11, %25 : vector<1x256xf32>
    %28 = arith.subf %26, %27 : vector<1x256xf32>
    %29 = vector.broadcast %25 : vector<1x256xf32> to vector<8x256xf32>
    %30 = arith.mulf %2, %29 : vector<8x256xf32>
    %31 = vector.broadcast %28 : vector<1x256xf32> to vector<8x256xf32>
    %32 = arith.addf %30, %31 : vector<8x256xf32>
    %cst_12 = arith.constant 0.000000e+00 : f32
    %33 = vector.broadcast %cst_12 : f32 to vector<8x256xf32>
    %34 = arith.cmpf ogt, %32, %33 : vector<8x256xf32>
    %cst_13 = arith.constant 2.000000e-01 : f32
    %35 = vector.broadcast %cst_13 : f32 to vector<8x256xf32>
    %36 = arith.mulf %35, %32 : vector<8x256xf32>
    %37 = arith.select %34, %32, %36 : vector<8x256xi1>, vector<8x256xf32>
    %38 = arith.truncf %37 : vector<8x256xf32> to vector<8x256xbf16>
    %c0_14 = arith.constant 0 : index
    %c0_15 = arith.constant 0 : index
    %39 = vector.load %arg4[%c0_14, %c0_15] : memref<8x256xbf16, #tpu.memory_space<vmem>>, vector<8x256xbf16>
    tpu.vector_store %arg4[%c0_14, %c0_15], %38 {strides = array<i32>} : memref<8x256xbf16, #tpu.memory_space<vmem>>, vector<8x256xbf16>,
    return
  }
  func.func @transform_0(%arg0: i32) -> (i32, i32) {
    %c0_i32 = arith.constant 0 : i32
    %c0_i32_0 = arith.constant 0 : i32
    %c0_i32_1 = arith.constant 0 : i32
    return %c0_i32, %c0_i32_0 : i32, i32
  }
  func.func @transform_1(%arg0: i32) -> (i32, i32) {
    %c0_i32 = arith.constant 0 : i32
    %c0_i32_0 = arith.constant 0 : i32
    %c0_i32_1 = arith.constant 0 : i32
    return %c0_i32, %c0_i32_0 : i32, i32
  }
  func.func @transform_2(%arg0: i32) -> (i32, i32) {
    %c0_i32 = arith.constant 0 : i32
    %c0_i32_0 = arith.constant 0 : i32
    %c0_i32_1 = arith.constant 0 : i32
    return %c0_i32, %c0_i32_0 : i32, i32
  }
  func.func @transform_3(%arg0: i32) -> (i32, i32) {
    %c0_i32 = arith.constant 0 : i32
    %c0_i32_0 = arith.constant 0 : i32
    %c0_i32_1 = arith.constant 0 : i32
    return %c0_i32, %c0_i32_0 : i32, i32
  }
}

module attributes {stable_mosaic.version = 11 : i64} {
  func.func @_fused_layer_kernel(%arg0: i32, %arg1: memref<8x4096xbf16, #tpu.memory_space<vmem>>, %arg2: memref<4096x128xbf16, #tpu.memory_space<vmem>>, %arg3: memref<8x128xf32, #tpu.memory_space<vmem>>, %arg4: memref<8x128xf32, #tpu.memory_space<vmem>>) attributes {dimension_semantics = [#tpu.dimension_semantics<arbitrary>], iteration_bounds = array<i64: 1>, scalar_prefetch = 0 : i64, scratch_operands = 0 : i64, tpu.core_type = #tpu.core_type<tc>, window_params = [{pipeline_mode = #tpu.pipeline_mode<synchronous>, transform_indices = @transform_0, window_bounds = array<i64: 8, 4096>}, {pipeline_mode = #tpu.pipeline_mode<synchronous>, transform_indices = @transform_1, window_bounds = array<i64: 4096, 128>}, {pipeline_mode = #tpu.pipeline_mode<synchronous>, transform_indices = @transform_2, window_bounds = array<i64: 8, 128>}, {pipeline_mode = #tpu.pipeline_mode<synchronous>, transform_indices = @transform_3, window_bounds = array<i64: 8, 128>}]} {
    %c0 = arith.constant 0 : index
    %c0_0 = arith.constant 0 : index
    %0 = vector.load %arg1[%c0, %c0_0] : memref<8x4096xbf16, #tpu.memory_space<vmem>>, vector<8x4096xbf16>
    %c0_1 = arith.constant 0 : index
    %c0_2 = arith.constant 0 : index
    %1 = vector.load %arg2[%c0_1, %c0_2] : memref<4096x128xbf16, #tpu.memory_space<vmem>>, vector<4096x128xbf16>
    %cst = arith.constant dense<0.000000e+00> : vector<8x128xf32>
    %2 = tpu.matmul %0, %1, %cst {dimension_numbers = #tpu.dot_dimension_numbers<[1], [0], [0], [1], [0, 0, 1, 1], [], []>} : vector<8x4096xbf16>, vector<4096x128xbf16>, vector<8x128xf32> -> vector<8x128xf32>
    %c0_3 = arith.constant 0 : index
    %c0_4 = arith.constant 0 : index
    %3 = vector.load %arg4[%c0_3, %c0_4] : memref<8x128xf32, #tpu.memory_space<vmem>>, vector<8x128xf32>
    tpu.vector_store %arg4[%c0_3, %c0_4], %2 {strides = array<i32>} : memref<8x128xf32, #tpu.memory_space<vmem>>, vector<8x128xf32>,
    return
  }
  func.func @transform_0(%arg0: i32) -> (i32, i32) {
    %c0_i32 = arith.constant 0 : i32
    %c0_i32_0 = arith.constant 0 : i32
    %c0_i32_1 = arith.constant 0 : i32
    return %c0_i32, %c0_i32_0 : i32, i32
  }
  func.func @transform_1(%arg0: i32) -> (i32, i32) {
    %c0_i32 = arith.constant 0 : i32
    %c0_i32_0 = arith.constant 0 : i32
    %c0_i32_1 = arith.constant 0 : i32
    return %c0_i32, %c0_i32_0 : i32, i32
  }
  func.func @transform_2(%arg0: i32) -> (i32, i32) {
    %c0_i32 = arith.constant 0 : i32
    %c0_i32_0 = arith.constant 0 : i32
    %c0_i32_1 = arith.constant 0 : i32
    return %c0_i32, %c0_i32_0 : i32, i32
  }
  func.func @transform_3(%arg0: i32) -> (i32, i32) {
    %c0_i32 = arith.constant 0 : i32
    %c0_i32_0 = arith.constant 0 : i32
    %c0_i32_1 = arith.constant 0 : i32
    return %c0_i32, %c0_i32_0 : i32, i32
  }
}

</mosaic_0001>

<bundles_post_ra>
// kernel: forward.5
= control target key start
LH: loop header
LB: loop body
LE: loop exit
PB: predicated region body
PF: predicated region fallthrough
CT: control target
= control target key end

     0   :  { %s1811_s1 = inlined_call_operand.vmem [shape: bf16[512,512], index: 1, kind: input, shape index: {}]   ;;  %s1812_s0 = inlined_call_operand.vmem [shape: bf16[8,512], index: 0, kind: input, shape index: {}]   ;;  %s1813_s2 = inlined_call_operand.vmem [shape: f32[8,512], index: 2, kind: input, shape index: {}]   ;;  %s1814_s3 = inlined_call_operand.vmem [shape: f32[8,512], index: 3, kind: output, shape index: {}]  }
   0x1   :  { %v1154_v0 = vld [vmem:[%s1811_s1 + $0x4] ss:$16 sps:$4 sm:$0xff]   ;;  %v1156_v1 = vld [vmem:[%s1811_s1 + $0xc] ss:$16 sps:$4 sm:$0xff]   ;;  %v1158_v2 = vld [vmem:[%s1811_s1] ss:$16 sps:$4 sm:$0xff]  }
   0x2   :  { %842 = vmatprep.subr.bf16.mxu0 %v1154_v0  ;;  %v1159_v3 = vld [vmem:[%s1811_s1 + $0x8] ss:$16 sps:$4 sm:$0xff]   ;;  %924 = vmatprep.subr.bf16.mxu1 %v1156_v1  ;;  %v1160_v4 = vld [vmem:[%s1811_s1 + $0x24] ss:$16 sps:$4 sm:$0xff]   ;;  %v1162_v5 = vld [vmem:[%s1811_s1 + $0x2c] ss:$16 sps:$4 sm:$0xff]  }
   0x3   :  { %843 = vmatpush1.bf16.msra.mxu0 %v1158_v2  ;;  %925 = vmatpush1.bf16.msra.mxu1 %v1159_v3  ;;  %v1164_v6 = vld [vmem:[%s1811_s1 + $0x20] ss:$16 sps:$4 sm:$0xff]   ;;  %v1165_v7 = vld [vmem:[%s1811_s1 + $0x28] ss:$16 sps:$4 sm:$0xff]   ;;  %v1166_v8 = vld [vmem:[%s1811_s1 + $0x44] ss:$16 sps:$4 sm:$0xff]  }
   0x4   :  { %844 = vmatprep.subr.bf16.mxu0 %v1160_v4  ;;  %926 = vmatprep.subr.bf16.mxu1 %v1162_v5  ;;  %v1168_v9 = vld [vmem:[%s1811_s1 + $0x4c] ss:$16 sps:$4 sm:$0xff]   ;;  %v1170_v10 = vld [vmem:[%s1811_s1 + $0x40] ss:$16 sps:$4 sm:$0xff]   ;;  %v1171_v11 = vld [vmem:[%s1811_s1 + $0x48] ss:$16 sps:$4 sm:$0xff]  }
   0x5   :  { %v1172_v12 = vld [vmem:[%s1811_s1 + $0x64] ss:$16 sps:$4 sm:$0xff]   ;;  %v1174_v13 = vld [vmem:[%s1811_s1 + $0x6c] ss:$16 sps:$4 sm:$0xff]   ;;  %v1176_v14 = vld [vmem:[%s1811_s1 + $0x60] ss:$16 sps:$4 sm:$0xff]  }
   0x6   :  { %v1177_v15 = vld [vmem:[%s1811_s1 + $0x68] ss:$16 sps:$4 sm:$0xff]   ;;  %v1178_v16 = vld [vmem:[%s1811_s1 + $0x84] ss:$16 sps:$4 sm:$0xff]   ;;  %v1180_v17 = vld [vmem:[%s1811_s1 + $0x8c] ss:$16 sps:$4 sm:$0xff]  }
   0x7   :  { %845 = vmatpush1.bf16.msra.mxu0 %v1164_v6  ;;  %927 = vmatpush1.bf16.msra.mxu1 %v1165_v7  ;;  %v1182_v18 = vld [vmem:[%s1811_s1 + $0x80] ss:$16 sps:$4 sm:$0xff]   ;;  %v1183_v19 = vld [vmem:[%s1811_s1 + $0x88] ss:$16 sps:$4 sm:$0xff]   ;;  %v1184_v20 = vld [vmem:[%s1811_s1 + $0xa4] ss:$16 sps:$4 sm:$0xff]  }
   0x8   :  { %846 = vmatprep.subr.bf16.mxu0 %v1166_v8  ;;  %928 = vmatprep.subr.bf16.mxu1 %v1168_v9  ;;  %v1186_v21 = vld [vmem:[%s1811_s1 + $0xac] ss:$16 sps:$4 sm:$0xff]   ;;  %v1188_v22 = vld [vmem:[%s1811_s1 + $0xa0] ss:$16 sps:$4 sm:$0xff]   ;;  %v1189_v23 = vld [vmem:[%s1811_s1 + $0xa8] ss:$16 sps:$4 sm:$0xff]  }
   0x9   :  { %v1190_v24 = vld [vmem:[%s1811_s1 + $0xc4] ss:$16 sps:$4 sm:$0xff]   ;;  %v1192_v25 = vld [vmem:[%s1811_s1 + $0xcc] ss:$16 sps:$4 sm:$0xff]   ;;  %v1194_v26 = vld [vmem:[%s1811_s1 + $0xc0] ss:$16 sps:$4 sm:$0xff]  }
   0xa   :  { %v1195_v27 = vld [vmem:[%s1811_s1 + $0xc8] ss:$16 sps:$4 sm:$0xff]   ;;  %v1196_v28 = vld [vmem:[%s1811_s1 + $0xe4] ss:$16 sps:$4 sm:$0xff]   ;;  %v1198_v29 = vld [vmem:[%s1811_s1 + $0xec] ss:$16 sps:$4 sm:$0xff]  }
   0xb   :  { %847 = vmatpush1.bf16.msra.mxu0 %v1170_v10  ;;  %929 = vmatpush1.bf16.msra.mxu1 %v1171_v11  ;;  %v1200_v30 = vld [vmem:[%s1811_s1 + $0xe0] ss:$16 sps:$4 sm:$0xff]   ;;  %v1201_v31 = vld [vmem:[%s1811_s1 + $0xe8] ss:$16 sps:$4 sm:$0xff]   ;;  %v1202_v32 = vld [vmem:[%s1811_s1 + $0x104] ss:$16 sps:$4 sm:$0xff]  }
   0xc   :  { %848 = vmatprep.subr.bf16.mxu0 %v1172_v12  ;;  %930 = vmatprep.subr.bf16.mxu1 %v1174_v13  ;;  %v1204_v33 = vld [vmem:[%s1811_s1 + $0x10c] ss:$16 sps:$4 sm:$0xff]   ;;  %v1206_v34 = vld [vmem:[%s1811_s1 + $0x100] ss:$16 sps:$4 sm:$0xff]   ;;  %v1207_v35 = vld [vmem:[%s1811_s1 + $0x108] ss:$16 sps:$4 sm:$0xff]  }
   0xd   :  { %v1208_v36 = vld [vmem:[%s1811_s1 + $0x124] ss:$16 sps:$4 sm:$0xff]   ;;  %v1210_v37 = vld [vmem:[%s1811_s1 + $0x12c] ss:$16 sps:$4 sm:$0xff]   ;;  %v1212_v38 = vld [vmem:[%s1811_s1 + $0x120] ss:$16 sps:$4 sm:$0xff]  }
   0xe   :  { %v1213_v39 = vld [vmem:[%s1811_s1 + $0x128] ss:$16 sps:$4 sm:$0xff]   ;;  %v1214_v40 = vld [vmem:[%s1811_s1 + $0x144] ss:$16 sps:$4 sm:$0xff]   ;;  %v1216_v41 = vld [vmem:[%s1811_s1 + $0x14c] ss:$16 sps:$4 sm:$0xff]  }
   0xf   :  { %849 = vmatpush1.bf16.msra.mxu0 %v1176_v14  ;;  %931 = vmatpush1.bf16.msra.mxu1 %v1177_v15  ;;  %v1218_v42 = vld [vmem:[%s1811_s1 + $0x140] ss:$16 sps:$4 sm:$0xff]   ;;  %v1219_v43 = vld [vmem:[%s1811_s1 + $0x148] ss:$16 sps:$4 sm:$0xff]   ;;  %v1220_v44 = vld [vmem:[%s1811_s1 + $0x164] ss:$16 sps:$4 sm:$0xff]  }
  0x10   :  { %850 = vmatprep.subr.bf16.mxu0 %v1178_v16  ;;  %932 = vmatprep.subr.bf16.mxu1 %v1180_v17  ;;  %v1222_v45 = vld [vmem:[%s1811_s1 + $0x16c] ss:$16 sps:$4 sm:$0xff]   ;;  %v1224_v46 = vld [vmem:[%s1811_s1 + $0x160] ss:$16 sps:$4 sm:$0xff]   ;;  %v1225_v51 = vld [vmem:[%s1811_s1 + $0x168] ss:$16 sps:$4 sm:$0xff]  }
  0x11   :  { %v1526_v47 = vld [vmem:[%s1812_s0] sm:$0xff]  ;;  %v1531_v48 = vld [vmem:[%s1812_s0 + $0x8] sm:$0xff] }
  0x12   :  { %v16_v49 = vunpack.c.l.bf16 %v1526_v47  ;;  %v17_v50 = vunpack.c.h.bf16 %v1526_v47  ;;  %v1226_v52 = vld [vmem:[%s1811_s1 + $0x184] ss:$16 sps:$4 sm:$0xff]   ;;  %v1228_v53 = vld [vmem:[%s1811_s1 + $0x18c] ss:$16 sps:$4 sm:$0xff]   ;;  %v19_v56 = vunpack.c.h.bf16 %v1531_v48  ;;  %v1230_v57 = vld [vmem:[%s1811_s1 + $0x180] ss:$16 sps:$4 sm:$0xff]  }
  0x13   :  { %851 = vmatpush1.bf16.msra.mxu0 %v1182_v18  ;;  %933 = vmatpush1.bf16.msra.mxu1 %v1183_v19  ;;  %v1231_v58 = vld [vmem:[%s1811_s1 + $0x188] ss:$16 sps:$4 sm:$0xff]   ;;  %v1232_v61 = vld [vmem:[%s1811_s1 + $0x1a4] ss:$16 sps:$4 sm:$0xff]   ;;  %v1234_v62 = vld [vmem:[%s1811_s1 + $0x1ac] ss:$16 sps:$4 sm:$0xff]  }
  0x14   :  { %852 = vmatprep.subr.bf16.mxu0 %v1184_v20  ;;  %934 = vmatprep.subr.bf16.mxu1 %v1186_v21  ;;  %v20_v54 = vsub.f32 0.0, %v16_v49  ;;  %v21_v55 = vsub.f32 0.0, %v17_v50  ;;  %v23_v63 = vsub.f32 0.0, %v19_v56  ;;  %v1236_v0 = vld [vmem:[%s1811_s1 + $0x1a0] ss:$16 sps:$4 sm:$0xff]  }
  0x15   :  { %v1237_v1 = vld [vmem:[%s1811_s1 + $0x1a8] ss:$16 sps:$4 sm:$0xff]   ;;  %v1238_v2 = vld [vmem:[%s1811_s1 + $0x1c4] ss:$16 sps:$4 sm:$0xff]   ;;  %v1240_v4 = vld [vmem:[%s1811_s1 + $0x1cc] ss:$16 sps:$4 sm:$0xff]  }
  0x16   :  { %v24_v59 = vmul.f32 1.442695, %v20_v54  ;;  %v26_v60 = vmul.f32 1.442695, %v21_v55  ;;  %v30_v3 = vmul.f32 1.442695, %v23_v63 }
  0x17   :  { %853 = vmatpush1.bf16.msra.mxu0 %v1188_v22  ;;  %935 = vmatpush1.bf16.msra.mxu1 %v1189_v23  ;;  %v1242_v5 = vld [vmem:[%s1811_s1 + $0x1c0] ss:$16 sps:$4 sm:$0xff]   ;;  %v1243_v6 = vld [vmem:[%s1811_s1 + $0x1c8] ss:$16 sps:$4 sm:$0xff]   ;;  %v1244_v7 = vld [vmem:[%s1811_s1 + $0x1e4] ss:$16 sps:$4 sm:$0xff]  }
  0x18   :  { %854 = vmatprep.subr.bf16.mxu0 %v1190_v24  ;;  %936 = vmatprep.subr.bf16.mxu1 %v1192_v25  ;;  %1346 = vpow2.f32 %v24_v59  ;;  %v1246_v8 = vld [vmem:[%s1811_s1 + $0x1ec] ss:$16 sps:$4 sm:$0xff]   ;;  %v1248_v10 = vld [vmem:[%s1811_s1 + $0x1e0] ss:$16 sps:$4 sm:$0xff]   ;;  %v1249_v11 = vld [vmem:[%s1811_s1 + $0x1e8] ss:$16 sps:$4 sm:$0xff]  }
  0x19   :  { %1348 = vpow2.f32 %v26_v60  ;;  %v1252_v14 = vld [vmem:[%s1811_s1 + $0x204] ss:$16 sps:$4 sm:$0xff]   ;;  %v1255_v16 = vld [vmem:[%s1811_s1 + $0x20c] ss:$16 sps:$4 sm:$0xff]   ;;  %v1250_v23 = vld [vmem:[%s1811_s1 + $0x200] ss:$16 sps:$4 sm:$0xff]  }
  0x1a   :  { %1350 = vpow2.f32 %v30_v3  ;;  %v1253_v24 = vld [vmem:[%s1811_s1 + $0x208] ss:$16 sps:$4 sm:$0xff]   ;;  %v1282_v47 = vld [vmem:[%s1811_s1 + $0x2a4] ss:$16 sps:$4 sm:$0xff]   ;;  %v1291_v54 = vld [vmem:[%s1811_s1 + $0x2cc] ss:$16 sps:$4 sm:$0xff]  }
  0x1b   :  { %855 = vmatpush1.bf16.msra.mxu0 %v1194_v26  ;;  %937 = vmatpush1.bf16.msra.mxu1 %v1195_v27  ;;  %v1258_v27 = vld [vmem:[%s1811_s1 + $0x224] ss:$16 sps:$4 sm:$0xff]   ;;  %v1286_v55 = vld [vmem:[%s1811_s1 + $0x2c0] ss:$16 sps:$4 sm:$0xff]   ;;  %v1297_v59 = vld [vmem:[%s1811_s1 + $0x2ec] ss:$16 sps:$4 sm:$0xff]  }
  0x1c   :  { %856 = vmatprep.subr.bf16.mxu0 %v1196_v28  ;;  %938 = vmatprep.subr.bf16.mxu1 %v1198_v29  ;;  %v1261_v29 = vld [vmem:[%s1811_s1 + $0x22c] ss:$16 sps:$4 sm:$0xff]   ;;  %v1292_v60 = vld [vmem:[%s1811_s1 + $0x2e0] ss:$16 sps:$4 sm:$0xff]  }
  0x1d   :  { %v1303_v63 = vld [vmem:[%s1811_s1 + $0x30c] ss:$16 sps:$4 sm:$0xff]  }
  0x1e   :  { %v1309_v3 = vld [vmem:[%s1811_s1 + $0x32c] ss:$16 sps:$4 sm:$0xff]  }
  0x1f   :  { %857 = vmatpush1.bf16.msra.mxu0 %v1200_v30  ;;  %939 = vmatpush1.bf16.msra.mxu1 %v1201_v31  ;;  %v1256_v31 = vld [vmem:[%s1811_s1 + $0x220] ss:$16 sps:$4 sm:$0xff]  }
  0x20   :  { %858 = vmatprep.subr.bf16.mxu0 %v1202_v32  ;;  %940 = vmatprep.subr.bf16.mxu1 %v1204_v33  ;;  %v1259_v32 = vld [vmem:[%s1811_s1 + $0x228] ss:$16 sps:$4 sm:$0xff]   ;;  %v1264_v33 = vld [vmem:[%s1811_s1 + $0x244] ss:$16 sps:$4 sm:$0xff]  }
  0x22   :  { %v1347_v9 = vpop.eup %1346 }
  0x23   :  { %859 = vmatpush1.bf16.msra.mxu0 %v1206_v34  ;;  %941 = vmatpush1.bf16.msra.mxu1 %v1207_v35  ;;  %v1349_v12 = vpop.eup %1348  ;;  %v32_v13 = vadd.f32 1.0, %v1347_v9  ;;  %v1267_v35 = vld [vmem:[%s1811_s1 + $0x24c] ss:$16 sps:$4 sm:$0xff]   ;;  %v1310_v9 = vld [vmem:[%s1811_s1 + $0x340] ss:$16 sps:$4 sm:$0xff]  }
  0x24   :  { %860 = vmatprep.subr.bf16.mxu0 %v1208_v36  ;;  %942 = vmatprep.subr.bf16.mxu1 %v1210_v37  ;;  %v33_v15 = vadd.f32 1.0, %v1349_v12  ;;  %v1351_v17 = vpop.eup %1350  ;;  %v1262_v36 = vld [vmem:[%s1811_s1 + $0x240] ss:$16 sps:$4 sm:$0xff]   ;;  %v1265_v37 = vld [vmem:[%s1811_s1 + $0x248] ss:$16 sps:$4 sm:$0xff]  }
  0x25   :  { %1352 = vrcp.f32 %v32_v13  ;;  %v35_v18 = vadd.f32 1.0, %v1351_v17  ;;  %v1321_v12 = vld [vmem:[%s1811_s1 + $0x36c] ss:$16 sps:$4 sm:$0xff]  }
  0x26   :  { %1354 = vrcp.f32 %v33_v15  ;;  %v1319_v15 = vld [vmem:[%s1811_s1 + $0x368] ss:$16 sps:$4 sm:$0xff]   ;;  %v1327_v17 = vld [vmem:[%s1811_s1 + $0x38c] ss:$16 sps:$4 sm:$0xff]  }
  0x27   :  { %861 = vmatpush1.bf16.msra.mxu0 %v1212_v38  ;;  %943 = vmatpush1.bf16.msra.mxu1 %v1213_v39  ;;  %1356 = vrcp.f32 %v35_v18  ;;  %v1270_v38 = vld [vmem:[%s1811_s1 + $0x264] ss:$16 sps:$4 sm:$0xff]   ;;  %v1273_v39 = vld [vmem:[%s1811_s1 + $0x26c] ss:$16 sps:$4 sm:$0xff]   ;;  %v1322_v18 = vld [vmem:[%s1811_s1 + $0x380] ss:$16 sps:$4 sm:$0xff]  }
  0x28   :  { %862 = vmatprep.subr.bf16.mxu0 %v1214_v40  ;;  %944 = vmatprep.subr.bf16.mxu1 %v1216_v41  ;;  %v1268_v40 = vld [vmem:[%s1811_s1 + $0x260] ss:$16 sps:$4 sm:$0xff]   ;;  %v1271_v41 = vld [vmem:[%s1811_s1 + $0x268] ss:$16 sps:$4 sm:$0xff]  }
  0x2b   :  { %863 = vmatpush1.bf16.msra.mxu0 %v1218_v42  ;;  %945 = vmatpush1.bf16.msra.mxu1 %v1219_v43  ;;  %v1276_v42 = vld [vmem:[%s1811_s1 + $0x284] ss:$16 sps:$4 sm:$0xff]   ;;  %v1279_v43 = vld [vmem:[%s1811_s1 + $0x28c] ss:$16 sps:$4 sm:$0xff]  }
  0x2c   :  { %864 = vmatprep.subr.bf16.mxu0 %v1220_v44  ;;  %946 = vmatprep.subr.bf16.mxu1 %v1222_v45  ;;  %v1274_v44 = vld [vmem:[%s1811_s1 + $0x280] ss:$16 sps:$4 sm:$0xff]   ;;  %v1277_v45 = vld [vmem:[%s1811_s1 + $0x288] ss:$16 sps:$4 sm:$0xff]  }
  0x2f   :  { %865 = vmatpush1.bf16.msra.mxu0 %v1224_v46  ;;  %947 = vmatpush1.bf16.msra.mxu1 %v1225_v51  ;;  %v1353_v19 = vpop.eup %1352  ;;  %v18_v46 = vunpack.c.l.bf16 %v1531_v48  ;;  %v1283_v51 = vld [vmem:[%s1811_s1 + $0x2a8] ss:$16 sps:$4 sm:$0xff]  }
  0x30   :  { %866 = vmatprep.subr.bf16.mxu0 %v1226_v52  ;;  %948 = vmatprep.subr.bf16.mxu1 %v1228_v53  ;;  %v1355_v20 = vpop.eup %1354  ;;  %v44_v21 = vmul.f32 %v1353_v19, %v16_v49  ;;  %v1285_v49 = vld [vmem:[%s1811_s1 + $0x2ac] ss:$16 sps:$4 sm:$0xff]   ;;  %v1288_v53 = vld [vmem:[%s1811_s1 + $0x2c4] ss:$16 sps:$4 sm:$0xff]   ;;  %v1325_v19 = vld [vmem:[%s1811_s1 + $0x388] ss:$16 sps:$4 sm:$0xff]  }
  0x31   :  { %v45_v22 = vmul.f32 %v1355_v20, %v17_v50  ;;  %v1357_v28 = vpop.eup %1356  ;;  %v1280_v50 = vld [vmem:[%s1811_s1 + $0x2a0] ss:$16 sps:$4 sm:$0xff]   ;;  %v22_v52 = vsub.f32 0.0, %v18_v46  ;;  %v1330_v20 = vld [vmem:[%s1811_s1 + $0x3a4] ss:$16 sps:$4 sm:$0xff]  }
  0x32   :  { %v48_v25 = vpack.c.bf16 %v44_v21, %v44_v21  ;;  %v47_v30 = vmul.f32 %v1357_v28, %v19_v56  ;;  %v1289_v56 = vld [vmem:[%s1811_s1 + $0x2c8] ss:$16 sps:$4 sm:$0xff]   ;;  %v1333_v21 = vld [vmem:[%s1811_s1 + $0x3ac] ss:$16 sps:$4 sm:$0xff]  }
  0x33   :  { %867 = vmatpush1.bf16.msra.mxu0 %v1230_v57  ;;  %949 = vmatpush1.bf16.msra.mxu1 %v1231_v58  ;;  %v49_v26 = vpack.c.bf16 %v45_v22, %v45_v22  ;;  %v28_v57 = vmul.f32 1.442695, %v22_v52  ;;  %v1294_v58 = vld [vmem:[%s1811_s1 + $0x2e4] ss:$16 sps:$4 sm:$0xff]   ;;  %v1328_v22 = vld [vmem:[%s1811_s1 + $0x3a0] ss:$16 sps:$4 sm:$0xff]  }
  0x34   :  { %868 = vmatprep.subr.bf16.mxu0 %v1232_v61  ;;  %950 = vmatprep.subr.bf16.mxu1 %v1234_v62  ;;  %v51_v34 = vpack.c.bf16 %v47_v30, %v47_v30  ;;  %v1295_v61 = vld [vmem:[%s1811_s1 + $0x2e8] ss:$16 sps:$4 sm:$0xff]   ;;  %v1300_v62 = vld [vmem:[%s1811_s1 + $0x304] ss:$16 sps:$4 sm:$0xff]   ;;  %v1345_v30 = vld [vmem:[%s1811_s1 + $0x3ec] ss:$16 sps:$4 sm:$0xff]  }
  0x35   :  { %874 = vmatprep.mubr.bf16.mxu0 %v49_v26  ;;  %956 = vmatprep.mubr.bf16.mxu1 %v49_v26  ;;  %1358 = vpow2.f32 %v28_v57  ;;  %v1337_v28 = vld [vmem:[%s1811_s1 + $0x3c8] ss:$16 sps:$4 sm:$0xff]  }
  0x37   :  { %869 = vmatpush1.bf16.msra.mxu0 %v1236_v0  ;;  %951 = vmatpush1.bf16.msra.mxu1 %v1237_v1  ;;  %v1298_v0 = vld [vmem:[%s1811_s1 + $0x300] ss:$16 sps:$4 sm:$0xff]   ;;  %v1301_v1 = vld [vmem:[%s1811_s1 + $0x308] ss:$16 sps:$4 sm:$0xff]  }
  0x38   :  { %870 = vmatprep.subr.bf16.mxu0 %v1238_v2  ;;  %952 = vmatprep.subr.bf16.mxu1 %v1240_v4  ;;  %v1306_v2 = vld [vmem:[%s1811_s1 + $0x324] ss:$16 sps:$4 sm:$0xff]   ;;  %v1304_v4 = vld [vmem:[%s1811_s1 + $0x320] ss:$16 sps:$4 sm:$0xff]  }
  0x3b   :  { %871 = vmatpush1.bf16.msra.mxu0 %v1242_v5  ;;  %953 = vmatpush1.bf16.msra.mxu1 %v1243_v6  ;;  %v1307_v5 = vld [vmem:[%s1811_s1 + $0x328] ss:$16 sps:$4 sm:$0xff]   ;;  %v1312_v6 = vld [vmem:[%s1811_s1 + $0x344] ss:$16 sps:$4 sm:$0xff]  }
  0x3c   :  { %872 = vmatprep.subr.bf16.mxu0 %v1244_v7  ;;  %954 = vmatprep.subr.bf16.mxu1 %v1246_v8  ;;  %v1315_v7 = vld [vmem:[%s1811_s1 + $0x34c] ss:$16 sps:$4 sm:$0xff]  }
  0x3f   :  { %873 = vmatpush1.bf16.msra.mxu0 %v1248_v10  ;;  %955 = vmatpush1.bf16.msra.mxu1 %v1249_v11  ;;  %v1359_v8 = vpop.eup %1358  ;;  %v1313_v10 = vld [vmem:[%s1811_s1 + $0x348] ss:$16 sps:$4 sm:$0xff]   ;;  %v1318_v11 = vld [vmem:[%s1811_s1 + $0x364] ss:$16 sps:$4 sm:$0xff]  }
  0x40   :  { %883 = vmatprep.subr.bf16.mxu0 %v1252_v14  ;;  %965 = vmatprep.subr.bf16.mxu1 %v1255_v16  ;;  %v34_v13 = vadd.f32 1.0, %v1359_v8  ;;  %v1316_v14 = vld [vmem:[%s1811_s1 + $0x360] ss:$16 sps:$4 sm:$0xff]   ;;  %v1324_v16 = vld [vmem:[%s1811_s1 + $0x384] ss:$16 sps:$4 sm:$0xff]  }
  0x42   :  { %875 = vmatmul.mubr.bf16.vlgmr.msra.gmra.mrb[0].mxu0 %v48_v25  ;;  %957 = vmatmul.mubr.bf16.vlgmr.msra.gmra.mrb[0].mxu1 %v48_v25  ;;  %1360 = vrcp.f32 %v34_v13  ;;  %v1339_v25 = vld [vmem:[%s1811_s1 + $0x3cc] ss:$16 sps:$4 sm:$0xff]  }
  0x43   :  { %884 = vmatpush1.bf16.msra.mxu0 %v1250_v23  ;;  %966 = vmatpush1.bf16.msra.mxu1 %v1253_v24  ;;  %v1331_v23 = vld [vmem:[%s1811_s1 + $0x3a8] ss:$16 sps:$4 sm:$0xff]   ;;  %v1336_v24 = vld [vmem:[%s1811_s1 + $0x3c4] ss:$16 sps:$4 sm:$0xff]  }
  0x44   :  { %885 = vmatprep.subr.bf16.mxu0 %v1258_v27  ;;  %967 = vmatprep.subr.bf16.mxu1 %v1261_v29  ;;  %v1334_v27 = vld [vmem:[%s1811_s1 + $0x3c0] ss:$16 sps:$4 sm:$0xff]   ;;  %v1342_v29 = vld [vmem:[%s1811_s1 + $0x3e4] ss:$16 sps:$4 sm:$0xff]  }
  0x45   :  { %915 = vmatprep.mubr.bf16.mxu0 %v51_v34  ;;  %997 = vmatprep.mubr.bf16.mxu1 %v51_v34 }
  0x47   :  { %886 = vmatpush1.bf16.msra.mxu0 %v1256_v31  ;;  %968 = vmatpush1.bf16.msra.mxu1 %v1259_v32  ;;  %v1340_v32 = vld [vmem:[%s1811_s1 + $0x3e0] ss:$16 sps:$4 sm:$0xff]  }
  0x48   :  { %887 = vmatprep.subr.bf16.mxu0 %v1264_v33  ;;  %969 = vmatprep.subr.bf16.mxu1 %v1267_v35  ;;  %v1343_v33 = vld [vmem:[%s1811_s1 + $0x3e8] ss:$16 sps:$4 sm:$0xff]   ;;  %v182_v35 = vlaneseq }
  0x4a   :  { %v183_v48 = vshrl.u32 %v182_v35, 7 }
  0x4b   :  { %888 = vmatpush1.bf16.msra.mxu0 %v1262_v36  ;;  %970 = vmatpush1.bf16.msra.mxu1 %v1265_v37 }
  0x4c   :  { %889 = vmatprep.subr.bf16.mxu0 %v1270_v38  ;;  %971 = vmatprep.subr.bf16.mxu1 %v1273_v39  ;;  %v1361_v26 = vpop.eup %1360  ;;  %v184_v36 = vsub.s32 0, %v183_v48  ;;  %v192_v37 = vsub.s32 2, %v183_v48  ;;  %v180_v38 = vld [vmem:[%s1813_s2] ss:$8 sm:$0xf]  ;;  %v188_v39 = vsub.s32 1, %v183_v48 }
  0x4d   :  { %v46_v31 = vmul.f32 %v1361_v26, %v18_v46 }
  0x4f   :  { %890 = vmatpush1.bf16.msra.mxu0 %v1268_v40  ;;  %972 = vmatpush1.bf16.msra.mxu1 %v1271_v41  ;;  %v50_v34 = vpack.c.bf16 %v46_v31, %v46_v31  ;;  %v196_v40 = vsub.s32 3, %v183_v48  ;;  %v185_v41 = vrot.slane %v180_v38, %v184_v36 }
  0x50   :  { %891 = vmatprep.subr.bf16.mxu0 %v1276_v42  ;;  %973 = vmatprep.subr.bf16.mxu1 %v1279_v43  ;;  %v193_v42 = vrot.slane %v180_v38, %v192_v37  ;;  %v189_v43 = vrot.slane %v180_v38, %v188_v39 }
  0x53   :  { %892 = vmatpush1.bf16.msra.mxu0 %v1274_v44  ;;  %974 = vmatpush1.bf16.msra.mxu1 %v1277_v45  ;;  %v197_v44 = vrot.slane %v180_v38, %v196_v40 }
  0x54   :  { %893 = vmatprep.subr.bf16.mxu0 %v1282_v47  ;;  %975 = vmatprep.subr.bf16.mxu1 %v1285_v49 }
  0x57   :  { %894 = vmatpush1.bf16.msra.mxu0 %v1280_v50  ;;  %976 = vmatpush1.bf16.msra.mxu1 %v1283_v51 }
  0x58   :  { %895 = vmatprep.subr.bf16.mxu0 %v1288_v53  ;;  %977 = vmatprep.subr.bf16.mxu1 %v1291_v54 }
  0x5b   :  { %896 = vmatpush1.bf16.msra.mxu0 %v1286_v55  ;;  %978 = vmatpush1.bf16.msra.mxu1 %v1289_v56 }
  0x5c   :  { %897 = vmatprep.subr.bf16.mxu0 %v1294_v58  ;;  %979 = vmatprep.subr.bf16.mxu1 %v1297_v59 }
  0x5f   :  { %898 = vmatpush1.bf16.msra.mxu0 %v1292_v60  ;;  %980 = vmatpush1.bf16.msra.mxu1 %v1295_v61 }
  0x60   :  { %899 = vmatprep.subr.bf16.mxu0 %v1300_v62  ;;  %981 = vmatprep.subr.bf16.mxu1 %v1303_v63 }
  0x63   :  { %900 = vmatpush1.bf16.msra.mxu0 %v1298_v0  ;;  %982 = vmatpush1.bf16.msra.mxu1 %v1301_v1 }
  0x64   :  { %901 = vmatprep.subr.bf16.mxu0 %v1306_v2  ;;  %983 = vmatprep.subr.bf16.mxu1 %v1309_v3 }
  0x67   :  { %902 = vmatpush1.bf16.msra.mxu0 %v1304_v4  ;;  %984 = vmatpush1.bf16.msra.mxu1 %v1307_v5 }
  0x68   :  { %903 = vmatprep.subr.bf16.mxu0 %v1312_v6  ;;  %985 = vmatprep.subr.bf16.mxu1 %v1315_v7 }
  0x6b   :  { %904 = vmatpush1.bf16.msra.mxu0 %v1310_v9  ;;  %986 = vmatpush1.bf16.msra.mxu1 %v1313_v10 }
  0x6c   :  { %905 = vmatprep.subr.bf16.mxu0 %v1318_v11  ;;  %987 = vmatprep.subr.bf16.mxu1 %v1321_v12 }
  0x6f   :  { %906 = vmatpush1.bf16.msra.mxu0 %v1316_v14  ;;  %988 = vmatpush1.bf16.msra.mxu1 %v1319_v15 }
  0x70   :  { %907 = vmatprep.subr.bf16.mxu0 %v1324_v16  ;;  %989 = vmatprep.subr.bf16.mxu1 %v1327_v17 }
  0x73   :  { %908 = vmatpush1.bf16.msra.mxu0 %v1322_v18  ;;  %990 = vmatpush1.bf16.msra.mxu1 %v1325_v19 }
  0x74   :  { %909 = vmatprep.subr.bf16.mxu0 %v1330_v20  ;;  %991 = vmatprep.subr.bf16.mxu1 %v1333_v21 }
  0x77   :  { %910 = vmatpush1.bf16.msra.mxu0 %v1328_v22  ;;  %992 = vmatpush1.bf16.msra.mxu1 %v1331_v23 }
  0x78   :  { %911 = vmatprep.subr.bf16.mxu0 %v1336_v24  ;;  %993 = vmatprep.subr.bf16.mxu1 %v1339_v25 }
  0x7b   :  { %912 = vmatpush1.bf16.msra.mxu0 %v1334_v27  ;;  %994 = vmatpush1.bf16.msra.mxu1 %v1337_v28 }
  0x7c   :  { %913 = vmatprep.subr.bf16.mxu0 %v1342_v29  ;;  %995 = vmatprep.subr.bf16.mxu1 %v1345_v30 }
  0x7f   :  { %914 = vmatpush1.bf16.msra.mxu0 %v1340_v32  ;;  %996 = vmatpush1.bf16.msra.mxu1 %v1343_v33 }
  0x82   :  { %916 = vmatmul.mubr.bf16.vlgmr.msra.gmra.mrb[0].mxu0 %v50_v34  ;;  %998 = vmatmul.mubr.bf16.vlgmr.msra.gmra.mrb[0].mxu1 %v50_v34 }
 0x155   :  { %v917_v45 = vpop.f32.mrb[0].mxu0  ;;  %v999_v46 = vpop.f32.mrb[0].mxu1 }
 0x156   :  { %v1142_v47 = vadd.f32 %v917_v45, %v185_v41  ;;  %v1144_v49 = vadd.f32 %v999_v46, %v193_v42  ;;  %v919_v50 = vpop.f32.mrb[1].mxu0  ;;  %v1001_v51 = vpop.f32.mrb[1].mxu1 }
 0x157   :  { %v1143_v52 = vadd.f32 %v919_v50, %v189_v43  ;;  %v1145_v53 = vadd.f32 %v1001_v51, %v197_v44  ;;  %v921_v54 = vpop.f32.mrb[2].mxu0  ;;  %v1003_v55 = vpop.f32.mrb[2].mxu1 }
 0x158   :  { %1006 = vst [vmem:[%s1814_s3] sm:$0xff] %v1142_v47  ;;  %1008 = vst [vmem:[%s1814_s3 + $0x10] sm:$0xff] %v1144_v49  ;;  %v922_v56 = vpop.f32.mrb[3].mxu0  ;;  %v1004_v57 = vpop.f32.mrb[3].mxu1 }
 0x159   :  { %1007 = vst [vmem:[%s1814_s3 + $0x8] sm:$0xff] %v1143_v52  ;;  %1009 = vst [vmem:[%s1814_s3 + $0x18] sm:$0xff] %v1145_v53 }

// kernel: forward.6
= control target key start
LH: loop header
LB: loop body
LE: loop exit
PB: predicated region body
PF: predicated region fallthrough
CT: control target
= control target key end

     0   :  { %vm108_vm0 = vcmask 523264   ;;  %s631_s1 = inlined_call_operand.vmem [shape: bf16[64,128], index: 1, kind: input, shape index: {}]   ;;  %s632_s0 = inlined_call_operand.vmem [shape: bf16[128,64], index: 0, kind: input, shape index: {}]   ;;  %s633_s2 = inlined_call_operand.vmem [shape: f32[8,128], index: 2, kind: input, shape index: {}]   ;;  %s634_s3 = inlined_call_operand.vmem [shape: bf16[128,128], index: 3, kind: output, shape index: {}]  }
   0x1   :  { %v506_v0 = vld [vmem:[%s631_s1] sm:$0xff]   ;;  %v507_v1 = vld [vmem:[%s631_s1 + $0x8] sm:$0xff]   ;;  %v508_v2 = vld [vmem:[%s631_s1 + $0x10] sm:$0xff]  }
   0x2   :  { %474 = vmatprep.subr.bf16.mxu0 %v506_v0  ;;  %498 = vmatprep.subr.bf16.mxu1 %v506_v0  ;;  %v510_v3 = vld [vmem:[%s632_s0] sm:$0xff]   ;;  %v509_v5 = vld [vmem:[%s631_s1 + $0x18] sm:$0xff]   ;;  %v512_v6 = vld [vmem:[%s632_s0 + $0x8] sm:$0xff]  }
   0x3   :  { %475 = vmatpush3.bf16.msra.mxu0 %v506_v0  ;;  %502 = vmatpush3.bf16.msra.mxu1 %v506_v0  ;;  %v511_v4 = vld [vmem:[%s632_s0 + $0x20] sm:$0xff]   ;;  %v513_v7 = vld [vmem:[%s632_s0 + $0x28] sm:$0xff]   ;;  %v514_v8 = vld [vmem:[%s632_s0 + $0x10] sm:$0xff]  }
   0x4   :  { %476 = vmatprep.subr.bf16.mxu0 %v507_v1  ;;  %499 = vmatprep.subr.bf16.mxu1 %v507_v1  ;;  %v515_v9 = vld [vmem:[%s632_s0 + $0x30] sm:$0xff]   ;;  %v516_v10 = vld [vmem:[%s632_s0 + $0x18] sm:$0xff]   ;;  %v585_v12 = vld [vmem:[%s633_s2] ss:$0 sm:$0xff] }
   0x5   :  { %482 = vmatprep.mubr.msk.bf16.mxu0 %vm108_vm0, %v510_v3  ;;  %490 = vmatprep.mubr.msk.bf16.mxu1 %vm108_vm0, %v511_v4  ;;  %v517_v11 = vld [vmem:[%s632_s0 + $0x38] sm:$0xff]  }
   0x7   :  { %477 = vmatpush3.bf16.msra.mxu0 %v507_v1  ;;  %503 = vmatpush3.bf16.msra.mxu1 %v507_v1 }
   0x8   :  { %478 = vmatprep.subr.bf16.mxu0 %v508_v2  ;;  %500 = vmatprep.subr.bf16.mxu1 %v508_v2 }
   0xb   :  { %479 = vmatpush3.bf16.msra.mxu0 %v508_v2  ;;  %504 = vmatpush3.bf16.msra.mxu1 %v508_v2 }
   0xc   :  { %480 = vmatprep.subr.bf16.mxu0 %v509_v5  ;;  %501 = vmatprep.subr.bf16.mxu1 %v509_v5 }
   0xf   :  { %481 = vmatpush3.bf16.msra.mxu0 %v509_v5  ;;  %505 = vmatpush3.bf16.msra.mxu1 %v509_v5 }
  0x12   :  { %483 = vmatmul.mubr.msk.bf16.vlgmr.msra.gmra.mrb[0].mxu0 %vm108_vm0, %v512_v6  ;;  %491 = vmatmul.mubr.msk.bf16.vlgmr.msra.gmra.mrb[0].mxu1 %vm108_vm0, %v513_v7 }
  0x13   :  { %486 = vmatprep.mubr.msk.bf16.mxu0 %vm108_vm0, %v514_v8  ;;  %494 = vmatprep.mubr.msk.bf16.mxu1 %vm108_vm0, %v515_v9 }
  0x1a   :  { %487 = vmatmul.mubr.msk.bf16.gmra.mrb[4].mxu0 %vm108_vm0, %v516_v10  ;;  %495 = vmatmul.mubr.msk.bf16.gmra.mrb[4].mxu1 %vm108_vm0, %v517_v11 }
  0xe5   :  { %v484_v13 = vpop.f32.mrb[0].mxu0  ;;  %v492_v14 = vpop.f32.mrb[0].mxu1 }
  0xe6   :  { %v176_v15 = vadd.f32 %v484_v13, %v585_v12  ;;  %v208_v16 = vadd.f32 %v492_v14, %v585_v12  ;;  %v167_v17 = vpop.f32.mrb[1].mxu0  ;;  %v199_v18 = vpop.f32.mrb[1].mxu1 }
  0xe7   :  { %v168_v19 = vadd.f32 %v585_v12, %v167_v17  ;;  %v200_v20 = vadd.f32 %v585_v12, %v199_v18  ;;  %v485_v21 = vpop.f32.mrb[2].mxu0  ;;  %v493_v22 = vpop.f32.mrb[2].mxu1 }
  0xe8   :  { %vm232_vm1 = vcmp.gt.f32.partialorder %v176_v15, 0.0  ;;  %v248_v23 = vmul.f32 0.2, %v176_v15  ;;  %vm240_vm2 = vcmp.gt.f32.partialorder %v208_v16, 0.0  ;;  %v256_v24 = vmul.f32 0.2, %v208_v16 }
  0xe9   :  { %vm230_vm3 = vcmp.gt.f32.partialorder %v168_v19, 0.0  ;;  %v246_v25 = vmul.f32 0.2, %v168_v19  ;;  %vm238_vm4 = vcmp.gt.f32.partialorder %v200_v20, 0.0  ;;  %v254_v26 = vmul.f32 0.2, %v200_v20 }
  0xea   :  { %v179_v27 = vadd.f32 %v485_v21, %v585_v12  ;;  %v211_v28 = vadd.f32 %v493_v22, %v585_v12  ;;  %v170_v29 = vpop.f32.mrb[3].mxu0  ;;  %v202_v30 = vpop.f32.mrb[3].mxu1  ;;  %v264_v31 = vsel %vm232_vm1, %v176_v15, %v248_v23  ;;  %v272_v32 = vsel %vm240_vm2, %v208_v16, %v256_v24 }
  0xeb   :  { %v171_v33 = vadd.f32 %v585_v12, %v170_v29  ;;  %v203_v34 = vadd.f32 %v585_v12, %v202_v30  ;;  %v262_v39 = vsel %vm230_vm3, %v168_v19, %v246_v25  ;;  %v270_v40 = vsel %vm238_vm4, %v200_v20, %v254_v26 }
  0xec   :  { %vm233_vm5 = vcmp.gt.f32.partialorder %v179_v27, 0.0  ;;  %v249_v35 = vmul.f32 0.2, %v179_v27  ;;  %vm241_vm6 = vcmp.gt.f32.partialorder %v211_v28, 0.0  ;;  %v257_v36 = vmul.f32 0.2, %v211_v28 }
  0xed   :  { %vm231_vm7 = vcmp.gt.f32.partialorder %v171_v33, 0.0  ;;  %v247_v37 = vmul.f32 0.2, %v171_v33  ;;  %vm239_vm8 = vcmp.gt.f32.partialorder %v203_v34, 0.0  ;;  %v255_v38 = vmul.f32 0.2, %v203_v34 }
  0xee   :  { %v265_v41 = vsel %vm233_vm5, %v179_v27, %v249_v35  ;;  %v273_v42 = vsel %vm241_vm6, %v211_v28, %v257_v36  ;;  %v488_v43 = vpop.f32.mrb[4].mxu0  ;;  %v496_v44 = vpop.f32.mrb[4].mxu1 }
  0xef   :  { %v423_v45 = vpack.c.bf16 %v265_v41, %v264_v31  ;;  %v443_v46 = vpack.c.bf16 %v273_v42, %v272_v32  ;;  %v263_v47 = vsel %vm231_vm7, %v171_v33, %v247_v37  ;;  %v271_v48 = vsel %vm239_vm8, %v203_v34, %v255_v38  ;;  %v183_v49 = vpop.f32.mrb[5].mxu0  ;;  %v215_v50 = vpop.f32.mrb[5].mxu1 }
  0xf0   :  { %v418_v51 = vpack.c.bf16 %v263_v47, %v262_v39  ;;  %v438_v52 = vpack.c.bf16 %v271_v48, %v270_v40  ;;  %v192_v53 = vadd.f32 %v488_v43, %v585_v12  ;;  %v224_v54 = vadd.f32 %v496_v44, %v585_v12  ;;  %v489_v55 = vpop.f32.mrb[6].mxu0  ;;  %v497_v56 = vpop.f32.mrb[6].mxu1 }
  0xf1   :  { %455 = vst [vmem:[%s634_s3 + $0x8] sm:$0xff] %v423_v45   ;;  %459 = vst [vmem:[%s634_s3 + $0x28] sm:$0xff] %v443_v46   ;;  %v184_v57 = vadd.f32 %v585_v12, %v183_v49  ;;  %v216_v58 = vadd.f32 %v585_v12, %v215_v50  ;;  %v195_v59 = vadd.f32 %v489_v55, %v585_v12  ;;  %v186_v61 = vpop.f32.mrb[7].mxu0  ;;  %v218_v62 = vpop.f32.mrb[7].mxu1 }
  0xf2   :  { %v227_v60 = vadd.f32 %v497_v56, %v585_v12  ;;  %419 = vst [vmem:[%s634_s3] sm:$0xff] %v418_v51   ;;  %458 = vst [vmem:[%s634_s3 + $0x20] sm:$0xff] %v438_v52   ;;  %v252_v63 = vmul.f32 0.2, %v192_v53  ;;  %vm236_vm9 = vcmp.gt.f32.partialorder %v192_v53, 0.0  ;;  %v260_v0 = vmul.f32 0.2, %v224_v54 }
  0xf3   :  { %vm244_vm10 = vcmp.gt.f32.partialorder %v224_v54, 0.0  ;;  %vm234_vm11 = vcmp.gt.f32.partialorder %v184_v57, 0.0  ;;  %vm237_vm12 = vcmp.gt.f32.partialorder %v195_v59, 0.0  ;;  %v253_v1 = vmul.f32 0.2, %v195_v59 }
  0xf4   :  { %v250_v2 = vmul.f32 0.2, %v184_v57  ;;  %vm242_vm13 = vcmp.gt.f32.partialorder %v216_v58, 0.0  ;;  %vm245_vm14 = vcmp.gt.f32.partialorder %v227_v60, 0.0  ;;  %v261_v3 = vmul.f32 0.2, %v227_v60 }
  0xf5   :  { %v268_v4 = vsel %vm236_vm9, %v192_v53, %v252_v63  ;;  %v269_v5 = vsel %vm237_vm12, %v195_v59, %v253_v1  ;;  %v187_v6 = vadd.f32 %v585_v12, %v186_v61  ;;  %v219_v7 = vadd.f32 %v585_v12, %v218_v62 }
  0xf6   :  { %v276_v8 = vsel %vm244_vm10, %v224_v54, %v260_v0  ;;  %v258_v9 = vmul.f32 0.2, %v216_v58  ;;  %v433_v10 = vpack.c.bf16 %v269_v5, %v268_v4  ;;  %v277_v11 = vsel %vm245_vm14, %v227_v60, %v261_v3 }
  0xf7   :  { %v453_v13 = vpack.c.bf16 %v277_v11, %v276_v8  ;;  %vm235_vm15 = vcmp.gt.f32.partialorder %v187_v6, 0.0  ;;  %v251_v14 = vmul.f32 0.2, %v187_v6  ;;  %vm243_vm0 = vcmp.gt.f32.partialorder %v219_v7, 0.0 }
  0xf8   :  { %457 = vst [vmem:[%s634_s3 + $0x18] sm:$0xff] %v433_v10   ;;  %v259_v15 = vmul.f32 0.2, %v219_v7  ;;  %v266_v16 = vsel %vm234_vm11, %v184_v57, %v250_v2  ;;  %v274_v17 = vsel %vm242_vm13, %v216_v58, %v258_v9 }
  0xf9   :  { %461 = vst [vmem:[%s634_s3 + $0x38] sm:$0xff] %v453_v13   ;;  %v267_v12 = vsel %vm235_vm15, %v187_v6, %v251_v14 }
  0xfa   :  { %v428_v18 = vpack.c.bf16 %v267_v12, %v266_v16  ;;  %v275_v19 = vsel %vm243_vm0, %v219_v7, %v259_v15 }
  0xfb   :  { %v448_v20 = vpack.c.bf16 %v275_v19, %v274_v17 }
  0xfc   :  { %456 = vst [vmem:[%s634_s3 + $0x10] sm:$0xff] %v428_v18  }
  0xfd   :  { %460 = vst [vmem:[%s634_s3 + $0x30] sm:$0xff] %v448_v20  }

// kernel: forward.7
= control target key start
LH: loop header
LB: loop body
LE: loop exit
PB: predicated region body
PF: predicated region fallthrough
CT: control target
= control target key end

     0   :  { %s1472_s1 = inlined_call_operand.vmem [shape: bf16[1024,128], index: 1, kind: input, shape index: {}]   ;;  %s1473_s0 = inlined_call_operand.vmem [shape: bf16[32,1024], index: 0, kind: input, shape index: {}]   ;;  %s1474_s2 = inlined_call_operand.vmem [shape: f32[8,128], index: 2, kind: input, shape index: {}]   ;;  %s1475_s3 = inlined_call_operand.vmem [shape: bf16[32,128], index: 3, kind: output, shape index: {}]  }
   0x1   :  { %v1134_v0 = vld [vmem:[%s1472_s1 + $0x40] sm:$0xff]   ;;  %v1138_v4 = vld [vmem:[%s1472_s1 + $0x48] sm:$0xff]   ;;  %v1142_v8 = vld [vmem:[%s1472_s1 + $0x50] sm:$0xff]  }
   0x2   :  { %v1135_v1 = vld [vmem:[%s1472_s1 + $0xc0] sm:$0xff]   ;;  %1022 = vmatprep.subr.bf16.mxu0 %v1134_v0  ;;  %v1139_v5 = vld [vmem:[%s1472_s1 + $0xc8] sm:$0xff]   ;;  %v1143_v9 = vld [vmem:[%s1472_s1 + $0xd0] sm:$0xff]  }
   0x3   :  { %v1136_v2 = vld [vmem:[%s1472_s1] sm:$0xff]   ;;  %1050 = vmatprep.subr.bf16.mxu1 %v1135_v1  ;;  %v1140_v6 = vld [vmem:[%s1472_s1 + $0x8] sm:$0xff]   ;;  %v1144_v10 = vld [vmem:[%s1472_s1 + $0x10] sm:$0xff]  }
   0x4   :  { %v1137_v3 = vld [vmem:[%s1472_s1 + $0x80] sm:$0xff]   ;;  %1023 = vmatpush3.bf16.msra.mxu0 %v1136_v2  ;;  %v1141_v7 = vld [vmem:[%s1472_s1 + $0x88] sm:$0xff]   ;;  %v1145_v11 = vld [vmem:[%s1472_s1 + $0x90] sm:$0xff]  }
   0x5   :  { %1051 = vmatpush3.bf16.msra.mxu1 %v1137_v3  ;;  %1024 = vmatprep.subr.bf16.mxu0 %v1138_v4  ;;  %v1146_v12 = vld [vmem:[%s1472_s1 + $0x58] sm:$0xff]   ;;  %v1150_v16 = vld [vmem:[%s1472_s1 + $0x60] sm:$0xff]   ;;  %v1154_v20 = vld [vmem:[%s1472_s1 + $0x68] sm:$0xff]  }
   0x6   :  { %1052 = vmatprep.subr.bf16.mxu1 %v1139_v5  ;;  %v1147_v13 = vld [vmem:[%s1472_s1 + $0xd8] sm:$0xff]   ;;  %v1151_v17 = vld [vmem:[%s1472_s1 + $0xe0] sm:$0xff]   ;;  %v1155_v21 = vld [vmem:[%s1472_s1 + $0xe8] sm:$0xff]  }
   0x7   :  { %v1148_v14 = vld [vmem:[%s1472_s1 + $0x18] sm:$0xff]   ;;  %v1152_v18 = vld [vmem:[%s1472_s1 + $0x20] sm:$0xff]   ;;  %v1156_v22 = vld [vmem:[%s1472_s1 + $0x28] sm:$0xff]  }
   0x8   :  { %1025 = vmatpush3.bf16.msra.mxu0 %v1140_v6  ;;  %v1149_v15 = vld [vmem:[%s1472_s1 + $0x98] sm:$0xff]   ;;  %v1153_v19 = vld [vmem:[%s1472_s1 + $0xa0] sm:$0xff]   ;;  %v1157_v23 = vld [vmem:[%s1472_s1 + $0xa8] sm:$0xff]  }
   0x9   :  { %1053 = vmatpush3.bf16.msra.mxu1 %v1141_v7  ;;  %1026 = vmatprep.subr.bf16.mxu0 %v1142_v8  ;;  %v1158_v24 = vld [vmem:[%s1472_s1 + $0x70] sm:$0xff]   ;;  %v1162_v28 = vld [vmem:[%s1472_s1 + $0x78] sm:$0xff]   ;;  %v15_v32 = vld [vmem:[%s1473_s0] sm:$0xff] }
   0xa   :  { %1054 = vmatprep.subr.bf16.mxu1 %v1143_v9  ;;  %v1159_v25 = vld [vmem:[%s1472_s1 + $0xf0] sm:$0xff]   ;;  %v1163_v29 = vld [vmem:[%s1472_s1 + $0xf8] sm:$0xff]   ;;  %v19_v33 = vld [vmem:[%s1473_s0 + $0x20] sm:$0xff] }
   0xb   :  { %v1160_v26 = vld [vmem:[%s1472_s1 + $0x30] sm:$0xff]   ;;  %v1164_v30 = vld [vmem:[%s1472_s1 + $0x38] sm:$0xff]   ;;  %v16_v34 = vld [vmem:[%s1473_s0 + $0x8] sm:$0xff]  ;;  %v923_v35 = vcombine.low %v15_v32, %v19_v33  ;;  %v924_v36 = vcombine.high %v15_v32, %v19_v33 }
   0xc   :  { %1027 = vmatpush3.bf16.msra.mxu0 %v1144_v10  ;;  %v1161_v27 = vld [vmem:[%s1472_s1 + $0xb0] sm:$0xff]   ;;  %v1165_v31 = vld [vmem:[%s1472_s1 + $0xb8] sm:$0xff]   ;;  %v20_v37 = vld [vmem:[%s1473_s0 + $0x28] sm:$0xff] }
   0xd   :  { %1055 = vmatpush3.bf16.msra.mxu1 %v1145_v11  ;;  %1028 = vmatprep.subr.bf16.mxu0 %v1146_v12  ;;  %v925_v38 = vcombine.low %v16_v34, %v20_v37  ;;  %v926_v39 = vcombine.high %v16_v34, %v20_v37  ;;  %v1166_v40 = vld [vmem:[%s1472_s1 + $0x140] sm:$0xff]   ;;  %v1170_v44 = vld [vmem:[%s1472_s1 + $0x148] sm:$0xff]   ;;  %v1174_v48 = vld [vmem:[%s1472_s1 + $0x150] sm:$0xff]  }
   0xe   :  { %1056 = vmatprep.subr.bf16.mxu1 %v1147_v13  ;;  %655 = vmatprep.mubr.bf16.mxu0 %v924_v36  ;;  %v1167_v41 = vld [vmem:[%s1472_s1 + $0x1c0] sm:$0xff]   ;;  %v1171_v45 = vld [vmem:[%s1472_s1 + $0x1c8] sm:$0xff]   ;;  %v1175_v49 = vld [vmem:[%s1472_s1 + $0x1d0] sm:$0xff]  }
   0xf   :  { %704 = vmatprep.mubr.bf16.mxu1 %v926_v39  ;;  %v1168_v42 = vld [vmem:[%s1472_s1 + $0x100] sm:$0xff]   ;;  %v1172_v46 = vld [vmem:[%s1472_s1 + $0x108] sm:$0xff]   ;;  %v1176_v50 = vld [vmem:[%s1472_s1 + $0x110] sm:$0xff]  }
  0x10   :  { %1029 = vmatpush3.bf16.msra.mxu0 %v1148_v14  ;;  %v1169_v43 = vld [vmem:[%s1472_s1 + $0x180] sm:$0xff]   ;;  %v1173_v47 = vld [vmem:[%s1472_s1 + $0x188] sm:$0xff]   ;;  %v1177_v51 = vld [vmem:[%s1472_s1 + $0x190] sm:$0xff]  }
  0x11   :  { %1057 = vmatpush3.bf16.msra.mxu1 %v1149_v15  ;;  %1030 = vmatprep.subr.bf16.mxu0 %v1150_v16  ;;  %v1178_v52 = vld [vmem:[%s1472_s1 + $0x158] sm:$0xff]   ;;  %v1182_v56 = vld [vmem:[%s1472_s1 + $0x160] sm:$0xff]   ;;  %v24_v63 = vld [vmem:[%s1473_s0 + $0x48] sm:$0xff] }
  0x12   :  { %1058 = vmatprep.subr.bf16.mxu1 %v1151_v17  ;;  %v1179_v53 = vld [vmem:[%s1472_s1 + $0x1d8] sm:$0xff]   ;;  %v1183_v57 = vld [vmem:[%s1472_s1 + $0x1e0] sm:$0xff]   ;;  %v28_v0 = vld [vmem:[%s1473_s0 + $0x68] sm:$0xff] }
  0x13   :  { %v1180_v54 = vld [vmem:[%s1472_s1 + $0x118] sm:$0xff]   ;;  %v1184_v58 = vld [vmem:[%s1472_s1 + $0x120] sm:$0xff]   ;;  %v934_v2 = vcombine.high %v24_v63, %v28_v0  ;;  %v1186_v3 = vld [vmem:[%s1472_s1 + $0x168] sm:$0xff]   ;;  %v933_v4 = vcombine.low %v24_v63, %v28_v0 }
  0x14   :  { %1031 = vmatpush3.bf16.msra.mxu0 %v1152_v18  ;;  %v1181_v55 = vld [vmem:[%s1472_s1 + $0x198] sm:$0xff]   ;;  %v1185_v59 = vld [vmem:[%s1472_s1 + $0x1a0] sm:$0xff]   ;;  %v1187_v5 = vld [vmem:[%s1472_s1 + $0x1e8] sm:$0xff]  }
  0x15   :  { %1059 = vmatpush3.bf16.msra.mxu1 %v1153_v19  ;;  %1032 = vmatprep.subr.bf16.mxu0 %v1154_v20  ;;  %v23_v60 = vld [vmem:[%s1473_s0 + $0x40] sm:$0xff]  ;;  %v1188_v6 = vld [vmem:[%s1472_s1 + $0x128] sm:$0xff]   ;;  %v1190_v8 = vld [vmem:[%s1472_s1 + $0x170] sm:$0xff]  }
  0x16   :  { %1060 = vmatprep.subr.bf16.mxu1 %v1155_v21  ;;  %v27_v61 = vld [vmem:[%s1473_s0 + $0x60] sm:$0xff]  ;;  %v1189_v7 = vld [vmem:[%s1472_s1 + $0x1a8] sm:$0xff]   ;;  %v1191_v9 = vld [vmem:[%s1472_s1 + $0x1f0] sm:$0xff]  }
  0x17   :  { %v932_v62 = vcombine.high %v23_v60, %v27_v61  ;;  %v931_v1 = vcombine.low %v23_v60, %v27_v61  ;;  %v1192_v10 = vld [vmem:[%s1472_s1 + $0x130] sm:$0xff]   ;;  %v1194_v12 = vld [vmem:[%s1472_s1 + $0x178] sm:$0xff]  }
  0x18   :  { %1033 = vmatpush3.bf16.msra.mxu0 %v1156_v22  ;;  %v1193_v11 = vld [vmem:[%s1472_s1 + $0x1b0] sm:$0xff]   ;;  %v1195_v13 = vld [vmem:[%s1472_s1 + $0x1f8] sm:$0xff]  }
  0x19   :  { %1061 = vmatpush3.bf16.msra.mxu1 %v1157_v23  ;;  %1034 = vmatprep.subr.bf16.mxu0 %v1158_v24  ;;  %v1196_v14 = vld [vmem:[%s1472_s1 + $0x138] sm:$0xff]   ;;  %v17_v16 = vld [vmem:[%s1473_s0 + $0x10] sm:$0xff] }
  0x1a   :  { %1062 = vmatprep.subr.bf16.mxu1 %v1159_v25  ;;  %v1197_v15 = vld [vmem:[%s1472_s1 + $0x1b8] sm:$0xff]   ;;  %v21_v17 = vld [vmem:[%s1473_s0 + $0x30] sm:$0xff] }
  0x1b   :  { %v18_v18 = vld [vmem:[%s1473_s0 + $0x18] sm:$0xff]  ;;  %v927_v20 = vcombine.low %v17_v16, %v21_v17  ;;  %v928_v21 = vcombine.high %v17_v16, %v21_v17  ;;  %v25_v24 = vld [vmem:[%s1473_s0 + $0x50] sm:$0xff] }
  0x1c   :  { %1035 = vmatpush3.bf16.msra.mxu0 %v1160_v26  ;;  %v22_v19 = vld [vmem:[%s1473_s0 + $0x38] sm:$0xff]  ;;  %v29_v25 = vld [vmem:[%s1473_s0 + $0x70] sm:$0xff] }
  0x1d   :  { %1063 = vmatpush3.bf16.msra.mxu1 %v1161_v27  ;;  %1036 = vmatprep.subr.bf16.mxu0 %v1162_v28  ;;  %v929_v22 = vcombine.low %v18_v18, %v22_v19  ;;  %v930_v23 = vcombine.high %v18_v18, %v22_v19  ;;  %v26_v26 = vld [vmem:[%s1473_s0 + $0x58] sm:$0xff]  ;;  %v936_v27 = vcombine.high %v25_v24, %v29_v25 }
  0x1e   :  { %1064 = vmatprep.subr.bf16.mxu1 %v1163_v29  ;;  %v30_v28 = vld [vmem:[%s1473_s0 + $0x78] sm:$0xff] }
  0x1f   :  { %v938_v29 = vcombine.high %v26_v26, %v30_v28 }
  0x20   :  { %1037 = vmatpush3.bf16.msra.mxu0 %v1164_v30  ;;  %v935_v30 = vcombine.low %v25_v24, %v29_v25 }
  0x21   :  { %1065 = vmatpush3.bf16.msra.mxu1 %v1165_v31  ;;  %1078 = vmatprep.subr.bf16.mxu0 %v1166_v40  ;;  %v937_v31 = vcombine.low %v26_v26, %v30_v28 }
  0x22   :  { %1106 = vmatprep.subr.bf16.mxu1 %v1167_v41 }
  0x23   :  { %656 = vmatmul.mubr.bf16.vlgmr.msra.gmra.mrb[0].mxu0 %v923_v35 }
  0x24   :  { %705 = vmatmul.mubr.bf16.vlgmr.msra.gmra.mrb[0].mxu1 %v925_v38  ;;  %1079 = vmatpush3.bf16.msra.mxu0 %v1168_v42 }
  0x25   :  { %1107 = vmatpush3.bf16.msra.mxu1 %v1169_v43  ;;  %1080 = vmatprep.subr.bf16.mxu0 %v1170_v44 }
  0x26   :  { %1108 = vmatprep.subr.bf16.mxu1 %v1171_v45  ;;  %663 = vmatprep.mubr.bf16.mxu0 %v932_v62 }
  0x27   :  { %712 = vmatprep.mubr.bf16.mxu1 %v934_v2 }
  0x28   :  { %1081 = vmatpush3.bf16.msra.mxu0 %v1172_v46 }
  0x29   :  { %1109 = vmatpush3.bf16.msra.mxu1 %v1173_v47  ;;  %1082 = vmatprep.subr.bf16.mxu0 %v1174_v48 }
  0x2a   :  { %1110 = vmatprep.subr.bf16.mxu1 %v1175_v49 }
  0x2b   :  { %664 = vmatmul.mubr.bf16.gmra.mrb[4].mxu0 %v931_v1 }
  0x2c   :  { %1083 = vmatpush3.bf16.msra.mxu0 %v1176_v50  ;;  %713 = vmatmul.mubr.bf16.gmra.mrb[4].mxu1 %v933_v4 }
  0x2d   :  { %1111 = vmatpush3.bf16.msra.mxu1 %v1177_v51  ;;  %1084 = vmatprep.subr.bf16.mxu0 %v1178_v52 }
  0x2e   :  { %1112 = vmatprep.subr.bf16.mxu1 %v1179_v53  ;;  %753 = vmatprep.mubr.bf16.mxu0 %v928_v21 }
  0x2f   :  { %802 = vmatprep.mubr.bf16.mxu1 %v930_v23 }
  0x30   :  { %1085 = vmatpush3.bf16.msra.mxu0 %v1180_v54 }
  0x31   :  { %1113 = vmatpush3.bf16.msra.mxu1 %v1181_v55  ;;  %1086 = vmatprep.subr.bf16.mxu0 %v1182_v56 }
  0x32   :  { %1114 = vmatprep.subr.bf16.mxu1 %v1183_v57 }
  0x34   :  { %1087 = vmatpush3.bf16.msra.mxu0 %v1184_v58 }
  0x35   :  { %1115 = vmatpush3.bf16.msra.mxu1 %v1185_v59  ;;  %1088 = vmatprep.subr.bf16.mxu0 %v1186_v3 }
  0x36   :  { %1116 = vmatprep.subr.bf16.mxu1 %v1187_v5 }
  0x38   :  { %1089 = vmatpush3.bf16.msra.mxu0 %v1188_v6 }
  0x39   :  { %1117 = vmatpush3.bf16.msra.mxu1 %v1189_v7  ;;  %1090 = vmatprep.subr.bf16.mxu0 %v1190_v8 }
  0x3a   :  { %1118 = vmatprep.subr.bf16.mxu1 %v1191_v9 }
  0x3c   :  { %1091 = vmatpush3.bf16.msra.mxu0 %v1192_v10 }
  0x3d   :  { %1119 = vmatpush3.bf16.msra.mxu1 %v1193_v11  ;;  %1092 = vmatprep.subr.bf16.mxu0 %v1194_v12 }
  0x3e   :  { %1120 = vmatprep.subr.bf16.mxu1 %v1195_v13 }
  0x40   :  { %1093 = vmatpush3.bf16.msra.mxu0 %v1196_v14 }
  0x41   :  { %1121 = vmatpush3.bf16.msra.mxu1 %v1197_v15 }
  0x43   :  { %754 = vmatmul.mubr.bf16.vlgmr.msra.gmra.mrb[8].mxu0 %v927_v20 }
  0x44   :  { %803 = vmatmul.mubr.bf16.vlgmr.msra.gmra.mrb[8].mxu1 %v929_v22  ;;  %761 = vmatprep.mubr.bf16.mxu0 %v936_v27 }
  0x45   :  { %810 = vmatprep.mubr.bf16.mxu1 %v938_v29 }
  0x4b   :  { %762 = vmatmul.mubr.bf16.gmra.mrb[12].mxu0 %v935_v30 }
  0x4c   :  { %811 = vmatmul.mubr.bf16.gmra.mrb[12].mxu1 %v937_v31 }
  0xf6   :  { %v1038_v32 = vpop.f32.mrb[0].mxu0 }
  0xf7   :  { %v1066_v33 = vpop.f32.mrb[0].mxu1  ;;  %v1039_v34 = vpop.f32.mrb[1].mxu0 }
  0xf8   :  { %v1040_v35 = vadd.f32 %v1039_v34, %v1038_v32  ;;  %v1067_v36 = vpop.f32.mrb[1].mxu1  ;;  %v1041_v37 = vpop.f32.mrb[2].mxu0 }
  0xf9   :  { %v1068_v38 = vadd.f32 %v1067_v36, %v1066_v33  ;;  %v1069_v39 = vpop.f32.mrb[2].mxu1  ;;  %v1042_v40 = vpop.f32.mrb[3].mxu0 }
  0xfa   :  { %v1043_v41 = vadd.f32 %v1042_v40, %v1041_v37  ;;  %v1070_v42 = vpop.f32.mrb[3].mxu1 }
  0xfb   :  { %v707_v43 = vadd.f32 %v1068_v38, %v1040_v35  ;;  %v1071_v44 = vadd.f32 %v1070_v42, %v1069_v39 }
  0xfd   :  { %v710_v45 = vadd.f32 %v1071_v44, %v1043_v41 }
  0xfe   :  { %v1044_v46 = vpop.f32.mrb[4].mxu0 }
  0xff   :  { %v1072_v47 = vpop.f32.mrb[4].mxu1  ;;  %v1045_v48 = vpop.f32.mrb[5].mxu0 }
 0x100   :  { %v1046_v49 = vadd.f32 %v1045_v48, %v1044_v46  ;;  %v1073_v50 = vpop.f32.mrb[5].mxu1  ;;  %v1047_v51 = vpop.f32.mrb[6].mxu0 }
 0x101   :  { %v1074_v52 = vadd.f32 %v1073_v50, %v1072_v47  ;;  %v1075_v53 = vpop.f32.mrb[6].mxu1  ;;  %v1048_v54 = vpop.f32.mrb[7].mxu0 }
 0x102   :  { %v1049_v55 = vadd.f32 %v1048_v54, %v1047_v51  ;;  %v1076_v56 = vpop.f32.mrb[7].mxu1 }
 0x103   :  { %v715_v57 = vadd.f32 %v1074_v52, %v1046_v49  ;;  %v1077_v58 = vadd.f32 %v1076_v56, %v1075_v53 }
 0x105   :  { %v718_v59 = vadd.f32 %v1077_v58, %v1049_v55 }
 0x116   :  { %v1094_v60 = vpop.f32.mrb[8].mxu0 }
 0x117   :  { %v1122_v61 = vpop.f32.mrb[8].mxu1  ;;  %v1095_v62 = vpop.f32.mrb[9].mxu0 }
 0x118   :  { %v1123_v63 = vpop.f32.mrb[9].mxu1  ;;  %v1096_v0 = vadd.f32 %v1095_v62, %v1094_v60  ;;  %v1097_v2 = vpop.f32.mrb[10].mxu0 }
 0x119   :  { %v1124_v1 = vadd.f32 %v1123_v63, %v1122_v61  ;;  %v1125_v3 = vpop.f32.mrb[10].mxu1  ;;  %v1098_v4 = vpop.f32.mrb[11].mxu0  ;;  %v868_v63 = vld [vmem:[%s1474_s2 + $0x2] sm:$0x1] }
 0x11a   :  { %v1126_v5 = vpop.f32.mrb[11].mxu1  ;;  %v756_v6 = vadd.f32 %v1096_v0, %v707_v43  ;;  %v1099_v7 = vadd.f32 %v1098_v4, %v1097_v2 }
 0x11b   :  { %v1127_v8 = vadd.f32 %v1126_v5, %v1125_v3 }
 0x11c   :  { %v805_v9 = vadd.f32 %v1124_v1, %v756_v6  ;;  %v759_v10 = vadd.f32 %v1099_v7, %v710_v45 }
 0x11e   :  { %v808_v11 = vadd.f32 %v1127_v8, %v759_v10  ;;  %v1100_v12 = vpop.f32.mrb[12].mxu0 }
 0x11f   :  { %v1128_v13 = vpop.f32.mrb[12].mxu1  ;;  %v1101_v14 = vpop.f32.mrb[13].mxu0 }
 0x120   :  { %v1129_v15 = vpop.f32.mrb[13].mxu1  ;;  %v832_v16 = vadd.f32 %v808_v11, %v805_v9  ;;  %v1102_v17 = vadd.f32 %v1101_v14, %v1100_v12  ;;  %v1103_v19 = vpop.f32.mrb[14].mxu0 }
 0x121   :  { %v1130_v18 = vadd.f32 %v1129_v15, %v1128_v13  ;;  %v1131_v20 = vpop.f32.mrb[14].mxu1  ;;  %v1104_v21 = vpop.f32.mrb[15].mxu0 }
 0x122   :  { %v1132_v22 = vpop.f32.mrb[15].mxu1  ;;  %v764_v23 = vadd.f32 %v1102_v17, %v715_v57  ;;  %v1105_v24 = vadd.f32 %v1104_v21, %v1103_v19  ;;  %v871_v57 = vlaneseq }
 0x123   :  { %v1133_v25 = vadd.f32 %v1132_v22, %v1131_v20 }
 0x124   :  { %v813_v26 = vadd.f32 %v1130_v18, %v764_v23  ;;  %v767_v27 = vadd.f32 %v1105_v24, %v718_v59  ;;  %v872_v58 = vshrl.u32 %v871_v57, 7  ;;  %v864_v59 = vld [vmem:[%s1474_s2 + $0x1] sm:$0x1] }
 0x126   :  { %v833_v28 = vadd.f32 %v832_v16, %v813_v26  ;;  %v816_v29 = vadd.f32 %v1133_v25, %v767_v27  ;;  %v873_v60 = vsub.s32 0, %v872_v58 }
 0x128   :  { %v834_v30 = vadd.f32 %v833_v28, %v816_v29 }
 0x12a   :  { %v835_v31 = vrot.slane %v834_v30, 4 }
 0x12c   :  { %v836_v32 = vadd.f32 %v835_v31, %v834_v30 }
 0x12e   :  { %v837_v33 = vrot.slane %v836_v32, 2 }
 0x130   :  { %v838_v34 = vadd.f32 %v837_v33, %v836_v32 }
 0x132   :  { %v839_v35 = vrot.slane %v838_v34, 1 }
 0x134   :  { %v840_v36 = vadd.f32 %v839_v35, %v838_v34 }
 0x136   :  { %v841_v37 = vmul.f32 0.03125, %v840_v36 }
 0x138   :  { %v842_v38 = vsub.f32 %v805_v9, %v841_v37  ;;  %v843_v39 = vsub.f32 %v808_v11, %v841_v37  ;;  %v844_v40 = vsub.f32 %v813_v26, %v841_v37  ;;  %v845_v41 = vsub.f32 %v816_v29, %v841_v37 }
 0x13a   :  { %v850_v42 = vmul.f32 %v842_v38, %v842_v38  ;;  %v851_v43 = vmul.f32 %v843_v39, %v843_v39  ;;  %v852_v44 = vmul.f32 %v844_v40, %v844_v40  ;;  %v853_v46 = vmul.f32 %v845_v41, %v845_v41 }
 0x13c   :  { %v854_v45 = vadd.f32 %v851_v43, %v850_v42 }
 0x13e   :  { %v855_v47 = vadd.f32 %v854_v45, %v852_v44 }
 0x140   :  { %v856_v48 = vadd.f32 %v855_v47, %v853_v46 }
 0x142   :  { %v857_v49 = vrot.slane %v856_v48, 4 }
 0x144   :  { %v858_v50 = vadd.f32 %v857_v49, %v856_v48 }
 0x146   :  { %v859_v51 = vrot.slane %v858_v50, 2 }
 0x148   :  { %v860_v52 = vadd.f32 %v859_v51, %v858_v50 }
 0x14a   :  { %v861_v53 = vrot.slane %v860_v52, 1 }
 0x14c   :  { %v862_v54 = vadd.f32 %v861_v53, %v860_v52 }
 0x14e   :  { %v863_v55 = vmul.f32 0.03125, %v862_v54 }
 0x150   :  { %v865_v56 = vadd.f32 1e-05, %v863_v55 }
 0x152   :  { %1198 = vrsqrt.f32 %v865_v56 }
 0x15c   :  { %v1199_v61 = vpop.eup %1198 }
 0x15d   :  { %v867_v62 = vmul.f32 %v1199_v61, %v864_v59 }
 0x15f   :  { %v869_v0 = vmul.f32 %v867_v62, %v841_v37  ;;  %v874_v1 = vrot.slane %v867_v62, %v873_v60 }
 0x161   :  { %v870_v2 = vsub.f32 %v868_v63, %v869_v0  ;;  %v875_v3 = vmul.f32 %v874_v1, %v805_v9  ;;  %v876_v4 = vmul.f32 %v874_v1, %v808_v11  ;;  %v877_v5 = vmul.f32 %v874_v1, %v813_v26 }
 0x162   :  { %v878_v6 = vmul.f32 %v874_v1, %v816_v29 }
 0x163   :  { %v882_v7 = vrot.slane %v870_v2, %v873_v60 }
 0x165   :  { %v883_v8 = vadd.f32 %v882_v7, %v875_v3  ;;  %v884_v10 = vadd.f32 %v882_v7, %v876_v4  ;;  %v885_v12 = vadd.f32 %v882_v7, %v877_v5  ;;  %v886_v13 = vadd.f32 %v882_v7, %v878_v6 }
 0x167   :  { %vm887_vm0 = vcmp.gt.f32.partialorder %v883_v8, 0.0  ;;  %vm888_vm1 = vcmp.gt.f32.partialorder %v884_v10, 0.0  ;;  %vm889_vm2 = vcmp.gt.f32.partialorder %v885_v12, 0.0  ;;  %vm890_vm3 = vcmp.gt.f32.partialorder %v886_v13, 0.0 }
 0x168   :  { %v891_v14 = vmul.f32 0.2, %v883_v8  ;;  %v892_v15 = vmul.f32 0.2, %v884_v10  ;;  %v893_v16 = vmul.f32 0.2, %v885_v12 }
 0x169   :  { %v894_v17 = vmul.f32 0.2, %v886_v13 }
 0x16a   :  { %v895_v18 = vsel %vm887_vm0, %v883_v8, %v891_v14  ;;  %v896_v19 = vsel %vm888_vm1, %v884_v10, %v892_v15  ;;  %v897_v20 = vsel %vm889_vm2, %v885_v12, %v893_v16 }
 0x16b   :  { %v898_v9 = vsel %vm890_vm3, %v886_v13, %v894_v17  ;;  %v1014_v11 = vpack.c.bf16 %v896_v19, %v895_v18 }
 0x16c   :  { %v1019_v21 = vpack.c.bf16 %v898_v9, %v897_v20 }
 0x16d   :  { %1015 = vst [vmem:[%s1475_s3] sm:$0xff] %v1014_v11  }
 0x16e   :  { %1021 = vst [vmem:[%s1475_s3 + $0x8] sm:$0xff] %v1019_v21  }

// kernel: forward.8
= control target key start
LH: loop header
LB: loop body
LE: loop exit
PB: predicated region body
PF: predicated region fallthrough
CT: control target
= control target key end

     0   :  { %s3645_s1 = inlined_call_operand.vmem [shape: bf16[2048,256], index: 1, kind: input, shape index: {}]   ;;  %s3646_s0 = inlined_call_operand.vmem [shape: bf16[8,2048], index: 0, kind: input, shape index: {}]   ;;  %s3647_s2 = inlined_call_operand.vmem [shape: f32[8,256], index: 2, kind: input, shape index: {}]   ;;  %s3648_s3 = inlined_call_operand.vmem [shape: bf16[8,256], index: 3, kind: output, shape index: {}]  }
   0x1   :  { %v2377_v0 = vld [vmem:[%s3645_s1 + $0x4] ss:$8 sps:$4 sm:$0xff]   ;;  %v2381_v2 = vld [vmem:[%s3645_s1] ss:$8 sps:$4 sm:$0xff]   ;;  %v2383_v4 = vld [vmem:[%s3645_s1 + $0x14] ss:$8 sps:$4 sm:$0xff]  }
   0x2   :  { %v2379_v1 = vld [vmem:[%s3645_s1 + $0x404] ss:$8 sps:$4 sm:$0xff]   ;;  %1614 = vmatprep.subr.bf16.mxu1 %v2377_v0  ;;  %v2382_v3 = vld [vmem:[%s3645_s1 + $0x400] ss:$8 sps:$4 sm:$0xff]   ;;  %v2385_v5 = vld [vmem:[%s3645_s1 + $0x414] ss:$8 sps:$4 sm:$0xff]  }
   0x3   :  { %1778 = vmatprep.subr.bf16.mxu0 %v2379_v1  ;;  %1615 = vmatpush1.bf16.msra.mxu1 %v2381_v2  ;;  %v2387_v6 = vld [vmem:[%s3645_s1 + $0x10] ss:$8 sps:$4 sm:$0xff]   ;;  %v2389_v8 = vld [vmem:[%s3645_s1 + $0x24] ss:$8 sps:$4 sm:$0xff]   ;;  %v2393_v10 = vld [vmem:[%s3645_s1 + $0x20] ss:$8 sps:$4 sm:$0xff]  }
   0x4   :  { %1779 = vmatpush1.bf16.msra.mxu0 %v2382_v3  ;;  %1616 = vmatprep.subr.bf16.mxu1 %v2383_v4  ;;  %v2388_v7 = vld [vmem:[%s3645_s1 + $0x410] ss:$8 sps:$4 sm:$0xff]   ;;  %v2391_v9 = vld [vmem:[%s3645_s1 + $0x424] ss:$8 sps:$4 sm:$0xff]   ;;  %v2394_v11 = vld [vmem:[%s3645_s1 + $0x420] ss:$8 sps:$4 sm:$0xff]  }
   0x5   :  { %1780 = vmatprep.subr.bf16.mxu0 %v2385_v5  ;;  %v2395_v12 = vld [vmem:[%s3645_s1 + $0x34] ss:$8 sps:$4 sm:$0xff]   ;;  %v2399_v14 = vld [vmem:[%s3645_s1 + $0x30] ss:$8 sps:$4 sm:$0xff]   ;;  %v2401_v16 = vld [vmem:[%s3645_s1 + $0x44] ss:$8 sps:$4 sm:$0xff]  }
   0x6   :  { %v2397_v13 = vld [vmem:[%s3645_s1 + $0x434] ss:$8 sps:$4 sm:$0xff]   ;;  %v2400_v15 = vld [vmem:[%s3645_s1 + $0x430] ss:$8 sps:$4 sm:$0xff]   ;;  %v2403_v17 = vld [vmem:[%s3645_s1 + $0x444] ss:$8 sps:$4 sm:$0xff]  }
   0x7   :  { %1617 = vmatpush1.bf16.msra.mxu1 %v2387_v6  ;;  %v2405_v18 = vld [vmem:[%s3645_s1 + $0x40] ss:$8 sps:$4 sm:$0xff]   ;;  %v2407_v20 = vld [vmem:[%s3645_s1 + $0x54] ss:$8 sps:$4 sm:$0xff]   ;;  %v2411_v22 = vld [vmem:[%s3645_s1 + $0x50] ss:$8 sps:$4 sm:$0xff]  }
   0x8   :  { %1781 = vmatpush1.bf16.msra.mxu0 %v2388_v7  ;;  %1618 = vmatprep.subr.bf16.mxu1 %v2389_v8  ;;  %v2406_v19 = vld [vmem:[%s3645_s1 + $0x440] ss:$8 sps:$4 sm:$0xff]   ;;  %v2409_v21 = vld [vmem:[%s3645_s1 + $0x454] ss:$8 sps:$4 sm:$0xff]   ;;  %v2412_v23 = vld [vmem:[%s3645_s1 + $0x450] ss:$8 sps:$4 sm:$0xff]  }
   0x9   :  { %1782 = vmatprep.subr.bf16.mxu0 %v2391_v9  ;;  %v2413_v24 = vld [vmem:[%s3645_s1 + $0x64] ss:$8 sps:$4 sm:$0xff]   ;;  %v2417_v26 = vld [vmem:[%s3645_s1 + $0x60] ss:$8 sps:$4 sm:$0xff]   ;;  %v2419_v28 = vld [vmem:[%s3645_s1 + $0x74] ss:$8 sps:$4 sm:$0xff]  }
   0xa   :  { %v2415_v25 = vld [vmem:[%s3645_s1 + $0x464] ss:$8 sps:$4 sm:$0xff]   ;;  %v2418_v27 = vld [vmem:[%s3645_s1 + $0x460] ss:$8 sps:$4 sm:$0xff]   ;;  %v2421_v29 = vld [vmem:[%s3645_s1 + $0x474] ss:$8 sps:$4 sm:$0xff]  }
   0xb   :  { %1619 = vmatpush1.bf16.msra.mxu1 %v2393_v10  ;;  %v2423_v30 = vld [vmem:[%s3645_s1 + $0x70] ss:$8 sps:$4 sm:$0xff]   ;;  %v2425_v32 = vld [vmem:[%s3645_s1 + $0x84] ss:$8 sps:$4 sm:$0xff]   ;;  %v2429_v34 = vld [vmem:[%s3645_s1 + $0x80] ss:$8 sps:$4 sm:$0xff]  }
   0xc   :  { %1783 = vmatpush1.bf16.msra.mxu0 %v2394_v11  ;;  %1620 = vmatprep.subr.bf16.mxu1 %v2395_v12  ;;  %v2424_v31 = vld [vmem:[%s3645_s1 + $0x470] ss:$8 sps:$4 sm:$0xff]   ;;  %v2427_v33 = vld [vmem:[%s3645_s1 + $0x484] ss:$8 sps:$4 sm:$0xff]   ;;  %v2430_v35 = vld [vmem:[%s3645_s1 + $0x480] ss:$8 sps:$4 sm:$0xff]  }
   0xd   :  { %1784 = vmatprep.subr.bf16.mxu0 %v2397_v13  ;;  %v2431_v36 = vld [vmem:[%s3645_s1 + $0x94] ss:$8 sps:$4 sm:$0xff]   ;;  %v2435_v38 = vld [vmem:[%s3645_s1 + $0x90] ss:$8 sps:$4 sm:$0xff]   ;;  %v2437_v40 = vld [vmem:[%s3645_s1 + $0xa4] ss:$8 sps:$4 sm:$0xff]  }
   0xe   :  { %v2433_v37 = vld [vmem:[%s3645_s1 + $0x494] ss:$8 sps:$4 sm:$0xff]   ;;  %v2436_v39 = vld [vmem:[%s3645_s1 + $0x490] ss:$8 sps:$4 sm:$0xff]   ;;  %v2439_v41 = vld [vmem:[%s3645_s1 + $0x4a4] ss:$8 sps:$4 sm:$0xff]  }
   0xf   :  { %1621 = vmatpush1.bf16.msra.mxu1 %v2399_v14  ;;  %v2441_v42 = vld [vmem:[%s3645_s1 + $0xa0] ss:$8 sps:$4 sm:$0xff]   ;;  %v2443_v44 = vld [vmem:[%s3645_s1 + $0xb4] ss:$8 sps:$4 sm:$0xff]   ;;  %v2447_v47 = vld [vmem:[%s3645_s1 + $0xb0] ss:$8 sps:$4 sm:$0xff]  }
  0x10   :  { %1785 = vmatpush1.bf16.msra.mxu0 %v2400_v15  ;;  %1622 = vmatprep.subr.bf16.mxu1 %v2401_v16  ;;  %v2442_v43 = vld [vmem:[%s3645_s1 + $0x4a0] ss:$8 sps:$4 sm:$0xff]   ;;  %v2445_v45 = vld [vmem:[%s3645_s1 + $0x4b4] ss:$8 sps:$4 sm:$0xff]   ;;  %v2448_v49 = vld [vmem:[%s3645_s1 + $0x4b0] ss:$8 sps:$4 sm:$0xff]  }
  0x11   :  { %1786 = vmatprep.subr.bf16.mxu0 %v2403_v17  ;;  %v14_v46 = vld [vmem:[%s3646_s0] sm:$0xff]  ;;  %v2455_v56 = vld [vmem:[%s3645_s1 + $0xd4] ss:$8 sps:$4 sm:$0xff]   ;;  %v2459_v58 = vld [vmem:[%s3645_s1 + $0xd0] ss:$8 sps:$4 sm:$0xff]  }
  0x12   :  { %v2075_v48 = vcombine.high %v14_v46, %v14_v46  ;;  %v18_v50 = vld [vmem:[%s3646_s0 + $0x20] sm:$0xff]  ;;  %v2457_v57 = vld [vmem:[%s3645_s1 + $0x4d4] ss:$8 sps:$4 sm:$0xff]   ;;  %v2460_v59 = vld [vmem:[%s3645_s1 + $0x4d0] ss:$8 sps:$4 sm:$0xff]   ;;  %v2074_v6 = vcombine.low %v14_v46, %v14_v46 }
  0x13   :  { %1623 = vmatpush1.bf16.msra.mxu1 %v2405_v18  ;;  %v2449_v51 = vld [vmem:[%s3645_s1 + $0xc4] ss:$8 sps:$4 sm:$0xff]   ;;  %v2083_v53 = vcombine.high %v18_v50, %v18_v50  ;;  %v2453_v54 = vld [vmem:[%s3645_s1 + $0xc0] ss:$8 sps:$4 sm:$0xff]   ;;  %v2467_v0 = vld [vmem:[%s3645_s1 + $0xf4] ss:$8 sps:$4 sm:$0xff]   ;;  %v2082_v7 = vcombine.low %v18_v50, %v18_v50 }
  0x14   :  { %1787 = vmatpush1.bf16.msra.mxu0 %v2406_v19  ;;  %1624 = vmatprep.subr.bf16.mxu1 %v2407_v20  ;;  %v2451_v52 = vld [vmem:[%s3645_s1 + $0x4c4] ss:$8 sps:$4 sm:$0xff]   ;;  %v2454_v55 = vld [vmem:[%s3645_s1 + $0x4c0] ss:$8 sps:$4 sm:$0xff]   ;;  %v2469_v1 = vld [vmem:[%s3645_s1 + $0x4f4] ss:$8 sps:$4 sm:$0xff]  }
  0x15   :  { %1788 = vmatprep.subr.bf16.mxu0 %v2409_v21  ;;  %1646 = vmatprep.mubr.bf16.mxu1 %v2075_v48  ;;  %v2461_v60 = vld [vmem:[%s3645_s1 + $0xe4] ss:$8 sps:$4 sm:$0xff]   ;;  %v2465_v62 = vld [vmem:[%s3645_s1 + $0xe0] ss:$8 sps:$4 sm:$0xff]   ;;  %v2471_v2 = vld [vmem:[%s3645_s1 + $0xf0] ss:$8 sps:$4 sm:$0xff]  }
  0x16   :  { %1810 = vmatprep.mubr.bf16.mxu0 %v2083_v53  ;;  %v2463_v61 = vld [vmem:[%s3645_s1 + $0x4e4] ss:$8 sps:$4 sm:$0xff]   ;;  %v2466_v63 = vld [vmem:[%s3645_s1 + $0x4e0] ss:$8 sps:$4 sm:$0xff]   ;;  %v2472_v3 = vld [vmem:[%s3645_s1 + $0x4f0] ss:$8 sps:$4 sm:$0xff]  }
  0x17   :  { %1625 = vmatpush1.bf16.msra.mxu1 %v2411_v22  ;;  %v2477_v4 = vld [vmem:[%s3645_s1 + $0x104] ss:$8 sps:$4 sm:$0xff]   ;;  %v2475_v8 = vld [vmem:[%s3645_s1 + $0x100] ss:$8 sps:$4 sm:$0xff]   ;;  %v2485_v10 = vld [vmem:[%s3645_s1 + $0x114] ss:$8 sps:$4 sm:$0xff]  }
  0x18   :  { %1789 = vmatpush1.bf16.msra.mxu0 %v2412_v23  ;;  %1626 = vmatprep.subr.bf16.mxu1 %v2413_v24  ;;  %v2482_v5 = vld [vmem:[%s3645_s1 + $0x504] ss:$8 sps:$4 sm:$0xff]   ;;  %v2480_v9 = vld [vmem:[%s3645_s1 + $0x500] ss:$8 sps:$4 sm:$0xff]   ;;  %v2488_v11 = vld [vmem:[%s3645_s1 + $0x514] ss:$8 sps:$4 sm:$0xff]  }
  0x19   :  { %1790 = vmatprep.subr.bf16.mxu0 %v2415_v25  ;;  %v2483_v12 = vld [vmem:[%s3645_s1 + $0x110] ss:$8 sps:$4 sm:$0xff]   ;;  %v2491_v14 = vld [vmem:[%s3645_s1 + $0x124] ss:$8 sps:$4 sm:$0xff]   ;;  %v2489_v16 = vld [vmem:[%s3645_s1 + $0x120] ss:$8 sps:$4 sm:$0xff]  }
  0x1a   :  { %v2486_v13 = vld [vmem:[%s3645_s1 + $0x510] ss:$8 sps:$4 sm:$0xff]   ;;  %v2494_v15 = vld [vmem:[%s3645_s1 + $0x524] ss:$8 sps:$4 sm:$0xff]   ;;  %v2492_v17 = vld [vmem:[%s3645_s1 + $0x520] ss:$8 sps:$4 sm:$0xff]  }
  0x1b   :  { %1627 = vmatpush1.bf16.msra.mxu1 %v2417_v26  ;;  %v2497_v18 = vld [vmem:[%s3645_s1 + $0x134] ss:$8 sps:$4 sm:$0xff]   ;;  %v2495_v20 = vld [vmem:[%s3645_s1 + $0x130] ss:$8 sps:$4 sm:$0xff]   ;;  %v2503_v22 = vld [vmem:[%s3645_s1 + $0x144] ss:$8 sps:$4 sm:$0xff]  }
  0x1c   :  { %1791 = vmatpush1.bf16.msra.mxu0 %v2418_v27  ;;  %1628 = vmatprep.subr.bf16.mxu1 %v2419_v28  ;;  %v2500_v19 = vld [vmem:[%s3645_s1 + $0x534] ss:$8 sps:$4 sm:$0xff]   ;;  %v2498_v21 = vld [vmem:[%s3645_s1 + $0x530] ss:$8 sps:$4 sm:$0xff]   ;;  %v2506_v23 = vld [vmem:[%s3645_s1 + $0x544] ss:$8 sps:$4 sm:$0xff]  }
  0x1d   :  { %1792 = vmatprep.subr.bf16.mxu0 %v2421_v29  ;;  %v2501_v24 = vld [vmem:[%s3645_s1 + $0x140] ss:$8 sps:$4 sm:$0xff]   ;;  %v2509_v26 = vld [vmem:[%s3645_s1 + $0x154] ss:$8 sps:$4 sm:$0xff]   ;;  %v2507_v28 = vld [vmem:[%s3645_s1 + $0x150] ss:$8 sps:$4 sm:$0xff]  }
  0x1e   :  { %v2504_v25 = vld [vmem:[%s3645_s1 + $0x540] ss:$8 sps:$4 sm:$0xff]   ;;  %v2512_v27 = vld [vmem:[%s3645_s1 + $0x554] ss:$8 sps:$4 sm:$0xff]   ;;  %v2510_v29 = vld [vmem:[%s3645_s1 + $0x550] ss:$8 sps:$4 sm:$0xff]  }
  0x1f   :  { %1629 = vmatpush1.bf16.msra.mxu1 %v2423_v30  ;;  %v2515_v30 = vld [vmem:[%s3645_s1 + $0x164] ss:$8 sps:$4 sm:$0xff]   ;;  %v2533_v46 = vld [vmem:[%s3645_s1 + $0x194] ss:$8 sps:$4 sm:$0xff]   ;;  %v2531_v48 = vld [vmem:[%s3645_s1 + $0x190] ss:$8 sps:$4 sm:$0xff]  }
  0x20   :  { %1793 = vmatpush1.bf16.msra.mxu0 %v2424_v31  ;;  %1630 = vmatprep.subr.bf16.mxu1 %v2425_v32  ;;  %v2518_v31 = vld [vmem:[%s3645_s1 + $0x564] ss:$8 sps:$4 sm:$0xff]   ;;  %v2540_v53 = vld [vmem:[%s3645_s1 + $0x5a0] ss:$8 sps:$4 sm:$0xff]  }
  0x21   :  { %1794 = vmatprep.subr.bf16.mxu0 %v2427_v33  ;;  %v3081_v32 = vld [vmem:[%s3646_s0 + $0x8] sm:$0xff] }
  0x22   :  { %v2513_v33 = vld [vmem:[%s3645_s1 + $0x160] ss:$8 sps:$4 sm:$0xff]   ;;  %v2539_v50 = vld [vmem:[%s3645_s1 + $0x1a4] ss:$8 sps:$4 sm:$0xff]  }
  0x23   :  { %1631 = vmatpush1.bf16.msra.mxu1 %v2429_v34  ;;  %v2516_v34 = vld [vmem:[%s3645_s1 + $0x560] ss:$8 sps:$4 sm:$0xff]  }
  0x24   :  { %1795 = vmatpush1.bf16.msra.mxu0 %v2430_v35  ;;  %1632 = vmatprep.subr.bf16.mxu1 %v2431_v36  ;;  %v2077_v35 = vcombine.high %v3081_v32, %v3081_v32  ;;  %v3094_v36 = vld [vmem:[%s3646_s0 + $0x28] sm:$0xff] }
  0x25   :  { %1796 = vmatprep.subr.bf16.mxu0 %v2433_v37  ;;  %v2521_v37 = vld [vmem:[%s3645_s1 + $0x174] ss:$8 sps:$4 sm:$0xff]  }
  0x27   :  { %1633 = vmatpush1.bf16.msra.mxu1 %v2435_v38  ;;  %v2085_v38 = vcombine.high %v3094_v36, %v3094_v36 }
  0x28   :  { %1797 = vmatpush1.bf16.msra.mxu0 %v2436_v39  ;;  %1634 = vmatprep.subr.bf16.mxu1 %v2437_v40  ;;  %v2524_v39 = vld [vmem:[%s3645_s1 + $0x574] ss:$8 sps:$4 sm:$0xff]   ;;  %v2519_v40 = vld [vmem:[%s3645_s1 + $0x170] ss:$8 sps:$4 sm:$0xff]  }
  0x29   :  { %1798 = vmatprep.subr.bf16.mxu0 %v2439_v41  ;;  %v2522_v41 = vld [vmem:[%s3645_s1 + $0x570] ss:$8 sps:$4 sm:$0xff]  }
  0x2b   :  { %1635 = vmatpush1.bf16.msra.mxu1 %v2441_v42  ;;  %v2527_v42 = vld [vmem:[%s3645_s1 + $0x184] ss:$8 sps:$4 sm:$0xff]  }
  0x2c   :  { %1799 = vmatpush1.bf16.msra.mxu0 %v2442_v43  ;;  %1636 = vmatprep.subr.bf16.mxu1 %v2443_v44  ;;  %v2530_v43 = vld [vmem:[%s3645_s1 + $0x584] ss:$8 sps:$4 sm:$0xff]   ;;  %v2525_v44 = vld [vmem:[%s3645_s1 + $0x180] ss:$8 sps:$4 sm:$0xff]  }
  0x2d   :  { %1800 = vmatprep.subr.bf16.mxu0 %v2445_v45  ;;  %v2528_v45 = vld [vmem:[%s3645_s1 + $0x580] ss:$8 sps:$4 sm:$0xff]  }
  0x2f   :  { %1637 = vmatpush1.bf16.msra.mxu1 %v2447_v47  ;;  %v2536_v47 = vld [vmem:[%s3645_s1 + $0x594] ss:$8 sps:$4 sm:$0xff]  }
  0x30   :  { %1801 = vmatpush1.bf16.msra.mxu0 %v2448_v49  ;;  %1638 = vmatprep.subr.bf16.mxu1 %v2449_v51  ;;  %v2534_v49 = vld [vmem:[%s3645_s1 + $0x590] ss:$8 sps:$4 sm:$0xff]   ;;  %v2542_v51 = vld [vmem:[%s3645_s1 + $0x5a4] ss:$8 sps:$4 sm:$0xff]  }
  0x31   :  { %1802 = vmatprep.subr.bf16.mxu0 %v2451_v52  ;;  %v2537_v52 = vld [vmem:[%s3645_s1 + $0x1a0] ss:$8 sps:$4 sm:$0xff]  }
  0x33   :  { %1639 = vmatpush1.bf16.msra.mxu1 %v2453_v54  ;;  %v2545_v54 = vld [vmem:[%s3645_s1 + $0x1b4] ss:$8 sps:$4 sm:$0xff]  }
  0x34   :  { %1803 = vmatpush1.bf16.msra.mxu0 %v2454_v55  ;;  %1640 = vmatprep.subr.bf16.mxu1 %v2455_v56  ;;  %v2548_v55 = vld [vmem:[%s3645_s1 + $0x5b4] ss:$8 sps:$4 sm:$0xff]   ;;  %v2543_v56 = vld [vmem:[%s3645_s1 + $0x1b0] ss:$8 sps:$4 sm:$0xff]  }
  0x35   :  { %1804 = vmatprep.subr.bf16.mxu0 %v2457_v57  ;;  %v2546_v57 = vld [vmem:[%s3645_s1 + $0x5b0] ss:$8 sps:$4 sm:$0xff]  }
  0x37   :  { %1641 = vmatpush1.bf16.msra.mxu1 %v2459_v58  ;;  %v2551_v58 = vld [vmem:[%s3645_s1 + $0x1c4] ss:$8 sps:$4 sm:$0xff]  }
  0x38   :  { %1805 = vmatpush1.bf16.msra.mxu0 %v2460_v59  ;;  %1642 = vmatprep.subr.bf16.mxu1 %v2461_v60  ;;  %v2554_v59 = vld [vmem:[%s3645_s1 + $0x5c4] ss:$8 sps:$4 sm:$0xff]   ;;  %v2549_v60 = vld [vmem:[%s3645_s1 + $0x1c0] ss:$8 sps:$4 sm:$0xff]  }
  0x39   :  { %1806 = vmatprep.subr.bf16.mxu0 %v2463_v61  ;;  %v2552_v61 = vld [vmem:[%s3645_s1 + $0x5c0] ss:$8 sps:$4 sm:$0xff]  }
  0x3b   :  { %1643 = vmatpush1.bf16.msra.mxu1 %v2465_v62  ;;  %v2557_v62 = vld [vmem:[%s3645_s1 + $0x1d4] ss:$8 sps:$4 sm:$0xff]  }
  0x3c   :  { %1807 = vmatpush1.bf16.msra.mxu0 %v2466_v63  ;;  %1644 = vmatprep.subr.bf16.mxu1 %v2467_v0  ;;  %v2560_v63 = vld [vmem:[%s3645_s1 + $0x5d4] ss:$8 sps:$4 sm:$0xff]   ;;  %v2555_v0 = vld [vmem:[%s3645_s1 + $0x1d0] ss:$8 sps:$4 sm:$0xff]  }
  0x3d   :  { %1808 = vmatprep.subr.bf16.mxu0 %v2469_v1  ;;  %v2558_v1 = vld [vmem:[%s3645_s1 + $0x5d0] ss:$8 sps:$4 sm:$0xff]  }
  0x3f   :  { %1645 = vmatpush1.bf16.msra.mxu1 %v2471_v2  ;;  %v2563_v2 = vld [vmem:[%s3645_s1 + $0x1e4] ss:$8 sps:$4 sm:$0xff]  }
  0x40   :  { %1809 = vmatpush1.bf16.msra.mxu0 %v2472_v3  ;;  %1655 = vmatprep.subr.bf16.mxu1 %v2477_v4  ;;  %v2566_v3 = vld [vmem:[%s3645_s1 + $0x5e4] ss:$8 sps:$4 sm:$0xff]   ;;  %v2561_v4 = vld [vmem:[%s3645_s1 + $0x1e0] ss:$8 sps:$4 sm:$0xff]  }
  0x41   :  { %1819 = vmatprep.subr.bf16.mxu0 %v2482_v5  ;;  %v2564_v5 = vld [vmem:[%s3645_s1 + $0x5e0] ss:$8 sps:$4 sm:$0xff]  }
  0x42   :  { %1647 = vmatmul.mubr.bf16.vlgmr.msra.gmra.mrb[0].mxu1 %v2074_v6  ;;  %v2569_v6 = vld [vmem:[%s3645_s1 + $0x1f4] ss:$8 sps:$4 sm:$0xff]  }
  0x43   :  { %1811 = vmatmul.mubr.bf16.vlgmr.msra.gmra.mrb[0].mxu0 %v2082_v7  ;;  %1656 = vmatpush1.bf16.msra.mxu1 %v2475_v8  ;;  %v2572_v7 = vld [vmem:[%s3645_s1 + $0x5f4] ss:$8 sps:$4 sm:$0xff]   ;;  %v2567_v8 = vld [vmem:[%s3645_s1 + $0x1f0] ss:$8 sps:$4 sm:$0xff]  }
  0x44   :  { %1820 = vmatpush1.bf16.msra.mxu0 %v2480_v9  ;;  %1657 = vmatprep.subr.bf16.mxu1 %v2485_v10  ;;  %v2570_v9 = vld [vmem:[%s3645_s1 + $0x5f0] ss:$8 sps:$4 sm:$0xff]   ;;  %v2577_v10 = vld [vmem:[%s3645_s1 + $0x204] ss:$8 sps:$4 sm:$0xff]  }
  0x45   :  { %1821 = vmatprep.subr.bf16.mxu0 %v2488_v11  ;;  %1687 = vmatprep.mubr.bf16.mxu1 %v2077_v35  ;;  %v2582_v11 = vld [vmem:[%s3645_s1 + $0x604] ss:$8 sps:$4 sm:$0xff]   ;;  %v2604_v35 = vld [vmem:[%s3645_s1 + $0x640] ss:$8 sps:$4 sm:$0xff]  }
  0x46   :  { %1851 = vmatprep.mubr.bf16.mxu0 %v2085_v38  ;;  %v2607_v38 = vld [vmem:[%s3645_s1 + $0x250] ss:$8 sps:$4 sm:$0xff]  }
  0x47   :  { %1658 = vmatpush1.bf16.msra.mxu1 %v2483_v12  ;;  %v2076_v12 = vcombine.low %v3081_v32, %v3081_v32  ;;  %v2603_v32 = vld [vmem:[%s3645_s1 + $0x244] ss:$8 sps:$4 sm:$0xff]  }
  0x48   :  { %1822 = vmatpush1.bf16.msra.mxu0 %v2486_v13  ;;  %1659 = vmatprep.subr.bf16.mxu1 %v2491_v14  ;;  %v2575_v13 = vld [vmem:[%s3645_s1 + $0x200] ss:$8 sps:$4 sm:$0xff]   ;;  %v2084_v14 = vcombine.low %v3094_v36, %v3094_v36  ;;  %v2609_v36 = vld [vmem:[%s3645_s1 + $0x254] ss:$8 sps:$4 sm:$0xff]  }
  0x49   :  { %1823 = vmatprep.subr.bf16.mxu0 %v2494_v15  ;;  %v2580_v15 = vld [vmem:[%s3645_s1 + $0x600] ss:$8 sps:$4 sm:$0xff]  }
  0x4b   :  { %1660 = vmatpush1.bf16.msra.mxu1 %v2489_v16  ;;  %v2585_v16 = vld [vmem:[%s3645_s1 + $0x214] ss:$8 sps:$4 sm:$0xff]  }
  0x4c   :  { %1824 = vmatpush1.bf16.msra.mxu0 %v2492_v17  ;;  %1661 = vmatprep.subr.bf16.mxu1 %v2497_v18  ;;  %v2588_v17 = vld [vmem:[%s3645_s1 + $0x614] ss:$8 sps:$4 sm:$0xff]  }
  0x4d   :  { %1825 = vmatprep.subr.bf16.mxu0 %v2500_v19  ;;  %v3231_v18 = vld [vmem:[%s3646_s0 + $0x10] sm:$0xff] }
  0x4e   :  { %v2079_v19 = vcombine.high %v3231_v18, %v3231_v18 }
  0x4f   :  { %1662 = vmatpush1.bf16.msra.mxu1 %v2495_v20  ;;  %v3238_v20 = vld [vmem:[%s3646_s0 + $0x30] sm:$0xff] }
  0x50   :  { %1826 = vmatpush1.bf16.msra.mxu0 %v2498_v21  ;;  %1663 = vmatprep.subr.bf16.mxu1 %v2503_v22  ;;  %v2583_v21 = vld [vmem:[%s3645_s1 + $0x210] ss:$8 sps:$4 sm:$0xff]  }
  0x51   :  { %1827 = vmatprep.subr.bf16.mxu0 %v2506_v23  ;;  %v2586_v22 = vld [vmem:[%s3645_s1 + $0x610] ss:$8 sps:$4 sm:$0xff]   ;;  %v2087_v23 = vcombine.high %v3238_v20, %v3238_v20 }
  0x53   :  { %1664 = vmatpush1.bf16.msra.mxu1 %v2501_v24  ;;  %v2591_v24 = vld [vmem:[%s3645_s1 + $0x224] ss:$8 sps:$4 sm:$0xff]  }
  0x54   :  { %1828 = vmatpush1.bf16.msra.mxu0 %v2504_v25  ;;  %1665 = vmatprep.subr.bf16.mxu1 %v2509_v26  ;;  %v2594_v25 = vld [vmem:[%s3645_s1 + $0x624] ss:$8 sps:$4 sm:$0xff]   ;;  %v2589_v26 = vld [vmem:[%s3645_s1 + $0x220] ss:$8 sps:$4 sm:$0xff]  }
  0x55   :  { %1829 = vmatprep.subr.bf16.mxu0 %v2512_v27  ;;  %v2592_v27 = vld [vmem:[%s3645_s1 + $0x620] ss:$8 sps:$4 sm:$0xff]  }
  0x57   :  { %1666 = vmatpush1.bf16.msra.mxu1 %v2507_v28  ;;  %v2597_v28 = vld [vmem:[%s3645_s1 + $0x234] ss:$8 sps:$4 sm:$0xff]  }
  0x58   :  { %1830 = vmatpush1.bf16.msra.mxu0 %v2510_v29  ;;  %1667 = vmatprep.subr.bf16.mxu1 %v2515_v30  ;;  %v2600_v29 = vld [vmem:[%s3645_s1 + $0x634] ss:$8 sps:$4 sm:$0xff]   ;;  %v2595_v30 = vld [vmem:[%s3645_s1 + $0x230] ss:$8 sps:$4 sm:$0xff]  }
  0x59   :  { %1831 = vmatprep.subr.bf16.mxu0 %v2518_v31  ;;  %v2598_v31 = vld [vmem:[%s3645_s1 + $0x630] ss:$8 sps:$4 sm:$0xff]  }
  0x5b   :  { %1668 = vmatpush1.bf16.msra.mxu1 %v2513_v33  ;;  %v2606_v33 = vld [vmem:[%s3645_s1 + $0x644] ss:$8 sps:$4 sm:$0xff]  }
  0x5c   :  { %1832 = vmatpush1.bf16.msra.mxu0 %v2516_v34  ;;  %1669 = vmatprep.subr.bf16.mxu1 %v2521_v37  ;;  %v2601_v34 = vld [vmem:[%s3645_s1 + $0x240] ss:$8 sps:$4 sm:$0xff]   ;;  %v2612_v37 = vld [vmem:[%s3645_s1 + $0x654] ss:$8 sps:$4 sm:$0xff]  }
  0x5d   :  { %1833 = vmatprep.subr.bf16.mxu0 %v2524_v39  ;;  %v2610_v39 = vld [vmem:[%s3645_s1 + $0x650] ss:$8 sps:$4 sm:$0xff]  }
  0x5f   :  { %1670 = vmatpush1.bf16.msra.mxu1 %v2519_v40  ;;  %v2615_v40 = vld [vmem:[%s3645_s1 + $0x264] ss:$8 sps:$4 sm:$0xff]  }
  0x60   :  { %1834 = vmatpush1.bf16.msra.mxu0 %v2522_v41  ;;  %1671 = vmatprep.subr.bf16.mxu1 %v2527_v42  ;;  %v2618_v41 = vld [vmem:[%s3645_s1 + $0x664] ss:$8 sps:$4 sm:$0xff]   ;;  %v2613_v42 = vld [vmem:[%s3645_s1 + $0x260] ss:$8 sps:$4 sm:$0xff]  }
  0x61   :  { %1835 = vmatprep.subr.bf16.mxu0 %v2530_v43  ;;  %v2616_v43 = vld [vmem:[%s3645_s1 + $0x660] ss:$8 sps:$4 sm:$0xff]  }
  0x63   :  { %1672 = vmatpush1.bf16.msra.mxu1 %v2525_v44  ;;  %v2621_v44 = vld [vmem:[%s3645_s1 + $0x274] ss:$8 sps:$4 sm:$0xff]  }
  0x64   :  { %1836 = vmatpush1.bf16.msra.mxu0 %v2528_v45  ;;  %1673 = vmatprep.subr.bf16.mxu1 %v2533_v46  ;;  %v2624_v45 = vld [vmem:[%s3645_s1 + $0x674] ss:$8 sps:$4 sm:$0xff]   ;;  %v2619_v46 = vld [vmem:[%s3645_s1 + $0x270] ss:$8 sps:$4 sm:$0xff]  }
  0x65   :  { %1837 = vmatprep.subr.bf16.mxu0 %v2536_v47  ;;  %v2622_v47 = vld [vmem:[%s3645_s1 + $0x670] ss:$8 sps:$4 sm:$0xff]  }
  0x67   :  { %1674 = vmatpush1.bf16.msra.mxu1 %v2531_v48  ;;  %v2627_v48 = vld [vmem:[%s3645_s1 + $0x284] ss:$8 sps:$4 sm:$0xff]  }
  0x68   :  { %1838 = vmatpush1.bf16.msra.mxu0 %v2534_v49  ;;  %1675 = vmatprep.subr.bf16.mxu1 %v2539_v50  ;;  %v2630_v49 = vld [vmem:[%s3645_s1 + $0x684] ss:$8 sps:$4 sm:$0xff]   ;;  %v2625_v50 = vld [vmem:[%s3645_s1 + $0x280] ss:$8 sps:$4 sm:$0xff]  }
  0x69   :  { %1839 = vmatprep.subr.bf16.mxu0 %v2542_v51  ;;  %v2628_v51 = vld [vmem:[%s3645_s1 + $0x680] ss:$8 sps:$4 sm:$0xff]  }
  0x6b   :  { %1676 = vmatpush1.bf16.msra.mxu1 %v2537_v52  ;;  %v2633_v52 = vld [vmem:[%s3645_s1 + $0x294] ss:$8 sps:$4 sm:$0xff]  }
  0x6c   :  { %1840 = vmatpush1.bf16.msra.mxu0 %v2540_v53  ;;  %1677 = vmatprep.subr.bf16.mxu1 %v2545_v54  ;;  %v2636_v53 = vld [vmem:[%s3645_s1 + $0x694] ss:$8 sps:$4 sm:$0xff]   ;;  %v2631_v54 = vld [vmem:[%s3645_s1 + $0x290] ss:$8 sps:$4 sm:$0xff]  }
  0x6d   :  { %1841 = vmatprep.subr.bf16.mxu0 %v2548_v55  ;;  %v2634_v55 = vld [vmem:[%s3645_s1 + $0x690] ss:$8 sps:$4 sm:$0xff]  }
  0x6f   :  { %1678 = vmatpush1.bf16.msra.mxu1 %v2543_v56  ;;  %v2639_v56 = vld [vmem:[%s3645_s1 + $0x2a4] ss:$8 sps:$4 sm:$0xff]  }
  0x70   :  { %1842 = vmatpush1.bf16.msra.mxu0 %v2546_v57  ;;  %1679 = vmatprep.subr.bf16.mxu1 %v2551_v58  ;;  %v2642_v57 = vld [vmem:[%s3645_s1 + $0x6a4] ss:$8 sps:$4 sm:$0xff]   ;;  %v2637_v58 = vld [vmem:[%s3645_s1 + $0x2a0] ss:$8 sps:$4 sm:$0xff]  }
  0x71   :  { %1843 = vmatprep.subr.bf16.mxu0 %v2554_v59  ;;  %v2640_v59 = vld [vmem:[%s3645_s1 + $0x6a0] ss:$8 sps:$4 sm:$0xff]  }
  0x73   :  { %1680 = vmatpush1.bf16.msra.mxu1 %v2549_v60  ;;  %v2645_v60 = vld [vmem:[%s3645_s1 + $0x2b4] ss:$8 sps:$4 sm:$0xff]  }
  0x74   :  { %1844 = vmatpush1.bf16.msra.mxu0 %v2552_v61  ;;  %1681 = vmatprep.subr.bf16.mxu1 %v2557_v62  ;;  %v2648_v61 = vld [vmem:[%s3645_s1 + $0x6b4] ss:$8 sps:$4 sm:$0xff]   ;;  %v2643_v62 = vld [vmem:[%s3645_s1 + $0x2b0] ss:$8 sps:$4 sm:$0xff]  }
  0x75   :  { %1845 = vmatprep.subr.bf16.mxu0 %v2560_v63  ;;  %v2646_v63 = vld [vmem:[%s3645_s1 + $0x6b0] ss:$8 sps:$4 sm:$0xff]  }
  0x77   :  { %1682 = vmatpush1.bf16.msra.mxu1 %v2555_v0  ;;  %v2651_v0 = vld [vmem:[%s3645_s1 + $0x2c4] ss:$8 sps:$4 sm:$0xff]  }
  0x78   :  { %1846 = vmatpush1.bf16.msra.mxu0 %v2558_v1  ;;  %1683 = vmatprep.subr.bf16.mxu1 %v2563_v2  ;;  %v2654_v1 = vld [vmem:[%s3645_s1 + $0x6c4] ss:$8 sps:$4 sm:$0xff]   ;;  %v2649_v2 = vld [vmem:[%s3645_s1 + $0x2c0] ss:$8 sps:$4 sm:$0xff]  }
  0x79   :  { %1847 = vmatprep.subr.bf16.mxu0 %v2566_v3  ;;  %v2652_v3 = vld [vmem:[%s3645_s1 + $0x6c0] ss:$8 sps:$4 sm:$0xff]  }
  0x7b   :  { %1684 = vmatpush1.bf16.msra.mxu1 %v2561_v4  ;;  %v2657_v4 = vld [vmem:[%s3645_s1 + $0x2d4] ss:$8 sps:$4 sm:$0xff]  }
  0x7c   :  { %1848 = vmatpush1.bf16.msra.mxu0 %v2564_v5  ;;  %1685 = vmatprep.subr.bf16.mxu1 %v2569_v6  ;;  %v2660_v5 = vld [vmem:[%s3645_s1 + $0x6d4] ss:$8 sps:$4 sm:$0xff]   ;;  %v2655_v6 = vld [vmem:[%s3645_s1 + $0x2d0] ss:$8 sps:$4 sm:$0xff]  }
  0x7d   :  { %1849 = vmatprep.subr.bf16.mxu0 %v2572_v7  ;;  %v2658_v7 = vld [vmem:[%s3645_s1 + $0x6d0] ss:$8 sps:$4 sm:$0xff]  }
  0x7f   :  { %1686 = vmatpush1.bf16.msra.mxu1 %v2567_v8  ;;  %v2663_v8 = vld [vmem:[%s3645_s1 + $0x2e4] ss:$8 sps:$4 sm:$0xff]  }
  0x80   :  { %1850 = vmatpush1.bf16.msra.mxu0 %v2570_v9  ;;  %1696 = vmatprep.subr.bf16.mxu1 %v2577_v10  ;;  %v2666_v9 = vld [vmem:[%s3645_s1 + $0x6e4] ss:$8 sps:$4 sm:$0xff]   ;;  %v2661_v10 = vld [vmem:[%s3645_s1 + $0x2e0] ss:$8 sps:$4 sm:$0xff]  }
  0x81   :  { %1860 = vmatprep.subr.bf16.mxu0 %v2582_v11  ;;  %v2664_v11 = vld [vmem:[%s3645_s1 + $0x6e0] ss:$8 sps:$4 sm:$0xff]  }
  0x82   :  { %1688 = vmatmul.mubr.bf16.vlgmr.msra.gmra.mrb[0].mxu1 %v2076_v12  ;;  %v2669_v12 = vld [vmem:[%s3645_s1 + $0x2f4] ss:$8 sps:$4 sm:$0xff]  }
  0x83   :  { %1852 = vmatmul.mubr.bf16.vlgmr.msra.gmra.mrb[0].mxu0 %v2084_v14  ;;  %1697 = vmatpush1.bf16.msra.mxu1 %v2575_v13  ;;  %v2672_v13 = vld [vmem:[%s3645_s1 + $0x6f4] ss:$8 sps:$4 sm:$0xff]   ;;  %v2667_v14 = vld [vmem:[%s3645_s1 + $0x2f0] ss:$8 sps:$4 sm:$0xff]  }
  0x84   :  { %1861 = vmatpush1.bf16.msra.mxu0 %v2580_v15  ;;  %1698 = vmatprep.subr.bf16.mxu1 %v2585_v16  ;;  %v2670_v15 = vld [vmem:[%s3645_s1 + $0x6f0] ss:$8 sps:$4 sm:$0xff]   ;;  %v2677_v16 = vld [vmem:[%s3645_s1 + $0x304] ss:$8 sps:$4 sm:$0xff]  }
  0x85   :  { %1862 = vmatprep.subr.bf16.mxu0 %v2588_v17  ;;  %1728 = vmatprep.mubr.bf16.mxu1 %v2079_v19  ;;  %v2682_v17 = vld [vmem:[%s3645_s1 + $0x704] ss:$8 sps:$4 sm:$0xff]   ;;  %v2078_v19 = vcombine.low %v3231_v18, %v3231_v18  ;;  %v2680_v18 = vld [vmem:[%s3645_s1 + $0x700] ss:$8 sps:$4 sm:$0xff]  }
  0x86   :  { %1892 = vmatprep.mubr.bf16.mxu0 %v2087_v23  ;;  %v3434_v23 = vld [vmem:[%s3646_s0 + $0x38] sm:$0xff] }
  0x87   :  { %1699 = vmatpush1.bf16.msra.mxu1 %v2583_v21  ;;  %v2086_v21 = vcombine.low %v3238_v20, %v3238_v20  ;;  %v2685_v20 = vld [vmem:[%s3645_s1 + $0x314] ss:$8 sps:$4 sm:$0xff]  }
  0x88   :  { %1863 = vmatpush1.bf16.msra.mxu0 %v2586_v22  ;;  %1700 = vmatprep.subr.bf16.mxu1 %v2591_v24  ;;  %v3429_v22 = vld [vmem:[%s3646_s0 + $0x18] sm:$0xff]  ;;  %v2675_v24 = vld [vmem:[%s3645_s1 + $0x300] ss:$8 sps:$4 sm:$0xff]  }
  0x89   :  { %1864 = vmatprep.subr.bf16.mxu0 %v2594_v25  ;;  %v2688_v25 = vld [vmem:[%s3645_s1 + $0x714] ss:$8 sps:$4 sm:$0xff]  }
  0x8b   :  { %1701 = vmatpush1.bf16.msra.mxu1 %v2589_v26  ;;  %v2081_v26 = vcombine.high %v3429_v22, %v3429_v22 }
  0x8c   :  { %1865 = vmatpush1.bf16.msra.mxu0 %v2592_v27  ;;  %1702 = vmatprep.subr.bf16.mxu1 %v2597_v28  ;;  %v2089_v27 = vcombine.high %v3434_v23, %v3434_v23  ;;  %v2683_v28 = vld [vmem:[%s3645_s1 + $0x310] ss:$8 sps:$4 sm:$0xff]  }
  0x8d   :  { %1866 = vmatprep.subr.bf16.mxu0 %v2600_v29  ;;  %v2686_v29 = vld [vmem:[%s3645_s1 + $0x710] ss:$8 sps:$4 sm:$0xff]  }
  0x8f   :  { %1703 = vmatpush1.bf16.msra.mxu1 %v2595_v30  ;;  %v2691_v30 = vld [vmem:[%s3645_s1 + $0x324] ss:$8 sps:$4 sm:$0xff]  }
  0x90   :  { %1867 = vmatpush1.bf16.msra.mxu0 %v2598_v31  ;;  %1704 = vmatprep.subr.bf16.mxu1 %v2603_v32  ;;  %v2694_v31 = vld [vmem:[%s3645_s1 + $0x724] ss:$8 sps:$4 sm:$0xff]   ;;  %v2689_v32 = vld [vmem:[%s3645_s1 + $0x320] ss:$8 sps:$4 sm:$0xff]  }
  0x91   :  { %1868 = vmatprep.subr.bf16.mxu0 %v2606_v33  ;;  %v2692_v33 = vld [vmem:[%s3645_s1 + $0x720] ss:$8 sps:$4 sm:$0xff]  }
  0x93   :  { %1705 = vmatpush1.bf16.msra.mxu1 %v2601_v34  ;;  %v2697_v34 = vld [vmem:[%s3645_s1 + $0x334] ss:$8 sps:$4 sm:$0xff]  }
  0x94   :  { %1869 = vmatpush1.bf16.msra.mxu0 %v2604_v35  ;;  %1706 = vmatprep.subr.bf16.mxu1 %v2609_v36  ;;  %v2700_v35 = vld [vmem:[%s3645_s1 + $0x734] ss:$8 sps:$4 sm:$0xff]   ;;  %v2695_v36 = vld [vmem:[%s3645_s1 + $0x330] ss:$8 sps:$4 sm:$0xff]  }
  0x95   :  { %1870 = vmatprep.subr.bf16.mxu0 %v2612_v37  ;;  %v2698_v37 = vld [vmem:[%s3645_s1 + $0x730] ss:$8 sps:$4 sm:$0xff]  }
  0x97   :  { %1707 = vmatpush1.bf16.msra.mxu1 %v2607_v38  ;;  %v2703_v38 = vld [vmem:[%s3645_s1 + $0x344] ss:$8 sps:$4 sm:$0xff]  }
  0x98   :  { %1871 = vmatpush1.bf16.msra.mxu0 %v2610_v39  ;;  %1708 = vmatprep.subr.bf16.mxu1 %v2615_v40  ;;  %v2706_v39 = vld [vmem:[%s3645_s1 + $0x744] ss:$8 sps:$4 sm:$0xff]   ;;  %v2701_v40 = vld [vmem:[%s3645_s1 + $0x340] ss:$8 sps:$4 sm:$0xff]  }
  0x99   :  { %1872 = vmatprep.subr.bf16.mxu0 %v2618_v41  ;;  %v2704_v41 = vld [vmem:[%s3645_s1 + $0x740] ss:$8 sps:$4 sm:$0xff]  }
  0x9b   :  { %1709 = vmatpush1.bf16.msra.mxu1 %v2613_v42  ;;  %v2709_v42 = vld [vmem:[%s3645_s1 + $0x354] ss:$8 sps:$4 sm:$0xff]  }
  0x9c   :  { %1873 = vmatpush1.bf16.msra.mxu0 %v2616_v43  ;;  %1710 = vmatprep.subr.bf16.mxu1 %v2621_v44  ;;  %v2712_v43 = vld [vmem:[%s3645_s1 + $0x754] ss:$8 sps:$4 sm:$0xff]   ;;  %v2707_v44 = vld [vmem:[%s3645_s1 + $0x350] ss:$8 sps:$4 sm:$0xff]  }
  0x9d   :  { %1874 = vmatprep.subr.bf16.mxu0 %v2624_v45  ;;  %v2710_v45 = vld [vmem:[%s3645_s1 + $0x750] ss:$8 sps:$4 sm:$0xff]  }
  0x9f   :  { %1711 = vmatpush1.bf16.msra.mxu1 %v2619_v46  ;;  %v2715_v46 = vld [vmem:[%s3645_s1 + $0x364] ss:$8 sps:$4 sm:$0xff]  }
  0xa0   :  { %1875 = vmatpush1.bf16.msra.mxu0 %v2622_v47  ;;  %1712 = vmatprep.subr.bf16.mxu1 %v2627_v48  ;;  %v2718_v47 = vld [vmem:[%s3645_s1 + $0x764] ss:$8 sps:$4 sm:$0xff]   ;;  %v2713_v48 = vld [vmem:[%s3645_s1 + $0x360] ss:$8 sps:$4 sm:$0xff]  }
  0xa1   :  { %1876 = vmatprep.subr.bf16.mxu0 %v2630_v49  ;;  %v2716_v49 = vld [vmem:[%s3645_s1 + $0x760] ss:$8 sps:$4 sm:$0xff]  }
  0xa3   :  { %1713 = vmatpush1.bf16.msra.mxu1 %v2625_v50  ;;  %v2721_v50 = vld [vmem:[%s3645_s1 + $0x374] ss:$8 sps:$4 sm:$0xff]  }
  0xa4   :  { %1877 = vmatpush1.bf16.msra.mxu0 %v2628_v51  ;;  %1714 = vmatprep.subr.bf16.mxu1 %v2633_v52  ;;  %v2724_v51 = vld [vmem:[%s3645_s1 + $0x774] ss:$8 sps:$4 sm:$0xff]   ;;  %v2719_v52 = vld [vmem:[%s3645_s1 + $0x370] ss:$8 sps:$4 sm:$0xff]  }
  0xa5   :  { %1878 = vmatprep.subr.bf16.mxu0 %v2636_v53  ;;  %v2722_v53 = vld [vmem:[%s3645_s1 + $0x770] ss:$8 sps:$4 sm:$0xff]  }
  0xa7   :  { %1715 = vmatpush1.bf16.msra.mxu1 %v2631_v54  ;;  %v2727_v54 = vld [vmem:[%s3645_s1 + $0x384] ss:$8 sps:$4 sm:$0xff]  }
  0xa8   :  { %1879 = vmatpush1.bf16.msra.mxu0 %v2634_v55  ;;  %1716 = vmatprep.subr.bf16.mxu1 %v2639_v56  ;;  %v2730_v55 = vld [vmem:[%s3645_s1 + $0x784] ss:$8 sps:$4 sm:$0xff]   ;;  %v2725_v56 = vld [vmem:[%s3645_s1 + $0x380] ss:$8 sps:$4 sm:$0xff]  }
  0xa9   :  { %1880 = vmatprep.subr.bf16.mxu0 %v2642_v57  ;;  %v2728_v57 = vld [vmem:[%s3645_s1 + $0x780] ss:$8 sps:$4 sm:$0xff]  }
  0xab   :  { %1717 = vmatpush1.bf16.msra.mxu1 %v2637_v58  ;;  %v2733_v58 = vld [vmem:[%s3645_s1 + $0x394] ss:$8 sps:$4 sm:$0xff]  }
  0xac   :  { %1881 = vmatpush1.bf16.msra.mxu0 %v2640_v59  ;;  %1718 = vmatprep.subr.bf16.mxu1 %v2645_v60  ;;  %v2736_v59 = vld [vmem:[%s3645_s1 + $0x794] ss:$8 sps:$4 sm:$0xff]   ;;  %v2731_v60 = vld [vmem:[%s3645_s1 + $0x390] ss:$8 sps:$4 sm:$0xff]  }
  0xad   :  { %1882 = vmatprep.subr.bf16.mxu0 %v2648_v61  ;;  %v2734_v61 = vld [vmem:[%s3645_s1 + $0x790] ss:$8 sps:$4 sm:$0xff]  }
  0xaf   :  { %1719 = vmatpush1.bf16.msra.mxu1 %v2643_v62  ;;  %v2739_v62 = vld [vmem:[%s3645_s1 + $0x3a4] ss:$8 sps:$4 sm:$0xff]  }
  0xb0   :  { %1883 = vmatpush1.bf16.msra.mxu0 %v2646_v63  ;;  %1720 = vmatprep.subr.bf16.mxu1 %v2651_v0  ;;  %v2742_v63 = vld [vmem:[%s3645_s1 + $0x7a4] ss:$8 sps:$4 sm:$0xff]   ;;  %v2737_v0 = vld [vmem:[%s3645_s1 + $0x3a0] ss:$8 sps:$4 sm:$0xff]  }
  0xb1   :  { %1884 = vmatprep.subr.bf16.mxu0 %v2654_v1  ;;  %v2740_v1 = vld [vmem:[%s3645_s1 + $0x7a0] ss:$8 sps:$4 sm:$0xff]  }
  0xb3   :  { %1721 = vmatpush1.bf16.msra.mxu1 %v2649_v2  ;;  %v2745_v2 = vld [vmem:[%s3645_s1 + $0x3b4] ss:$8 sps:$4 sm:$0xff]  }
  0xb4   :  { %1885 = vmatpush1.bf16.msra.mxu0 %v2652_v3  ;;  %1722 = vmatprep.subr.bf16.mxu1 %v2657_v4  ;;  %v2748_v3 = vld [vmem:[%s3645_s1 + $0x7b4] ss:$8 sps:$4 sm:$0xff]   ;;  %v2743_v4 = vld [vmem:[%s3645_s1 + $0x3b0] ss:$8 sps:$4 sm:$0xff]  }
  0xb5   :  { %1886 = vmatprep.subr.bf16.mxu0 %v2660_v5  ;;  %v2746_v5 = vld [vmem:[%s3645_s1 + $0x7b0] ss:$8 sps:$4 sm:$0xff]  }
  0xb7   :  { %1723 = vmatpush1.bf16.msra.mxu1 %v2655_v6  ;;  %v2751_v6 = vld [vmem:[%s3645_s1 + $0x3c4] ss:$8 sps:$4 sm:$0xff]  }
  0xb8   :  { %1887 = vmatpush1.bf16.msra.mxu0 %v2658_v7  ;;  %1724 = vmatprep.subr.bf16.mxu1 %v2663_v8  ;;  %v2754_v7 = vld [vmem:[%s3645_s1 + $0x7c4] ss:$8 sps:$4 sm:$0xff]   ;;  %v2749_v8 = vld [vmem:[%s3645_s1 + $0x3c0] ss:$8 sps:$4 sm:$0xff]  }
  0xb9   :  { %1888 = vmatprep.subr.bf16.mxu0 %v2666_v9  ;;  %v2752_v9 = vld [vmem:[%s3645_s1 + $0x7c0] ss:$8 sps:$4 sm:$0xff]  }
  0xbb   :  { %1725 = vmatpush1.bf16.msra.mxu1 %v2661_v10  ;;  %v2757_v10 = vld [vmem:[%s3645_s1 + $0x3d4] ss:$8 sps:$4 sm:$0xff]  }
  0xbc   :  { %1889 = vmatpush1.bf16.msra.mxu0 %v2664_v11  ;;  %1726 = vmatprep.subr.bf16.mxu1 %v2669_v12  ;;  %v2760_v11 = vld [vmem:[%s3645_s1 + $0x7d4] ss:$8 sps:$4 sm:$0xff]   ;;  %v2755_v12 = vld [vmem:[%s3645_s1 + $0x3d0] ss:$8 sps:$4 sm:$0xff]  }
  0xbd   :  { %1890 = vmatprep.subr.bf16.mxu0 %v2672_v13  ;;  %v2758_v13 = vld [vmem:[%s3645_s1 + $0x7d0] ss:$8 sps:$4 sm:$0xff]  }
  0xbf   :  { %1727 = vmatpush1.bf16.msra.mxu1 %v2667_v14  ;;  %v2763_v14 = vld [vmem:[%s3645_s1 + $0x3e4] ss:$8 sps:$4 sm:$0xff]  }
  0xc0   :  { %1891 = vmatpush1.bf16.msra.mxu0 %v2670_v15  ;;  %1737 = vmatprep.subr.bf16.mxu1 %v2677_v16  ;;  %v2766_v15 = vld [vmem:[%s3645_s1 + $0x7e4] ss:$8 sps:$4 sm:$0xff]   ;;  %v2761_v16 = vld [vmem:[%s3645_s1 + $0x3e0] ss:$8 sps:$4 sm:$0xff]  }
  0xc1   :  { %1901 = vmatprep.subr.bf16.mxu0 %v2682_v17  ;;  %v2764_v17 = vld [vmem:[%s3645_s1 + $0x7e0] ss:$8 sps:$4 sm:$0xff]  }
  0xc2   :  { %1729 = vmatmul.mubr.bf16.vlgmr.msra.gmra.mrb[0].mxu1 %v2078_v19  ;;  %v2769_v19 = vld [vmem:[%s3645_s1 + $0x3f4] ss:$8 sps:$4 sm:$0xff]  }
  0xc3   :  { %1893 = vmatmul.mubr.bf16.vlgmr.msra.gmra.mrb[0].mxu0 %v2086_v21  ;;  %1738 = vmatpush1.bf16.msra.mxu1 %v2675_v24  ;;  %v2772_v21 = vld [vmem:[%s3645_s1 + $0x7f4] ss:$8 sps:$4 sm:$0xff]   ;;  %v2767_v24 = vld [vmem:[%s3645_s1 + $0x3f0] ss:$8 sps:$4 sm:$0xff]  }
  0xc4   :  { %1902 = vmatpush1.bf16.msra.mxu0 %v2680_v18  ;;  %1739 = vmatprep.subr.bf16.mxu1 %v2685_v20  ;;  %v2770_v18 = vld [vmem:[%s3645_s1 + $0x7f0] ss:$8 sps:$4 sm:$0xff]   ;;  %v2080_v20 = vcombine.low %v3429_v22, %v3429_v22 }
  0xc5   :  { %1903 = vmatprep.subr.bf16.mxu0 %v2688_v25  ;;  %1769 = vmatprep.mubr.bf16.mxu1 %v2081_v26  ;;  %v2088_v25 = vcombine.low %v3434_v23, %v3434_v23 }
  0xc6   :  { %1933 = vmatprep.mubr.bf16.mxu0 %v2089_v27 }
  0xc7   :  { %1740 = vmatpush1.bf16.msra.mxu1 %v2683_v28 }
  0xc8   :  { %1904 = vmatpush1.bf16.msra.mxu0 %v2686_v29  ;;  %1741 = vmatprep.subr.bf16.mxu1 %v2691_v30 }
  0xc9   :  { %1905 = vmatprep.subr.bf16.mxu0 %v2694_v31 }
  0xcb   :  { %1742 = vmatpush1.bf16.msra.mxu1 %v2689_v32 }
  0xcc   :  { %1906 = vmatpush1.bf16.msra.mxu0 %v2692_v33  ;;  %1743 = vmatprep.subr.bf16.mxu1 %v2697_v34 }
  0xcd   :  { %1907 = vmatprep.subr.bf16.mxu0 %v2700_v35 }
  0xcf   :  { %1744 = vmatpush1.bf16.msra.mxu1 %v2695_v36 }
  0xd0   :  { %1908 = vmatpush1.bf16.msra.mxu0 %v2698_v37  ;;  %1745 = vmatprep.subr.bf16.mxu1 %v2703_v38 }
  0xd1   :  { %1909 = vmatprep.subr.bf16.mxu0 %v2706_v39 }
  0xd3   :  { %1746 = vmatpush1.bf16.msra.mxu1 %v2701_v40 }
  0xd4   :  { %1910 = vmatpush1.bf16.msra.mxu0 %v2704_v41  ;;  %1747 = vmatprep.subr.bf16.mxu1 %v2709_v42 }
  0xd5   :  { %1911 = vmatprep.subr.bf16.mxu0 %v2712_v43 }
  0xd7   :  { %1748 = vmatpush1.bf16.msra.mxu1 %v2707_v44 }
  0xd8   :  { %1912 = vmatpush1.bf16.msra.mxu0 %v2710_v45  ;;  %1749 = vmatprep.subr.bf16.mxu1 %v2715_v46 }
  0xd9   :  { %1913 = vmatprep.subr.bf16.mxu0 %v2718_v47 }
  0xdb   :  { %1750 = vmatpush1.bf16.msra.mxu1 %v2713_v48 }
  0xdc   :  { %1914 = vmatpush1.bf16.msra.mxu0 %v2716_v49  ;;  %1751 = vmatprep.subr.bf16.mxu1 %v2721_v50 }
  0xdd   :  { %1915 = vmatprep.subr.bf16.mxu0 %v2724_v51 }
  0xdf   :  { %1752 = vmatpush1.bf16.msra.mxu1 %v2719_v52 }
  0xe0   :  { %1916 = vmatpush1.bf16.msra.mxu0 %v2722_v53  ;;  %1753 = vmatprep.subr.bf16.mxu1 %v2727_v54 }
  0xe1   :  { %1917 = vmatprep.subr.bf16.mxu0 %v2730_v55 }
  0xe3   :  { %1754 = vmatpush1.bf16.msra.mxu1 %v2725_v56 }
  0xe4   :  { %1918 = vmatpush1.bf16.msra.mxu0 %v2728_v57  ;;  %1755 = vmatprep.subr.bf16.mxu1 %v2733_v58 }
  0xe5   :  { %1919 = vmatprep.subr.bf16.mxu0 %v2736_v59 }
  0xe7   :  { %1756 = vmatpush1.bf16.msra.mxu1 %v2731_v60 }
  0xe8   :  { %1920 = vmatpush1.bf16.msra.mxu0 %v2734_v61  ;;  %1757 = vmatprep.subr.bf16.mxu1 %v2739_v62 }
  0xe9   :  { %1921 = vmatprep.subr.bf16.mxu0 %v2742_v63 }
  0xeb   :  { %1758 = vmatpush1.bf16.msra.mxu1 %v2737_v0 }
  0xec   :  { %1922 = vmatpush1.bf16.msra.mxu0 %v2740_v1  ;;  %1759 = vmatprep.subr.bf16.mxu1 %v2745_v2 }
  0xed   :  { %1923 = vmatprep.subr.bf16.mxu0 %v2748_v3 }
  0xef   :  { %1760 = vmatpush1.bf16.msra.mxu1 %v2743_v4  ;;  %v2781_v4 = vmov 1966171168  }
  0xf0   :  { %1924 = vmatpush1.bf16.msra.mxu0 %v2746_v5  ;;  %1761 = vmatprep.subr.bf16.mxu1 %v2751_v6  ;;  %v1991_v5 = vunpack.c.l.s4 %v2781_v4  ;;  %v1993_v6 = vlaneseq }
  0xf1   :  { %1925 = vmatprep.subr.bf16.mxu0 %v2754_v7 }
  0xf2   :  { %v1992_v7 = vunpack.c.0.s8 %v1991_v5 }
  0xf3   :  { %1762 = vmatpush1.bf16.msra.mxu1 %v2749_v8  ;;  %v1994_v8 = vshrl.u32 %v1993_v6, 7 }
  0xf4   :  { %1926 = vmatpush1.bf16.msra.mxu0 %v2752_v9  ;;  %1763 = vmatprep.subr.bf16.mxu1 %v2757_v10 }
  0xf5   :  { %1927 = vmatprep.subr.bf16.mxu0 %v2760_v11  ;;  %v1995_v10 = vsub.s32 %v1992_v7, %v1994_v8 }
  0xf7   :  { %1764 = vmatpush1.bf16.msra.mxu1 %v2755_v12 }
  0xf8   :  { %1928 = vmatpush1.bf16.msra.mxu0 %v2758_v13  ;;  %1765 = vmatprep.subr.bf16.mxu1 %v2763_v14  ;;  %v2346_v14 = vld [vmem:[%s3647_s2 + $0x1] ss:$8 sm:$0x3] }
  0xf9   :  { %1929 = vmatprep.subr.bf16.mxu0 %v2766_v15 }
  0xfb   :  { %1766 = vmatpush1.bf16.msra.mxu1 %v2761_v16  ;;  %v2011_v16 = vsub.s32 0, %v1994_v8 }
  0xfc   :  { %1930 = vmatpush1.bf16.msra.mxu0 %v2764_v17  ;;  %1767 = vmatprep.subr.bf16.mxu1 %v2769_v19  ;;  %v2015_v17 = vsub.s32 1, %v1994_v8 }
  0xfd   :  { %1931 = vmatprep.subr.bf16.mxu0 %v2772_v21 }
  0xff   :  { %1768 = vmatpush1.bf16.msra.mxu1 %v2767_v24 }
 0x100   :  { %1932 = vmatpush1.bf16.msra.mxu0 %v2770_v18 }
 0x102   :  { %1770 = vmatmul.mubr.bf16.vlgmr.msra.gmra.mrb[0].mxu1 %v2080_v20 }
 0x103   :  { %1934 = vmatmul.mubr.bf16.vlgmr.msra.gmra.mrb[0].mxu0 %v2088_v25 }
 0x1d5   :  { %v1771_v26 = vpop.f32.mrb[0].mxu1 }
 0x1d6   :  { %v1935_v27 = vpop.f32.mrb[0].mxu0  ;;  %v1773_v29 = vpop.f32.mrb[1].mxu1 }
 0x1d7   :  { %v3630_v28 = vadd.f32 %v1935_v27, %v1771_v26  ;;  %v1937_v30 = vpop.f32.mrb[1].mxu0  ;;  %v1775_v32 = vpop.f32.mrb[2].mxu1 }
 0x1d8   :  { %v2351_v31 = vadd.f32 %v1937_v30, %v1773_v29  ;;  %v1939_v33 = vpop.f32.mrb[2].mxu0  ;;  %v1776_v35 = vpop.f32.mrb[3].mxu1  ;;  %v2347_v30 = vld [vmem:[%s3647_s2 + $0x2] ss:$8 sm:$0x3] }
 0x1d9   :  { %v1947_v34 = vrot.slane %v3630_v28, 4  ;;  %v1940_v22 = vpop.f32.mrb[3].mxu0 }
 0x1da   :  { %v1953_v36 = vrot.slane %v2351_v31, 4 }
 0x1db   :  { %v1948_v23 = vadd.f32 %v3630_v28, %v1947_v34 }
 0x1dc   :  { %v1954_v37 = vadd.f32 %v2351_v31, %v1953_v36 }
 0x1dd   :  { %v1949_v38 = vrot.slane %v1948_v23, 2 }
 0x1de   :  { %v1955_v39 = vrot.slane %v1954_v37, 2 }
 0x1df   :  { %v1950_v40 = vadd.f32 %v1949_v38, %v1948_v23 }
 0x1e0   :  { %v1956_v41 = vadd.f32 %v1955_v39, %v1954_v37 }
 0x1e1   :  { %v1951_v42 = vrot.slane %v1950_v40, 1 }
 0x1e2   :  { %v1957_v43 = vrot.slane %v1956_v41, 1 }
 0x1e3   :  { %v1952_v44 = vadd.f32 %v1951_v42, %v1950_v40 }
 0x1e4   :  { %v1958_v45 = vadd.f32 %v1957_v43, %v1956_v41 }
 0x1e5   :  { %v1959_v46 = vmul.f32 0.125, %v1952_v44 }
 0x1e6   :  { %v1960_v47 = vmul.f32 0.125, %v1958_v45 }
 0x1e7   :  { %v1961_v48 = vsub.f32 %v3630_v28, %v1959_v46 }
 0x1e8   :  { %v1962_v49 = vsub.f32 %v2351_v31, %v1960_v47 }
 0x1e9   :  { %v1965_v50 = vmul.f32 %v1961_v48, %v1961_v48 }
 0x1ea   :  { %v1966_v51 = vmul.f32 %v1962_v49, %v1962_v49 }
 0x1eb   :  { %v1967_v52 = vrot.slane %v1965_v50, 4 }
 0x1ec   :  { %v1973_v53 = vrot.slane %v1966_v51, 4 }
 0x1ed   :  { %v1968_v54 = vadd.f32 %v1967_v52, %v1965_v50 }
 0x1ee   :  { %v1974_v55 = vadd.f32 %v1973_v53, %v1966_v51 }
 0x1ef   :  { %v1969_v56 = vrot.slane %v1968_v54, 2 }
 0x1f0   :  { %v1975_v57 = vrot.slane %v1974_v55, 2 }
 0x1f1   :  { %v1970_v58 = vadd.f32 %v1969_v56, %v1968_v54 }
 0x1f2   :  { %v1976_v59 = vadd.f32 %v1975_v57, %v1974_v55 }
 0x1f3   :  { %v1971_v60 = vrot.slane %v1970_v58, 1 }
 0x1f4   :  { %v1977_v61 = vrot.slane %v1976_v59, 1 }
 0x1f5   :  { %v1972_v62 = vadd.f32 %v1971_v60, %v1970_v58 }
 0x1f6   :  { %v1978_v63 = vadd.f32 %v1977_v61, %v1976_v59 }
 0x1f7   :  { %v1979_v0 = vmul.f32 0.125, %v1972_v62 }
 0x1f8   :  { %v1980_v1 = vmul.f32 0.125, %v1978_v63 }
 0x1f9   :  { %v1983_v2 = vadd.f32 1e-05, %v1979_v0 }
 0x1fa   :  { %v1984_v3 = vadd.f32 1e-05, %v1980_v1 }
 0x1fb   :  { %2777 = vrsqrt.f32 %v1983_v2 }
 0x1fc   :  { %2779 = vrsqrt.f32 %v1984_v3 }
 0x205   :  { %v2778_v9 = vpop.eup %2777 }
 0x206   :  { %v2780_v11 = vpop.eup %2779 }
 0x207   :  { %v1989_v12 = vcombine.low %v2778_v9, %v2780_v11 }
 0x209   :  { %v1996_v13 = vrot.slane %v1989_v12, %v1995_v10 }
 0x20b   :  { %v2003_v15 = vrot.slane %v1996_v13, %v1995_v10 }
 0x20d   :  { %v2005_v19 = vmul.f32 %v2346_v14, %v2003_v15 }
 0x20f   :  { %v2012_v21 = vrot.slane %v2005_v19, %v2011_v16  ;;  %v2016_v24 = vrot.slane %v2005_v19, %v2015_v17 }
 0x211   :  { %v2019_v18 = vmul.f32 %v2012_v21, %v1959_v46  ;;  %v2020_v20 = vmul.f32 %v2016_v24, %v1960_v47  ;;  %v2040_v25 = vmul.f32 %v3630_v28, %v2012_v21  ;;  %v2041_v26 = vmul.f32 %v2351_v31, %v2016_v24 }
 0x213   :  { %v2023_v27 = vcombine.low %v2019_v18, %v2020_v20 }
 0x215   :  { %v2030_v29 = vrot.slane %v2023_v27, %v1995_v10 }
 0x217   :  { %v2037_v32 = vrot.slane %v2030_v29, %v1995_v10 }
 0x219   :  { %v2039_v33 = vsub.f32 %v2347_v30, %v2037_v32 }
 0x21b   :  { %v2046_v34 = vrot.slane %v2039_v33, %v2011_v16  ;;  %v2050_v35 = vrot.slane %v2039_v33, %v2015_v17 }
 0x21d   :  { %v2053_v22 = vadd.f32 %v2046_v34, %v2040_v25  ;;  %v2054_v36 = vadd.f32 %v2050_v35, %v2041_v26 }
 0x21f   :  { %vm2055_vm0 = vcmp.gt.f32.partialorder %v2053_v22, 0.0  ;;  %vm2056_vm1 = vcmp.gt.f32.partialorder %v2054_v36, 0.0  ;;  %v2057_v23 = vmul.f32 0.2, %v2053_v22  ;;  %v2058_v37 = vmul.f32 0.2, %v2054_v36 }
 0x221   :  { %v2059_v38 = vsel %vm2055_vm0, %v2053_v22, %v2057_v23  ;;  %v2060_v39 = vsel %vm2056_vm1, %v2054_v36, %v2058_v37 }
 0x222   :  { %v2349_v28 = vpack.c.bf16 %v2060_v39, %v2059_v38 }
 0x224   :  { %2069 = vst [vmem:[%s3648_s3] sm:$0xff] %v2349_v28 }

// kernel: forward.9
= control target key start
LH: loop header
LB: loop body
LE: loop exit
PB: predicated region body
PF: predicated region fallthrough
CT: control target
= control target key end

     0   :  { %s4603_s1 = inlined_call_operand.vmem [shape: bf16[4096,128], index: 1, kind: input, shape index: {}]   ;;  %s4604_s2 = inlined_call_operand.vmem [shape: f32[8,128], index: 2, kind: input, shape index: {}]   ;;  %s4605_s0 = inlined_call_operand.vmem [shape: bf16[8,4096], index: 0, kind: input, shape index: {}]   ;;  %s4606_s3 = inlined_call_operand.vmem [shape: f32[8,128], index: 3, kind: output, shape index: {}]  }
   0x1   :  { %v3476_v0 = vld [vmem:[%s4603_s1 + $0x40] sm:$0xff]   ;;  %v3480_v4 = vld [vmem:[%s4603_s1 + $0x48] sm:$0xff]   ;;  %v3484_v8 = vld [vmem:[%s4603_s1 + $0x50] sm:$0xff]  }
   0x2   :  { %v3477_v1 = vld [vmem:[%s4603_s1 + $0xc0] sm:$0xff]   ;;  %3124 = vmatprep.subr.bf16.mxu0 %v3476_v0  ;;  %v3481_v5 = vld [vmem:[%s4603_s1 + $0xc8] sm:$0xff]   ;;  %v3485_v9 = vld [vmem:[%s4603_s1 + $0xd0] sm:$0xff]  }
   0x3   :  { %v3478_v2 = vld [vmem:[%s4603_s1] sm:$0xff]   ;;  %3146 = vmatprep.subr.bf16.mxu1 %v3477_v1  ;;  %v3482_v6 = vld [vmem:[%s4603_s1 + $0x8] sm:$0xff]   ;;  %v3486_v10 = vld [vmem:[%s4603_s1 + $0x10] sm:$0xff]  }
   0x4   :  { %v3479_v3 = vld [vmem:[%s4603_s1 + $0x80] sm:$0xff]   ;;  %3125 = vmatpush3.bf16.msra.mxu0 %v3478_v2  ;;  %v3483_v7 = vld [vmem:[%s4603_s1 + $0x88] sm:$0xff]   ;;  %v3487_v11 = vld [vmem:[%s4603_s1 + $0x90] sm:$0xff]  }
   0x5   :  { %3147 = vmatpush3.bf16.msra.mxu1 %v3479_v3  ;;  %3126 = vmatprep.subr.bf16.mxu0 %v3480_v4  ;;  %v3488_v12 = vld [vmem:[%s4603_s1 + $0x58] sm:$0xff]   ;;  %v3492_v16 = vld [vmem:[%s4603_s1 + $0x60] sm:$0xff]   ;;  %v3496_v20 = vld [vmem:[%s4603_s1 + $0x68] sm:$0xff]  }
   0x6   :  { %3148 = vmatprep.subr.bf16.mxu1 %v3481_v5  ;;  %v3489_v13 = vld [vmem:[%s4603_s1 + $0xd8] sm:$0xff]   ;;  %v3493_v17 = vld [vmem:[%s4603_s1 + $0xe0] sm:$0xff]   ;;  %v3497_v21 = vld [vmem:[%s4603_s1 + $0xe8] sm:$0xff]  }
   0x7   :  { %v3490_v14 = vld [vmem:[%s4603_s1 + $0x18] sm:$0xff]   ;;  %v3494_v18 = vld [vmem:[%s4603_s1 + $0x20] sm:$0xff]   ;;  %v3498_v22 = vld [vmem:[%s4603_s1 + $0x28] sm:$0xff]  }
   0x8   :  { %3127 = vmatpush3.bf16.msra.mxu0 %v3482_v6  ;;  %v3491_v15 = vld [vmem:[%s4603_s1 + $0x98] sm:$0xff]   ;;  %v3495_v19 = vld [vmem:[%s4603_s1 + $0xa0] sm:$0xff]   ;;  %v3499_v23 = vld [vmem:[%s4603_s1 + $0xa8] sm:$0xff]  }
   0x9   :  { %3149 = vmatpush3.bf16.msra.mxu1 %v3483_v7  ;;  %3128 = vmatprep.subr.bf16.mxu0 %v3484_v8  ;;  %v3500_v24 = vld [vmem:[%s4603_s1 + $0x70] sm:$0xff]   ;;  %v3504_v28 = vld [vmem:[%s4603_s1 + $0x78] sm:$0xff]   ;;  %v15_v32 = vld [vmem:[%s4605_s0] sm:$0xff] }
   0xa   :  { %3150 = vmatprep.subr.bf16.mxu1 %v3485_v9  ;;  %v3501_v25 = vld [vmem:[%s4603_s1 + $0xf0] sm:$0xff]   ;;  %v3505_v29 = vld [vmem:[%s4603_s1 + $0xf8] sm:$0xff]   ;;  %v16_v33 = vld [vmem:[%s4605_s0 + $0x8] sm:$0xff]  ;;  %v2836_v34 = vcombine.low %v15_v32, %v15_v32  ;;  %v2837_v35 = vcombine.high %v15_v32, %v15_v32 }
   0xb   :  { %v3502_v26 = vld [vmem:[%s4603_s1 + $0x30] sm:$0xff]   ;;  %v3506_v30 = vld [vmem:[%s4603_s1 + $0x38] sm:$0xff]   ;;  %v2838_v36 = vcombine.low %v16_v33, %v16_v33  ;;  %v2839_v37 = vcombine.high %v16_v33, %v16_v33  ;;  %v3512_v38 = vld [vmem:[%s4603_s1 + $0x140] sm:$0xff]  }
   0xc   :  { %3129 = vmatpush3.bf16.msra.mxu0 %v3486_v10  ;;  %v3503_v27 = vld [vmem:[%s4603_s1 + $0xb0] sm:$0xff]   ;;  %v3507_v31 = vld [vmem:[%s4603_s1 + $0xb8] sm:$0xff]   ;;  %v3513_v39 = vld [vmem:[%s4603_s1 + $0x1c0] sm:$0xff]   ;;  %2223 = vmatprep.mubr.bf16.mxu0 %v2837_v35 }
   0xd   :  { %3151 = vmatpush3.bf16.msra.mxu1 %v3487_v11  ;;  %3130 = vmatprep.subr.bf16.mxu0 %v3488_v12  ;;  %v3514_v40 = vld [vmem:[%s4603_s1 + $0x100] sm:$0xff]   ;;  %v3516_v42 = vld [vmem:[%s4603_s1 + $0x148] sm:$0xff]   ;;  %v3520_v46 = vld [vmem:[%s4603_s1 + $0x150] sm:$0xff]  }
   0xe   :  { %3152 = vmatprep.subr.bf16.mxu1 %v3489_v13  ;;  %2263 = vmatprep.mubr.bf16.mxu1 %v2839_v37  ;;  %v3515_v41 = vld [vmem:[%s4603_s1 + $0x180] sm:$0xff]   ;;  %v3517_v43 = vld [vmem:[%s4603_s1 + $0x1c8] sm:$0xff]   ;;  %v3521_v47 = vld [vmem:[%s4603_s1 + $0x1d0] sm:$0xff]  }
   0xf   :  { %v3518_v44 = vld [vmem:[%s4603_s1 + $0x108] sm:$0xff]   ;;  %v3522_v48 = vld [vmem:[%s4603_s1 + $0x110] sm:$0xff]   ;;  %v3524_v50 = vld [vmem:[%s4603_s1 + $0x158] sm:$0xff]  }
  0x10   :  { %3131 = vmatpush3.bf16.msra.mxu0 %v3490_v14  ;;  %v3519_v45 = vld [vmem:[%s4603_s1 + $0x188] sm:$0xff]   ;;  %v3523_v49 = vld [vmem:[%s4603_s1 + $0x190] sm:$0xff]   ;;  %v3525_v51 = vld [vmem:[%s4603_s1 + $0x1d8] sm:$0xff]  }
  0x11   :  { %3153 = vmatpush3.bf16.msra.mxu1 %v3491_v15  ;;  %3132 = vmatprep.subr.bf16.mxu0 %v3492_v16  ;;  %v3526_v52 = vld [vmem:[%s4603_s1 + $0x118] sm:$0xff]   ;;  %v3528_v54 = vld [vmem:[%s4603_s1 + $0x160] sm:$0xff]   ;;  %v3532_v58 = vld [vmem:[%s4603_s1 + $0x168] sm:$0xff]  }
  0x12   :  { %3154 = vmatprep.subr.bf16.mxu1 %v3493_v17  ;;  %v3527_v53 = vld [vmem:[%s4603_s1 + $0x198] sm:$0xff]   ;;  %v3529_v55 = vld [vmem:[%s4603_s1 + $0x1e0] sm:$0xff]   ;;  %v3533_v59 = vld [vmem:[%s4603_s1 + $0x1e8] sm:$0xff]  }
  0x13   :  { %v3530_v56 = vld [vmem:[%s4603_s1 + $0x120] sm:$0xff]   ;;  %v3534_v60 = vld [vmem:[%s4603_s1 + $0x128] sm:$0xff]   ;;  %v3536_v62 = vld [vmem:[%s4603_s1 + $0x170] sm:$0xff]  }
  0x14   :  { %3133 = vmatpush3.bf16.msra.mxu0 %v3494_v18  ;;  %v3531_v57 = vld [vmem:[%s4603_s1 + $0x1a0] sm:$0xff]   ;;  %v3535_v61 = vld [vmem:[%s4603_s1 + $0x1a8] sm:$0xff]   ;;  %v3537_v63 = vld [vmem:[%s4603_s1 + $0x1f0] sm:$0xff]  }
  0x15   :  { %3155 = vmatpush3.bf16.msra.mxu1 %v3495_v19  ;;  %3134 = vmatprep.subr.bf16.mxu0 %v3496_v20  ;;  %v3538_v0 = vld [vmem:[%s4603_s1 + $0x130] sm:$0xff]   ;;  %v3540_v2 = vld [vmem:[%s4603_s1 + $0x178] sm:$0xff]   ;;  %v3548_v12 = vld [vmem:[%s4603_s1 + $0x240] sm:$0xff]  }
  0x16   :  { %3156 = vmatprep.subr.bf16.mxu1 %v3497_v21  ;;  %v3539_v1 = vld [vmem:[%s4603_s1 + $0x1b0] sm:$0xff]   ;;  %v3541_v3 = vld [vmem:[%s4603_s1 + $0x1f8] sm:$0xff]   ;;  %v3549_v13 = vld [vmem:[%s4603_s1 + $0x2c0] sm:$0xff]  }
  0x17   :  { %v3542_v4 = vld [vmem:[%s4603_s1 + $0x138] sm:$0xff]   ;;  %v17_v6 = vld [vmem:[%s4605_s0 + $0x10] sm:$0xff]  ;;  %v3550_v14 = vld [vmem:[%s4603_s1 + $0x200] sm:$0xff]  }
  0x18   :  { %3135 = vmatpush3.bf16.msra.mxu0 %v3498_v22  ;;  %v3543_v5 = vld [vmem:[%s4603_s1 + $0x1b8] sm:$0xff]   ;;  %v2840_v7 = vcombine.low %v17_v6, %v17_v6  ;;  %v2841_v8 = vcombine.high %v17_v6, %v17_v6  ;;  %v3551_v15 = vld [vmem:[%s4603_s1 + $0x280] sm:$0xff]   ;;  %v3552_v16 = vld [vmem:[%s4603_s1 + $0x248] sm:$0xff]  }
  0x19   :  { %3157 = vmatpush3.bf16.msra.mxu1 %v3499_v23  ;;  %3136 = vmatprep.subr.bf16.mxu0 %v3500_v24  ;;  %v18_v9 = vld [vmem:[%s4605_s0 + $0x18] sm:$0xff]  ;;  %v3553_v17 = vld [vmem:[%s4603_s1 + $0x2c8] sm:$0xff]   ;;  %v3556_v20 = vld [vmem:[%s4603_s1 + $0x250] sm:$0xff]  }
  0x1a   :  { %3158 = vmatprep.subr.bf16.mxu1 %v3501_v25  ;;  %v2842_v10 = vcombine.low %v18_v9, %v18_v9  ;;  %v2843_v11 = vcombine.high %v18_v9, %v18_v9  ;;  %v3554_v18 = vld [vmem:[%s4603_s1 + $0x208] sm:$0xff]   ;;  %v3557_v21 = vld [vmem:[%s4603_s1 + $0x2d0] sm:$0xff]   ;;  %v3560_v24 = vld [vmem:[%s4603_s1 + $0x258] sm:$0xff]  }
  0x1b   :  { %v3555_v19 = vld [vmem:[%s4603_s1 + $0x288] sm:$0xff]   ;;  %v3558_v22 = vld [vmem:[%s4603_s1 + $0x210] sm:$0xff]   ;;  %v3561_v25 = vld [vmem:[%s4603_s1 + $0x2d8] sm:$0xff]  }
  0x1c   :  { %3137 = vmatpush3.bf16.msra.mxu0 %v3502_v26  ;;  %v3559_v23 = vld [vmem:[%s4603_s1 + $0x290] sm:$0xff]   ;;  %v3562_v26 = vld [vmem:[%s4603_s1 + $0x218] sm:$0xff]   ;;  %v3568_v32 = vld [vmem:[%s4603_s1 + $0x268] sm:$0xff]  }
  0x1d   :  { %3159 = vmatpush3.bf16.msra.mxu1 %v3503_v27  ;;  %3138 = vmatprep.subr.bf16.mxu0 %v3504_v28  ;;  %v3563_v27 = vld [vmem:[%s4603_s1 + $0x298] sm:$0xff]   ;;  %v3564_v28 = vld [vmem:[%s4603_s1 + $0x260] sm:$0xff]   ;;  %v3569_v33 = vld [vmem:[%s4603_s1 + $0x2e8] sm:$0xff]  }
  0x1e   :  { %3160 = vmatprep.subr.bf16.mxu1 %v3505_v29  ;;  %v3565_v29 = vld [vmem:[%s4603_s1 + $0x2e0] sm:$0xff]   ;;  %v3571_v35 = vld [vmem:[%s4603_s1 + $0x2a8] sm:$0xff]   ;;  %v3573_v37 = vld [vmem:[%s4603_s1 + $0x2f0] sm:$0xff]  }
  0x1f   :  { %v3604_v6 = vld [vmem:[%s4603_s1 + $0x368] sm:$0xff]  }
  0x20   :  { %3139 = vmatpush3.bf16.msra.mxu0 %v3506_v30  ;;  %v3566_v30 = vld [vmem:[%s4603_s1 + $0x220] sm:$0xff]   ;;  %v3607_v9 = vld [vmem:[%s4603_s1 + $0x3a8] sm:$0xff]  }
  0x21   :  { %3161 = vmatpush3.bf16.msra.mxu1 %v3507_v31  ;;  %3168 = vmatprep.subr.bf16.mxu0 %v3512_v38  ;;  %v3567_v31 = vld [vmem:[%s4603_s1 + $0x2a0] sm:$0xff]   ;;  %v3574_v38 = vld [vmem:[%s4603_s1 + $0x230] sm:$0xff]  }
  0x22   :  { %3190 = vmatprep.subr.bf16.mxu1 %v3513_v39  ;;  %v3575_v39 = vld [vmem:[%s4603_s1 + $0x2b0] sm:$0xff]  }
  0x23   :  { %2224 = vmatmul.mubr.bf16.vlgmr.msra.gmra.mrb[0].mxu0 %v2836_v34  ;;  %v3570_v34 = vld [vmem:[%s4603_s1 + $0x228] sm:$0xff]  }
  0x24   :  { %2264 = vmatmul.mubr.bf16.vlgmr.msra.gmra.mrb[0].mxu1 %v2838_v36  ;;  %3169 = vmatpush3.bf16.msra.mxu0 %v3514_v40  ;;  %v3572_v36 = vld [vmem:[%s4603_s1 + $0x270] sm:$0xff]   ;;  %v3576_v40 = vld [vmem:[%s4603_s1 + $0x278] sm:$0xff]  }
  0x25   :  { %3191 = vmatpush3.bf16.msra.mxu1 %v3515_v41  ;;  %3170 = vmatprep.subr.bf16.mxu0 %v3516_v42  ;;  %v3577_v41 = vld [vmem:[%s4603_s1 + $0x2f8] sm:$0xff]  }
  0x26   :  { %3192 = vmatprep.subr.bf16.mxu1 %v3517_v43  ;;  %2303 = vmatprep.mubr.bf16.mxu0 %v2841_v8  ;;  %v3578_v42 = vld [vmem:[%s4603_s1 + $0x238] sm:$0xff]   ;;  %v3606_v8 = vld [vmem:[%s4603_s1 + $0x328] sm:$0xff]  }
  0x27   :  { %2343 = vmatprep.mubr.bf16.mxu1 %v2843_v11  ;;  %v3579_v43 = vld [vmem:[%s4603_s1 + $0x2b8] sm:$0xff]   ;;  %v3609_v11 = vld [vmem:[%s4603_s1 + $0x3f0] sm:$0xff]  }
  0x28   :  { %3171 = vmatpush3.bf16.msra.mxu0 %v3518_v44  ;;  %v19_v44 = vld [vmem:[%s4605_s0 + $0x20] sm:$0xff] }
  0x29   :  { %3193 = vmatpush3.bf16.msra.mxu1 %v3519_v45  ;;  %3172 = vmatprep.subr.bf16.mxu0 %v3520_v46  ;;  %v20_v45 = vld [vmem:[%s4605_s0 + $0x28] sm:$0xff]  ;;  %v2844_v46 = vcombine.low %v19_v44, %v19_v44 }
  0x2a   :  { %3194 = vmatprep.subr.bf16.mxu1 %v3521_v47  ;;  %v2845_v47 = vcombine.high %v19_v44, %v19_v44  ;;  %v3640_v44 = vld [vmem:[%s4603_s1 + $0x468] sm:$0xff]  }
  0x2c   :  { %3173 = vmatpush3.bf16.msra.mxu0 %v3522_v48  ;;  %v2846_v48 = vcombine.low %v20_v45, %v20_v45 }
  0x2d   :  { %3195 = vmatpush3.bf16.msra.mxu1 %v3523_v49  ;;  %3174 = vmatprep.subr.bf16.mxu0 %v3524_v50  ;;  %v2847_v49 = vcombine.high %v20_v45, %v20_v45  ;;  %v3584_v50 = vld [vmem:[%s4603_s1 + $0x340] sm:$0xff]   ;;  %v3641_v45 = vld [vmem:[%s4603_s1 + $0x4e8] sm:$0xff]  }
  0x2e   :  { %3196 = vmatprep.subr.bf16.mxu1 %v3525_v51  ;;  %v3585_v51 = vld [vmem:[%s4603_s1 + $0x3c0] sm:$0xff]  }
  0x30   :  { %3175 = vmatpush3.bf16.msra.mxu0 %v3526_v52  ;;  %v3586_v52 = vld [vmem:[%s4603_s1 + $0x300] sm:$0xff]  }
  0x31   :  { %3197 = vmatpush3.bf16.msra.mxu1 %v3527_v53  ;;  %3176 = vmatprep.subr.bf16.mxu0 %v3528_v54  ;;  %v3587_v53 = vld [vmem:[%s4603_s1 + $0x380] sm:$0xff]   ;;  %v3588_v54 = vld [vmem:[%s4603_s1 + $0x348] sm:$0xff]  }
  0x32   :  { %3198 = vmatprep.subr.bf16.mxu1 %v3529_v55  ;;  %v3589_v55 = vld [vmem:[%s4603_s1 + $0x3c8] sm:$0xff]  }
  0x34   :  { %3177 = vmatpush3.bf16.msra.mxu0 %v3530_v56  ;;  %v3590_v56 = vld [vmem:[%s4603_s1 + $0x308] sm:$0xff]  }
  0x35   :  { %3199 = vmatpush3.bf16.msra.mxu1 %v3531_v57  ;;  %3178 = vmatprep.subr.bf16.mxu0 %v3532_v58  ;;  %v3591_v57 = vld [vmem:[%s4603_s1 + $0x388] sm:$0xff]   ;;  %v3592_v58 = vld [vmem:[%s4603_s1 + $0x350] sm:$0xff]  }
  0x36   :  { %3200 = vmatprep.subr.bf16.mxu1 %v3533_v59  ;;  %v3593_v59 = vld [vmem:[%s4603_s1 + $0x3d0] sm:$0xff]  }
  0x38   :  { %3179 = vmatpush3.bf16.msra.mxu0 %v3534_v60  ;;  %v3594_v60 = vld [vmem:[%s4603_s1 + $0x310] sm:$0xff]  }
  0x39   :  { %3201 = vmatpush3.bf16.msra.mxu1 %v3535_v61  ;;  %3180 = vmatprep.subr.bf16.mxu0 %v3536_v62  ;;  %v3595_v61 = vld [vmem:[%s4603_s1 + $0x390] sm:$0xff]   ;;  %v3596_v62 = vld [vmem:[%s4603_s1 + $0x358] sm:$0xff]  }
  0x3a   :  { %3202 = vmatprep.subr.bf16.mxu1 %v3537_v63  ;;  %v3597_v63 = vld [vmem:[%s4603_s1 + $0x3d8] sm:$0xff]  }
  0x3c   :  { %3181 = vmatpush3.bf16.msra.mxu0 %v3538_v0  ;;  %v3598_v0 = vld [vmem:[%s4603_s1 + $0x318] sm:$0xff]  }
  0x3d   :  { %3203 = vmatpush3.bf16.msra.mxu1 %v3539_v1  ;;  %3182 = vmatprep.subr.bf16.mxu0 %v3540_v2  ;;  %v3599_v1 = vld [vmem:[%s4603_s1 + $0x398] sm:$0xff]   ;;  %v3600_v2 = vld [vmem:[%s4603_s1 + $0x360] sm:$0xff]  }
  0x3e   :  { %3204 = vmatprep.subr.bf16.mxu1 %v3541_v3  ;;  %v3601_v3 = vld [vmem:[%s4603_s1 + $0x3e0] sm:$0xff]  }
  0x40   :  { %3183 = vmatpush3.bf16.msra.mxu0 %v3542_v4  ;;  %v3602_v4 = vld [vmem:[%s4603_s1 + $0x320] sm:$0xff]  }
  0x41   :  { %3205 = vmatpush3.bf16.msra.mxu1 %v3543_v5  ;;  %3212 = vmatprep.subr.bf16.mxu0 %v3548_v12  ;;  %v3603_v5 = vld [vmem:[%s4603_s1 + $0x3a0] sm:$0xff]   ;;  %v3610_v12 = vld [vmem:[%s4603_s1 + $0x330] sm:$0xff]  }
  0x42   :  { %3234 = vmatprep.subr.bf16.mxu1 %v3549_v13  ;;  %v3611_v13 = vld [vmem:[%s4603_s1 + $0x3b0] sm:$0xff]  }
  0x43   :  { %2304 = vmatmul.mubr.bf16.vlgmr.msra.gmra.mrb[4].mxu0 %v2840_v7  ;;  %v3605_v7 = vld [vmem:[%s4603_s1 + $0x3e8] sm:$0xff]  }
  0x44   :  { %2344 = vmatmul.mubr.bf16.vlgmr.msra.gmra.mrb[4].mxu1 %v2842_v10  ;;  %3213 = vmatpush3.bf16.msra.mxu0 %v3550_v14  ;;  %v3608_v10 = vld [vmem:[%s4603_s1 + $0x370] sm:$0xff]   ;;  %v3612_v14 = vld [vmem:[%s4603_s1 + $0x378] sm:$0xff]  }
  0x45   :  { %3235 = vmatpush3.bf16.msra.mxu1 %v3551_v15  ;;  %3214 = vmatprep.subr.bf16.mxu0 %v3552_v16  ;;  %v3613_v15 = vld [vmem:[%s4603_s1 + $0x3f8] sm:$0xff]  }
  0x46   :  { %3236 = vmatprep.subr.bf16.mxu1 %v3553_v17  ;;  %2383 = vmatprep.mubr.bf16.mxu0 %v2845_v47  ;;  %v3614_v16 = vld [vmem:[%s4603_s1 + $0x338] sm:$0xff]   ;;  %v3643_v47 = vld [vmem:[%s4603_s1 + $0x4a8] sm:$0xff]  }
  0x47   :  { %2423 = vmatprep.mubr.bf16.mxu1 %v2847_v49  ;;  %v3615_v17 = vld [vmem:[%s4603_s1 + $0x3b8] sm:$0xff]   ;;  %v3645_v49 = vld [vmem:[%s4603_s1 + $0x4f0] sm:$0xff]  }
  0x48   :  { %3215 = vmatpush3.bf16.msra.mxu0 %v3554_v18  ;;  %v21_v18 = vld [vmem:[%s4605_s0 + $0x30] sm:$0xff] }
  0x49   :  { %3237 = vmatpush3.bf16.msra.mxu1 %v3555_v19  ;;  %3216 = vmatprep.subr.bf16.mxu0 %v3556_v20  ;;  %v22_v19 = vld [vmem:[%s4605_s0 + $0x38] sm:$0xff]  ;;  %v2848_v20 = vcombine.low %v21_v18, %v21_v18 }
  0x4a   :  { %3238 = vmatprep.subr.bf16.mxu1 %v3557_v21  ;;  %v2849_v21 = vcombine.high %v21_v18, %v21_v18  ;;  %v3676_v18 = vld [vmem:[%s4603_s1 + $0x568] sm:$0xff]  }
  0x4c   :  { %3217 = vmatpush3.bf16.msra.mxu0 %v3558_v22  ;;  %v2850_v22 = vcombine.low %v22_v19, %v22_v19 }
  0x4d   :  { %3239 = vmatpush3.bf16.msra.mxu1 %v3559_v23  ;;  %3218 = vmatprep.subr.bf16.mxu0 %v3560_v24  ;;  %v3620_v23 = vld [vmem:[%s4603_s1 + $0x440] sm:$0xff]   ;;  %v2851_v24 = vcombine.high %v22_v19, %v22_v19  ;;  %v3677_v19 = vld [vmem:[%s4603_s1 + $0x5e8] sm:$0xff]  }
  0x4e   :  { %3240 = vmatprep.subr.bf16.mxu1 %v3561_v25  ;;  %v3621_v25 = vld [vmem:[%s4603_s1 + $0x4c0] sm:$0xff]  }
  0x50   :  { %3219 = vmatpush3.bf16.msra.mxu0 %v3562_v26  ;;  %v3622_v26 = vld [vmem:[%s4603_s1 + $0x400] sm:$0xff]  }
  0x51   :  { %3241 = vmatpush3.bf16.msra.mxu1 %v3563_v27  ;;  %3220 = vmatprep.subr.bf16.mxu0 %v3564_v28  ;;  %v3623_v27 = vld [vmem:[%s4603_s1 + $0x480] sm:$0xff]   ;;  %v3624_v28 = vld [vmem:[%s4603_s1 + $0x448] sm:$0xff]  }
  0x52   :  { %3242 = vmatprep.subr.bf16.mxu1 %v3565_v29  ;;  %v3625_v29 = vld [vmem:[%s4603_s1 + $0x4c8] sm:$0xff]  }
  0x54   :  { %3221 = vmatpush3.bf16.msra.mxu0 %v3566_v30  ;;  %v3626_v30 = vld [vmem:[%s4603_s1 + $0x408] sm:$0xff]  }
  0x55   :  { %3243 = vmatpush3.bf16.msra.mxu1 %v3567_v31  ;;  %3222 = vmatprep.subr.bf16.mxu0 %v3568_v32  ;;  %v3627_v31 = vld [vmem:[%s4603_s1 + $0x488] sm:$0xff]   ;;  %v3628_v32 = vld [vmem:[%s4603_s1 + $0x450] sm:$0xff]  }
  0x56   :  { %3244 = vmatprep.subr.bf16.mxu1 %v3569_v33  ;;  %v3629_v33 = vld [vmem:[%s4603_s1 + $0x4d0] sm:$0xff]  }
  0x58   :  { %3223 = vmatpush3.bf16.msra.mxu0 %v3570_v34  ;;  %v3630_v34 = vld [vmem:[%s4603_s1 + $0x410] sm:$0xff]  }
  0x59   :  { %3245 = vmatpush3.bf16.msra.mxu1 %v3571_v35  ;;  %3224 = vmatprep.subr.bf16.mxu0 %v3572_v36  ;;  %v3631_v35 = vld [vmem:[%s4603_s1 + $0x490] sm:$0xff]   ;;  %v3632_v36 = vld [vmem:[%s4603_s1 + $0x458] sm:$0xff]  }
  0x5a   :  { %3246 = vmatprep.subr.bf16.mxu1 %v3573_v37  ;;  %v3633_v37 = vld [vmem:[%s4603_s1 + $0x4d8] sm:$0xff]  }
  0x5c   :  { %3225 = vmatpush3.bf16.msra.mxu0 %v3574_v38  ;;  %v3634_v38 = vld [vmem:[%s4603_s1 + $0x418] sm:$0xff]  }
  0x5d   :  { %3247 = vmatpush3.bf16.msra.mxu1 %v3575_v39  ;;  %3226 = vmatprep.subr.bf16.mxu0 %v3576_v40  ;;  %v3635_v39 = vld [vmem:[%s4603_s1 + $0x498] sm:$0xff]   ;;  %v3636_v40 = vld [vmem:[%s4603_s1 + $0x460] sm:$0xff]  }
  0x5e   :  { %3248 = vmatprep.subr.bf16.mxu1 %v3577_v41  ;;  %v3637_v41 = vld [vmem:[%s4603_s1 + $0x4e0] sm:$0xff]  }
  0x60   :  { %3227 = vmatpush3.bf16.msra.mxu0 %v3578_v42  ;;  %v3638_v42 = vld [vmem:[%s4603_s1 + $0x420] sm:$0xff]  }
  0x61   :  { %3249 = vmatpush3.bf16.msra.mxu1 %v3579_v43  ;;  %3256 = vmatprep.subr.bf16.mxu0 %v3584_v50  ;;  %v3639_v43 = vld [vmem:[%s4603_s1 + $0x4a0] sm:$0xff]   ;;  %v3646_v50 = vld [vmem:[%s4603_s1 + $0x430] sm:$0xff]  }
  0x62   :  { %3278 = vmatprep.subr.bf16.mxu1 %v3585_v51  ;;  %v3647_v51 = vld [vmem:[%s4603_s1 + $0x4b0] sm:$0xff]  }
  0x63   :  { %2384 = vmatmul.mubr.bf16.vlgmr.msra.gmra.mrb[8].mxu0 %v2844_v46  ;;  %v3642_v46 = vld [vmem:[%s4603_s1 + $0x428] sm:$0xff]  }
  0x64   :  { %2424 = vmatmul.mubr.bf16.vlgmr.msra.gmra.mrb[8].mxu1 %v2846_v48  ;;  %3257 = vmatpush3.bf16.msra.mxu0 %v3586_v52  ;;  %v3644_v48 = vld [vmem:[%s4603_s1 + $0x470] sm:$0xff]   ;;  %v3648_v52 = vld [vmem:[%s4603_s1 + $0x478] sm:$0xff]  }
  0x65   :  { %3279 = vmatpush3.bf16.msra.mxu1 %v3587_v53  ;;  %3258 = vmatprep.subr.bf16.mxu0 %v3588_v54  ;;  %v3649_v53 = vld [vmem:[%s4603_s1 + $0x4f8] sm:$0xff]  }
  0x66   :  { %3280 = vmatprep.subr.bf16.mxu1 %v3589_v55  ;;  %2463 = vmatprep.mubr.bf16.mxu0 %v2849_v21  ;;  %v3650_v54 = vld [vmem:[%s4603_s1 + $0x438] sm:$0xff]   ;;  %v3679_v21 = vld [vmem:[%s4603_s1 + $0x5a8] sm:$0xff]  }
  0x67   :  { %2503 = vmatprep.mubr.bf16.mxu1 %v2851_v24  ;;  %v3651_v55 = vld [vmem:[%s4603_s1 + $0x4b8] sm:$0xff]   ;;  %v3682_v24 = vld [vmem:[%s4603_s1 + $0x530] sm:$0xff]  }
  0x68   :  { %3259 = vmatpush3.bf16.msra.mxu0 %v3590_v56  ;;  %v23_v56 = vld [vmem:[%s4605_s0 + $0x40] sm:$0xff] }
  0x69   :  { %3281 = vmatpush3.bf16.msra.mxu1 %v3591_v57  ;;  %3260 = vmatprep.subr.bf16.mxu0 %v3592_v58  ;;  %v2852_v57 = vcombine.low %v23_v56, %v23_v56  ;;  %v2853_v58 = vcombine.high %v23_v56, %v23_v56  ;;  %v3712_v56 = vld [vmem:[%s4603_s1 + $0x668] sm:$0xff]  }
  0x6a   :  { %3282 = vmatprep.subr.bf16.mxu1 %v3593_v59  ;;  %v24_v59 = vld [vmem:[%s4605_s0 + $0x48] sm:$0xff] }
  0x6c   :  { %3261 = vmatpush3.bf16.msra.mxu0 %v3594_v60  ;;  %v2854_v60 = vcombine.low %v24_v59, %v24_v59 }
  0x6d   :  { %3283 = vmatpush3.bf16.msra.mxu1 %v3595_v61  ;;  %3262 = vmatprep.subr.bf16.mxu0 %v3596_v62  ;;  %v2855_v61 = vcombine.high %v24_v59, %v24_v59  ;;  %v3656_v62 = vld [vmem:[%s4603_s1 + $0x540] sm:$0xff]   ;;  %v3715_v59 = vld [vmem:[%s4603_s1 + $0x6a8] sm:$0xff]  }
  0x6e   :  { %3284 = vmatprep.subr.bf16.mxu1 %v3597_v63  ;;  %v3657_v63 = vld [vmem:[%s4603_s1 + $0x5c0] sm:$0xff]  }
  0x70   :  { %3263 = vmatpush3.bf16.msra.mxu0 %v3598_v0  ;;  %v3658_v0 = vld [vmem:[%s4603_s1 + $0x500] sm:$0xff]  }
  0x71   :  { %3285 = vmatpush3.bf16.msra.mxu1 %v3599_v1  ;;  %3264 = vmatprep.subr.bf16.mxu0 %v3600_v2  ;;  %v3659_v1 = vld [vmem:[%s4603_s1 + $0x580] sm:$0xff]   ;;  %v3660_v2 = vld [vmem:[%s4603_s1 + $0x548] sm:$0xff]  }
  0x72   :  { %3286 = vmatprep.subr.bf16.mxu1 %v3601_v3  ;;  %v3661_v3 = vld [vmem:[%s4603_s1 + $0x5c8] sm:$0xff]  }
  0x74   :  { %3265 = vmatpush3.bf16.msra.mxu0 %v3602_v4  ;;  %v3662_v4 = vld [vmem:[%s4603_s1 + $0x508] sm:$0xff]  }
  0x75   :  { %3287 = vmatpush3.bf16.msra.mxu1 %v3603_v5  ;;  %3266 = vmatprep.subr.bf16.mxu0 %v3604_v6  ;;  %v3663_v5 = vld [vmem:[%s4603_s1 + $0x588] sm:$0xff]   ;;  %v3664_v6 = vld [vmem:[%s4603_s1 + $0x550] sm:$0xff]  }
  0x76   :  { %3288 = vmatprep.subr.bf16.mxu1 %v3605_v7  ;;  %v3665_v7 = vld [vmem:[%s4603_s1 + $0x5d0] sm:$0xff]  }
  0x78   :  { %3267 = vmatpush3.bf16.msra.mxu0 %v3606_v8  ;;  %v3666_v8 = vld [vmem:[%s4603_s1 + $0x510] sm:$0xff]  }
  0x79   :  { %3289 = vmatpush3.bf16.msra.mxu1 %v3607_v9  ;;  %3268 = vmatprep.subr.bf16.mxu0 %v3608_v10  ;;  %v3667_v9 = vld [vmem:[%s4603_s1 + $0x590] sm:$0xff]   ;;  %v3668_v10 = vld [vmem:[%s4603_s1 + $0x558] sm:$0xff]  }
  0x7a   :  { %3290 = vmatprep.subr.bf16.mxu1 %v3609_v11  ;;  %v3669_v11 = vld [vmem:[%s4603_s1 + $0x5d8] sm:$0xff]  }
  0x7c   :  { %3269 = vmatpush3.bf16.msra.mxu0 %v3610_v12  ;;  %v3670_v12 = vld [vmem:[%s4603_s1 + $0x518] sm:$0xff]  }
  0x7d   :  { %3291 = vmatpush3.bf16.msra.mxu1 %v3611_v13  ;;  %3270 = vmatprep.subr.bf16.mxu0 %v3612_v14  ;;  %v3671_v13 = vld [vmem:[%s4603_s1 + $0x598] sm:$0xff]   ;;  %v3672_v14 = vld [vmem:[%s4603_s1 + $0x560] sm:$0xff]  }
  0x7e   :  { %3292 = vmatprep.subr.bf16.mxu1 %v3613_v15  ;;  %v3673_v15 = vld [vmem:[%s4603_s1 + $0x5e0] sm:$0xff]  }
  0x80   :  { %3271 = vmatpush3.bf16.msra.mxu0 %v3614_v16  ;;  %v3674_v16 = vld [vmem:[%s4603_s1 + $0x520] sm:$0xff]  }
  0x81   :  { %3293 = vmatpush3.bf16.msra.mxu1 %v3615_v17  ;;  %3300 = vmatprep.subr.bf16.mxu0 %v3620_v23  ;;  %v3675_v17 = vld [vmem:[%s4603_s1 + $0x5a0] sm:$0xff]   ;;  %v3681_v23 = vld [vmem:[%s4603_s1 + $0x5f0] sm:$0xff]  }
  0x82   :  { %3322 = vmatprep.subr.bf16.mxu1 %v3621_v25  ;;  %v3683_v25 = vld [vmem:[%s4603_s1 + $0x5b0] sm:$0xff]  }
  0x83   :  { %2464 = vmatmul.mubr.bf16.vlgmr.msra.gmra.mrb[12].mxu0 %v2848_v20  ;;  %v3678_v20 = vld [vmem:[%s4603_s1 + $0x528] sm:$0xff]  }
  0x84   :  { %2504 = vmatmul.mubr.bf16.vlgmr.msra.gmra.mrb[12].mxu1 %v2850_v22  ;;  %3301 = vmatpush3.bf16.msra.mxu0 %v3622_v26  ;;  %v3680_v22 = vld [vmem:[%s4603_s1 + $0x570] sm:$0xff]   ;;  %v3684_v26 = vld [vmem:[%s4603_s1 + $0x578] sm:$0xff]  }
  0x85   :  { %3323 = vmatpush3.bf16.msra.mxu1 %v3623_v27  ;;  %3302 = vmatprep.subr.bf16.mxu0 %v3624_v28  ;;  %v3685_v27 = vld [vmem:[%s4603_s1 + $0x5f8] sm:$0xff]  }
  0x86   :  { %3324 = vmatprep.subr.bf16.mxu1 %v3625_v29  ;;  %2543 = vmatprep.mubr.bf16.mxu0 %v2853_v58  ;;  %v3686_v28 = vld [vmem:[%s4603_s1 + $0x538] sm:$0xff]   ;;  %v3714_v58 = vld [vmem:[%s4603_s1 + $0x628] sm:$0xff]  }
  0x87   :  { %2583 = vmatprep.mubr.bf16.mxu1 %v2855_v61  ;;  %v3687_v29 = vld [vmem:[%s4603_s1 + $0x5b8] sm:$0xff]   ;;  %v3717_v61 = vld [vmem:[%s4603_s1 + $0x6f0] sm:$0xff]  }
  0x88   :  { %3303 = vmatpush3.bf16.msra.mxu0 %v3626_v30  ;;  %v25_v30 = vld [vmem:[%s4605_s0 + $0x50] sm:$0xff] }
  0x89   :  { %3325 = vmatpush3.bf16.msra.mxu1 %v3627_v31  ;;  %3304 = vmatprep.subr.bf16.mxu0 %v3628_v32  ;;  %v26_v31 = vld [vmem:[%s4605_s0 + $0x58] sm:$0xff]  ;;  %v2856_v32 = vcombine.low %v25_v30, %v25_v30 }
  0x8a   :  { %3326 = vmatprep.subr.bf16.mxu1 %v3629_v33  ;;  %v2857_v33 = vcombine.high %v25_v30, %v25_v30  ;;  %v3747_v30 = vld [vmem:[%s4603_s1 + $0x7a0] sm:$0xff]  }
  0x8c   :  { %3305 = vmatpush3.bf16.msra.mxu0 %v3630_v34  ;;  %v2858_v34 = vcombine.low %v26_v31, %v26_v31 }
  0x8d   :  { %3327 = vmatpush3.bf16.msra.mxu1 %v3631_v35  ;;  %3306 = vmatprep.subr.bf16.mxu0 %v3632_v36  ;;  %v2859_v35 = vcombine.high %v26_v31, %v26_v31  ;;  %v3692_v36 = vld [vmem:[%s4603_s1 + $0x640] sm:$0xff]  }
  0x8e   :  { %3328 = vmatprep.subr.bf16.mxu1 %v3633_v37  ;;  %v3693_v37 = vld [vmem:[%s4603_s1 + $0x6c0] sm:$0xff]  }
  0x90   :  { %3307 = vmatpush3.bf16.msra.mxu0 %v3634_v38  ;;  %v3694_v38 = vld [vmem:[%s4603_s1 + $0x600] sm:$0xff]  }
  0x91   :  { %3329 = vmatpush3.bf16.msra.mxu1 %v3635_v39  ;;  %3308 = vmatprep.subr.bf16.mxu0 %v3636_v40  ;;  %v3695_v39 = vld [vmem:[%s4603_s1 + $0x680] sm:$0xff]   ;;  %v3696_v40 = vld [vmem:[%s4603_s1 + $0x648] sm:$0xff]  }
  0x92   :  { %3330 = vmatprep.subr.bf16.mxu1 %v3637_v41  ;;  %v3697_v41 = vld [vmem:[%s4603_s1 + $0x6c8] sm:$0xff]  }
  0x94   :  { %3309 = vmatpush3.bf16.msra.mxu0 %v3638_v42  ;;  %v3698_v42 = vld [vmem:[%s4603_s1 + $0x608] sm:$0xff]  }
  0x95   :  { %3331 = vmatpush3.bf16.msra.mxu1 %v3639_v43  ;;  %3310 = vmatprep.subr.bf16.mxu0 %v3640_v44  ;;  %v3699_v43 = vld [vmem:[%s4603_s1 + $0x688] sm:$0xff]   ;;  %v3700_v44 = vld [vmem:[%s4603_s1 + $0x650] sm:$0xff]  }
  0x96   :  { %3332 = vmatprep.subr.bf16.mxu1 %v3641_v45  ;;  %v3701_v45 = vld [vmem:[%s4603_s1 + $0x6d0] sm:$0xff]  }
  0x98   :  { %3311 = vmatpush3.bf16.msra.mxu0 %v3642_v46  ;;  %v3702_v46 = vld [vmem:[%s4603_s1 + $0x610] sm:$0xff]  }
  0x99   :  { %3333 = vmatpush3.bf16.msra.mxu1 %v3643_v47  ;;  %3312 = vmatprep.subr.bf16.mxu0 %v3644_v48  ;;  %v3703_v47 = vld [vmem:[%s4603_s1 + $0x690] sm:$0xff]   ;;  %v3704_v48 = vld [vmem:[%s4603_s1 + $0x658] sm:$0xff]  }
  0x9a   :  { %3334 = vmatprep.subr.bf16.mxu1 %v3645_v49  ;;  %v3705_v49 = vld [vmem:[%s4603_s1 + $0x6d8] sm:$0xff]  }
  0x9c   :  { %3313 = vmatpush3.bf16.msra.mxu0 %v3646_v50  ;;  %v3706_v50 = vld [vmem:[%s4603_s1 + $0x618] sm:$0xff]  }
  0x9d   :  { %3335 = vmatpush3.bf16.msra.mxu1 %v3647_v51  ;;  %3314 = vmatprep.subr.bf16.mxu0 %v3648_v52  ;;  %v3707_v51 = vld [vmem:[%s4603_s1 + $0x698] sm:$0xff]   ;;  %v3708_v52 = vld [vmem:[%s4603_s1 + $0x660] sm:$0xff]  }
  0x9e   :  { %3336 = vmatprep.subr.bf16.mxu1 %v3649_v53  ;;  %v3709_v53 = vld [vmem:[%s4603_s1 + $0x6e0] sm:$0xff]  }
  0xa0   :  { %3315 = vmatpush3.bf16.msra.mxu0 %v3650_v54  ;;  %v3710_v54 = vld [vmem:[%s4603_s1 + $0x620] sm:$0xff]  }
  0xa1   :  { %3337 = vmatpush3.bf16.msra.mxu1 %v3651_v55  ;;  %3344 = vmatprep.subr.bf16.mxu0 %v3656_v62  ;;  %v3711_v55 = vld [vmem:[%s4603_s1 + $0x6a0] sm:$0xff]   ;;  %v3718_v62 = vld [vmem:[%s4603_s1 + $0x630] sm:$0xff]  }
  0xa2   :  { %3366 = vmatprep.subr.bf16.mxu1 %v3657_v63  ;;  %v3719_v63 = vld [vmem:[%s4603_s1 + $0x6b0] sm:$0xff]  }
  0xa3   :  { %2544 = vmatmul.mubr.bf16.vlgmr.msra.gmra.mrb[16].mxu0 %v2852_v57  ;;  %v3713_v57 = vld [vmem:[%s4603_s1 + $0x6e8] sm:$0xff]  }
  0xa4   :  { %2584 = vmatmul.mubr.bf16.vlgmr.msra.gmra.mrb[16].mxu1 %v2854_v60  ;;  %3345 = vmatpush3.bf16.msra.mxu0 %v3658_v0  ;;  %v3716_v60 = vld [vmem:[%s4603_s1 + $0x670] sm:$0xff]   ;;  %v3720_v0 = vld [vmem:[%s4603_s1 + $0x678] sm:$0xff]  }
  0xa5   :  { %3367 = vmatpush3.bf16.msra.mxu1 %v3659_v1  ;;  %3346 = vmatprep.subr.bf16.mxu0 %v3660_v2  ;;  %v3721_v1 = vld [vmem:[%s4603_s1 + $0x6f8] sm:$0xff]  }
  0xa6   :  { %3368 = vmatprep.subr.bf16.mxu1 %v3661_v3  ;;  %2623 = vmatprep.mubr.bf16.mxu0 %v2857_v33  ;;  %v3722_v2 = vld [vmem:[%s4603_s1 + $0x638] sm:$0xff]   ;;  %v3748_v33 = vld [vmem:[%s4603_s1 + $0x768] sm:$0xff]  }
  0xa7   :  { %2663 = vmatprep.mubr.bf16.mxu1 %v2859_v35  ;;  %v3723_v3 = vld [vmem:[%s4603_s1 + $0x6b8] sm:$0xff]  }
  0xa8   :  { %3347 = vmatpush3.bf16.msra.mxu0 %v3662_v4  ;;  %v27_v4 = vld [vmem:[%s4605_s0 + $0x60] sm:$0xff] }
  0xa9   :  { %3369 = vmatpush3.bf16.msra.mxu1 %v3663_v5  ;;  %3348 = vmatprep.subr.bf16.mxu0 %v3664_v6  ;;  %v28_v5 = vld [vmem:[%s4605_s0 + $0x68] sm:$0xff]  ;;  %v2860_v6 = vcombine.low %v27_v4, %v27_v4 }
  0xaa   :  { %3370 = vmatprep.subr.bf16.mxu1 %v3665_v7  ;;  %v2861_v7 = vcombine.high %v27_v4, %v27_v4 }
  0xac   :  { %3349 = vmatpush3.bf16.msra.mxu0 %v3666_v8  ;;  %v2862_v8 = vcombine.low %v28_v5, %v28_v5 }
  0xad   :  { %3371 = vmatpush3.bf16.msra.mxu1 %v3667_v9  ;;  %3350 = vmatprep.subr.bf16.mxu0 %v3668_v10  ;;  %v3728_v9 = vld [vmem:[%s4603_s1 + $0x740] sm:$0xff]   ;;  %v2863_v10 = vcombine.high %v28_v5, %v28_v5 }
  0xae   :  { %3372 = vmatprep.subr.bf16.mxu1 %v3669_v11  ;;  %v3729_v11 = vld [vmem:[%s4603_s1 + $0x7c0] sm:$0xff]  }
  0xb0   :  { %3351 = vmatpush3.bf16.msra.mxu0 %v3670_v12  ;;  %v3730_v12 = vld [vmem:[%s4603_s1 + $0x700] sm:$0xff]  }
  0xb1   :  { %3373 = vmatpush3.bf16.msra.mxu1 %v3671_v13  ;;  %3352 = vmatprep.subr.bf16.mxu0 %v3672_v14  ;;  %v3731_v13 = vld [vmem:[%s4603_s1 + $0x780] sm:$0xff]   ;;  %v3732_v14 = vld [vmem:[%s4603_s1 + $0x748] sm:$0xff]  }
  0xb2   :  { %3374 = vmatprep.subr.bf16.mxu1 %v3673_v15  ;;  %v3733_v15 = vld [vmem:[%s4603_s1 + $0x7c8] sm:$0xff]  }
  0xb4   :  { %3353 = vmatpush3.bf16.msra.mxu0 %v3674_v16  ;;  %v3734_v16 = vld [vmem:[%s4603_s1 + $0x708] sm:$0xff]  }
  0xb5   :  { %3375 = vmatpush3.bf16.msra.mxu1 %v3675_v17  ;;  %3354 = vmatprep.subr.bf16.mxu0 %v3676_v18  ;;  %v3735_v17 = vld [vmem:[%s4603_s1 + $0x788] sm:$0xff]   ;;  %v3736_v18 = vld [vmem:[%s4603_s1 + $0x750] sm:$0xff]  }
  0xb6   :  { %3376 = vmatprep.subr.bf16.mxu1 %v3677_v19  ;;  %v3737_v19 = vld [vmem:[%s4603_s1 + $0x7d0] sm:$0xff]  }
  0xb8   :  { %3355 = vmatpush3.bf16.msra.mxu0 %v3678_v20  ;;  %v3738_v20 = vld [vmem:[%s4603_s1 + $0x710] sm:$0xff]  }
  0xb9   :  { %3377 = vmatpush3.bf16.msra.mxu1 %v3679_v21  ;;  %3356 = vmatprep.subr.bf16.mxu0 %v3680_v22  ;;  %v3739_v21 = vld [vmem:[%s4603_s1 + $0x790] sm:$0xff]   ;;  %v3740_v22 = vld [vmem:[%s4603_s1 + $0x758] sm:$0xff]  }
  0xba   :  { %3378 = vmatprep.subr.bf16.mxu1 %v3681_v23  ;;  %v3741_v23 = vld [vmem:[%s4603_s1 + $0x7d8] sm:$0xff]  }
  0xbc   :  { %3357 = vmatpush3.bf16.msra.mxu0 %v3682_v24  ;;  %v3742_v24 = vld [vmem:[%s4603_s1 + $0x718] sm:$0xff]  }
  0xbd   :  { %3379 = vmatpush3.bf16.msra.mxu1 %v3683_v25  ;;  %3358 = vmatprep.subr.bf16.mxu0 %v3684_v26  ;;  %v3743_v25 = vld [vmem:[%s4603_s1 + $0x798] sm:$0xff]   ;;  %v3744_v26 = vld [vmem:[%s4603_s1 + $0x760] sm:$0xff]  }
  0xbe   :  { %3380 = vmatprep.subr.bf16.mxu1 %v3685_v27  ;;  %v3745_v27 = vld [vmem:[%s4603_s1 + $0x7e0] sm:$0xff]  }
  0xc0   :  { %3359 = vmatpush3.bf16.msra.mxu0 %v3686_v28  ;;  %v3746_v28 = vld [vmem:[%s4603_s1 + $0x720] sm:$0xff]  }
  0xc1   :  { %3381 = vmatpush3.bf16.msra.mxu1 %v3687_v29  ;;  %3388 = vmatprep.subr.bf16.mxu0 %v3692_v36  ;;  %v3749_v36 = vld [vmem:[%s4603_s1 + $0x7e8] sm:$0xff]  }
  0xc2   :  { %3410 = vmatprep.subr.bf16.mxu1 %v3693_v37 }
  0xc3   :  { %2624 = vmatmul.mubr.bf16.vlgmr.msra.gmra.mrb[20].mxu0 %v2856_v32 }
  0xc4   :  { %2664 = vmatmul.mubr.bf16.vlgmr.msra.gmra.mrb[20].mxu1 %v2858_v34  ;;  %3389 = vmatpush3.bf16.msra.mxu0 %v3694_v38 }
  0xc5   :  { %3411 = vmatpush3.bf16.msra.mxu1 %v3695_v39  ;;  %3390 = vmatprep.subr.bf16.mxu0 %v3696_v40  ;;  %v3750_v40 = vld [vmem:[%s4603_s1 + $0x728] sm:$0xff]  }
  0xc6   :  { %3412 = vmatprep.subr.bf16.mxu1 %v3697_v41  ;;  %2703 = vmatprep.mubr.bf16.mxu0 %v2861_v7 }
  0xc7   :  { %2743 = vmatprep.mubr.bf16.mxu1 %v2863_v10 }
  0xc8   :  { %3391 = vmatpush3.bf16.msra.mxu0 %v3698_v42 }
  0xc9   :  { %3413 = vmatpush3.bf16.msra.mxu1 %v3699_v43  ;;  %3392 = vmatprep.subr.bf16.mxu0 %v3700_v44  ;;  %v3751_v43 = vld [vmem:[%s4603_s1 + $0x7a8] sm:$0xff]  }
  0xca   :  { %3414 = vmatprep.subr.bf16.mxu1 %v3701_v45  ;;  %v3752_v45 = vld [vmem:[%s4603_s1 + $0x770] sm:$0xff]  }
  0xcc   :  { %3393 = vmatpush3.bf16.msra.mxu0 %v3702_v46  ;;  %v3753_v46 = vld [vmem:[%s4603_s1 + $0x7f0] sm:$0xff]  }
  0xcd   :  { %3415 = vmatpush3.bf16.msra.mxu1 %v3703_v47  ;;  %3394 = vmatprep.subr.bf16.mxu0 %v3704_v48  ;;  %v3754_v47 = vld [vmem:[%s4603_s1 + $0x730] sm:$0xff]  }
  0xce   :  { %3416 = vmatprep.subr.bf16.mxu1 %v3705_v49  ;;  %v3755_v48 = vld [vmem:[%s4603_s1 + $0x7b0] sm:$0xff]   ;;  %v3756_v49 = vld [vmem:[%s4603_s1 + $0x778] sm:$0xff]  }
  0xd0   :  { %3395 = vmatpush3.bf16.msra.mxu0 %v3706_v50  ;;  %v3757_v50 = vld [vmem:[%s4603_s1 + $0x7f8] sm:$0xff]  }
  0xd1   :  { %3417 = vmatpush3.bf16.msra.mxu1 %v3707_v51  ;;  %3396 = vmatprep.subr.bf16.mxu0 %v3708_v52  ;;  %v3758_v51 = vld [vmem:[%s4603_s1 + $0x738] sm:$0xff]  }
  0xd2   :  { %3418 = vmatprep.subr.bf16.mxu1 %v3709_v53  ;;  %v3759_v52 = vld [vmem:[%s4603_s1 + $0x7b8] sm:$0xff]   ;;  %v29_v53 = vld [vmem:[%s4605_s0 + $0x70] sm:$0xff] }
  0xd4   :  { %3397 = vmatpush3.bf16.msra.mxu0 %v3710_v54  ;;  %v30_v54 = vld [vmem:[%s4605_s0 + $0x78] sm:$0xff] }
  0xd5   :  { %3419 = vmatpush3.bf16.msra.mxu1 %v3711_v55  ;;  %3398 = vmatprep.subr.bf16.mxu0 %v3712_v56  ;;  %v2864_v55 = vcombine.low %v29_v53, %v29_v53  ;;  %v2865_v56 = vcombine.high %v29_v53, %v29_v53 }
  0xd6   :  { %3420 = vmatprep.subr.bf16.mxu1 %v3713_v57  ;;  %v2866_v57 = vcombine.low %v30_v54, %v30_v54 }
  0xd8   :  { %3399 = vmatpush3.bf16.msra.mxu0 %v3714_v58  ;;  %v2867_v58 = vcombine.high %v30_v54, %v30_v54 }
  0xd9   :  { %3421 = vmatpush3.bf16.msra.mxu1 %v3715_v59  ;;  %3400 = vmatprep.subr.bf16.mxu0 %v3716_v60 }
  0xda   :  { %3422 = vmatprep.subr.bf16.mxu1 %v3717_v61 }
  0xdc   :  { %3401 = vmatpush3.bf16.msra.mxu0 %v3718_v62 }
  0xdd   :  { %3423 = vmatpush3.bf16.msra.mxu1 %v3719_v63  ;;  %3402 = vmatprep.subr.bf16.mxu0 %v3720_v0 }
  0xde   :  { %3424 = vmatprep.subr.bf16.mxu1 %v3721_v1 }
  0xe0   :  { %3403 = vmatpush3.bf16.msra.mxu0 %v3722_v2 }
  0xe1   :  { %3425 = vmatpush3.bf16.msra.mxu1 %v3723_v3  ;;  %3432 = vmatprep.subr.bf16.mxu0 %v3728_v9 }
  0xe2   :  { %3454 = vmatprep.subr.bf16.mxu1 %v3729_v11 }
  0xe3   :  { %2704 = vmatmul.mubr.bf16.vlgmr.msra.gmra.mrb[24].mxu0 %v2860_v6 }
  0xe4   :  { %2744 = vmatmul.mubr.bf16.vlgmr.msra.gmra.mrb[24].mxu1 %v2862_v8  ;;  %3433 = vmatpush3.bf16.msra.mxu0 %v3730_v12 }
  0xe5   :  { %3455 = vmatpush3.bf16.msra.mxu1 %v3731_v13  ;;  %3434 = vmatprep.subr.bf16.mxu0 %v3732_v14 }
  0xe6   :  { %3456 = vmatprep.subr.bf16.mxu1 %v3733_v15  ;;  %2783 = vmatprep.mubr.bf16.mxu0 %v2865_v56 }
  0xe7   :  { %2823 = vmatprep.mubr.bf16.mxu1 %v2867_v58 }
  0xe8   :  { %3435 = vmatpush3.bf16.msra.mxu0 %v3734_v16 }
  0xe9   :  { %3457 = vmatpush3.bf16.msra.mxu1 %v3735_v17  ;;  %3436 = vmatprep.subr.bf16.mxu0 %v3736_v18 }
  0xea   :  { %3458 = vmatprep.subr.bf16.mxu1 %v3737_v19 }
  0xec   :  { %3437 = vmatpush3.bf16.msra.mxu0 %v3738_v20 }
  0xed   :  { %3459 = vmatpush3.bf16.msra.mxu1 %v3739_v21  ;;  %3438 = vmatprep.subr.bf16.mxu0 %v3740_v22 }
  0xee   :  { %3460 = vmatprep.subr.bf16.mxu1 %v3741_v23 }
  0xf0   :  { %3439 = vmatpush3.bf16.msra.mxu0 %v3742_v24 }
  0xf1   :  { %3461 = vmatpush3.bf16.msra.mxu1 %v3743_v25  ;;  %3440 = vmatprep.subr.bf16.mxu0 %v3744_v26 }
  0xf2   :  { %3462 = vmatprep.subr.bf16.mxu1 %v3745_v27 }
  0xf4   :  { %3441 = vmatpush3.bf16.msra.mxu0 %v3746_v28 }
  0xf5   :  { %3463 = vmatpush3.bf16.msra.mxu1 %v3747_v30  ;;  %3442 = vmatprep.subr.bf16.mxu0 %v3748_v33 }
  0xf6   :  { %v3140_v29 = vpop.f32.mrb[0].mxu0  ;;  %3464 = vmatprep.subr.bf16.mxu1 %v3749_v36 }
  0xf7   :  { %v3162_v31 = vpop.f32.mrb[0].mxu1  ;;  %v3141_v32 = vpop.f32.mrb[1].mxu0 }
  0xf8   :  { %v3142_v34 = vadd.f32 %v3141_v32, %v3140_v29  ;;  %v3163_v35 = vpop.f32.mrb[1].mxu1  ;;  %v3143_v38 = vpop.f32.mrb[2].mxu0  ;;  %3443 = vmatpush3.bf16.msra.mxu0 %v3750_v40 }
  0xf9   :  { %v3164_v37 = vadd.f32 %v3163_v35, %v3162_v31  ;;  %v3165_v39 = vpop.f32.mrb[2].mxu1  ;;  %v3144_v41 = vpop.f32.mrb[3].mxu0  ;;  %3465 = vmatpush3.bf16.msra.mxu1 %v3751_v43  ;;  %3444 = vmatprep.subr.bf16.mxu0 %v3752_v45 }
  0xfa   :  { %v3166_v44 = vpop.f32.mrb[3].mxu1  ;;  %3466 = vmatprep.subr.bf16.mxu1 %v3753_v46 }
  0xfb   :  { %v2266_v42 = vadd.f32 %v3164_v37, %v3142_v34 }
  0xfc   :  { %3445 = vmatpush3.bf16.msra.mxu0 %v3754_v47 }
  0xfd   :  { %3467 = vmatpush3.bf16.msra.mxu1 %v3755_v48  ;;  %3446 = vmatprep.subr.bf16.mxu0 %v3756_v49 }
  0xfe   :  { %3468 = vmatprep.subr.bf16.mxu1 %v3757_v50 }
 0x100   :  { %3447 = vmatpush3.bf16.msra.mxu0 %v3758_v51 }
 0x101   :  { %3469 = vmatpush3.bf16.msra.mxu1 %v3759_v52 }
 0x103   :  { %2784 = vmatmul.mubr.bf16.vlgmr.msra.gmra.mrb[28].mxu0 %v2864_v55 }
 0x104   :  { %2824 = vmatmul.mubr.bf16.vlgmr.msra.gmra.mrb[28].mxu1 %v2866_v57 }
 0x116   :  { %v3184_v59 = vpop.f32.mrb[4].mxu0 }
 0x117   :  { %v3206_v60 = vpop.f32.mrb[4].mxu1  ;;  %v3185_v61 = vpop.f32.mrb[5].mxu0 }
 0x118   :  { %v3207_v62 = vpop.f32.mrb[5].mxu1  ;;  %v3186_v63 = vadd.f32 %v3185_v61, %v3184_v59  ;;  %v3187_v1 = vpop.f32.mrb[6].mxu0 }
 0x119   :  { %v3208_v0 = vadd.f32 %v3207_v62, %v3206_v60  ;;  %v3209_v2 = vpop.f32.mrb[6].mxu1  ;;  %v3188_v3 = vpop.f32.mrb[7].mxu0 }
 0x11a   :  { %v3210_v4 = vpop.f32.mrb[7].mxu1  ;;  %v2306_v5 = vadd.f32 %v3186_v63, %v2266_v42 }
 0x11c   :  { %v2346_v6 = vadd.f32 %v3208_v0, %v2306_v5 }
 0x136   :  { %v3228_v7 = vpop.f32.mrb[8].mxu0 }
 0x137   :  { %v3250_v8 = vpop.f32.mrb[8].mxu1  ;;  %v3229_v9 = vpop.f32.mrb[9].mxu0 }
 0x138   :  { %v3230_v10 = vadd.f32 %v3229_v9, %v3228_v7  ;;  %v3251_v11 = vpop.f32.mrb[9].mxu1  ;;  %v3231_v12 = vpop.f32.mrb[10].mxu0 }
 0x139   :  { %v3252_v13 = vadd.f32 %v3251_v11, %v3250_v8  ;;  %v3253_v14 = vpop.f32.mrb[10].mxu1  ;;  %v3232_v15 = vpop.f32.mrb[11].mxu0 }
 0x13a   :  { %v2386_v16 = vadd.f32 %v3230_v10, %v2346_v6  ;;  %v3254_v17 = vpop.f32.mrb[11].mxu1 }
 0x13c   :  { %v2426_v18 = vadd.f32 %v3252_v13, %v2386_v16 }
 0x156   :  { %v3272_v19 = vpop.f32.mrb[12].mxu0 }
 0x157   :  { %v3294_v20 = vpop.f32.mrb[12].mxu1  ;;  %v3273_v21 = vpop.f32.mrb[13].mxu0 }
 0x158   :  { %v3274_v22 = vadd.f32 %v3273_v21, %v3272_v19  ;;  %v3295_v23 = vpop.f32.mrb[13].mxu1  ;;  %v3275_v24 = vpop.f32.mrb[14].mxu0 }
 0x159   :  { %v3296_v25 = vadd.f32 %v3295_v23, %v3294_v20  ;;  %v3297_v26 = vpop.f32.mrb[14].mxu1  ;;  %v3276_v27 = vpop.f32.mrb[15].mxu0 }
 0x15a   :  { %v2466_v28 = vadd.f32 %v3274_v22, %v2426_v18  ;;  %v3298_v29 = vpop.f32.mrb[15].mxu1 }
 0x15c   :  { %v2506_v30 = vadd.f32 %v3296_v25, %v2466_v28 }
 0x176   :  { %v3316_v31 = vpop.f32.mrb[16].mxu0 }
 0x177   :  { %v3338_v32 = vpop.f32.mrb[16].mxu1  ;;  %v3317_v33 = vpop.f32.mrb[17].mxu0 }
 0x178   :  { %v3339_v34 = vpop.f32.mrb[17].mxu1  ;;  %v3318_v35 = vadd.f32 %v3317_v33, %v3316_v31  ;;  %v3319_v37 = vpop.f32.mrb[18].mxu0 }
 0x179   :  { %v3340_v36 = vadd.f32 %v3339_v34, %v3338_v32  ;;  %v3341_v38 = vpop.f32.mrb[18].mxu1  ;;  %v3320_v39 = vpop.f32.mrb[19].mxu0 }
 0x17a   :  { %v3342_v40 = vpop.f32.mrb[19].mxu1  ;;  %v2546_v41 = vadd.f32 %v3318_v35, %v2506_v30 }
 0x17c   :  { %v2586_v42 = vadd.f32 %v3340_v36, %v2546_v41 }
 0x196   :  { %v3360_v43 = vpop.f32.mrb[20].mxu0 }
 0x197   :  { %v3382_v44 = vpop.f32.mrb[20].mxu1  ;;  %v3361_v45 = vpop.f32.mrb[21].mxu0 }
 0x198   :  { %v3362_v46 = vadd.f32 %v3361_v45, %v3360_v43  ;;  %v3383_v47 = vpop.f32.mrb[21].mxu1  ;;  %v3363_v48 = vpop.f32.mrb[22].mxu0 }
 0x199   :  { %v3384_v49 = vadd.f32 %v3383_v47, %v3382_v44  ;;  %v3385_v50 = vpop.f32.mrb[22].mxu1  ;;  %v3364_v51 = vpop.f32.mrb[23].mxu0 }
 0x19a   :  { %v2626_v52 = vadd.f32 %v3362_v46, %v2586_v42  ;;  %v3386_v53 = vpop.f32.mrb[23].mxu1 }
 0x19c   :  { %v2666_v54 = vadd.f32 %v3384_v49, %v2626_v52 }
 0x1b6   :  { %v3404_v55 = vpop.f32.mrb[24].mxu0 }
 0x1b7   :  { %v3426_v56 = vpop.f32.mrb[24].mxu1  ;;  %v3405_v57 = vpop.f32.mrb[25].mxu0 }
 0x1b8   :  { %v3406_v58 = vadd.f32 %v3405_v57, %v3404_v55  ;;  %v3427_v59 = vpop.f32.mrb[25].mxu1  ;;  %v3407_v60 = vpop.f32.mrb[26].mxu0 }
 0x1b9   :  { %v3428_v61 = vadd.f32 %v3427_v59, %v3426_v56  ;;  %v3429_v62 = vpop.f32.mrb[26].mxu1  ;;  %v3408_v63 = vpop.f32.mrb[27].mxu0 }
 0x1ba   :  { %v2706_v0 = vadd.f32 %v3406_v58, %v2666_v54  ;;  %v3430_v1 = vpop.f32.mrb[27].mxu1 }
 0x1bc   :  { %v2746_v2 = vadd.f32 %v3428_v61, %v2706_v0 }
 0x1d6   :  { %v3448_v3 = vpop.f32.mrb[28].mxu0 }
 0x1d7   :  { %v3470_v4 = vpop.f32.mrb[28].mxu1  ;;  %v3449_v5 = vpop.f32.mrb[29].mxu0 }
 0x1d8   :  { %v3450_v6 = vadd.f32 %v3449_v5, %v3448_v3  ;;  %v3471_v7 = vpop.f32.mrb[29].mxu1  ;;  %v3451_v8 = vpop.f32.mrb[30].mxu0 }
 0x1d9   :  { %v3472_v9 = vadd.f32 %v3471_v7, %v3470_v4  ;;  %v3473_v10 = vpop.f32.mrb[30].mxu1  ;;  %v3452_v11 = vpop.f32.mrb[31].mxu0 }
 0x1da   :  { %v2786_v12 = vadd.f32 %v3450_v6, %v2746_v2  ;;  %v3474_v13 = vpop.f32.mrb[31].mxu1 }
 0x1dc   :  { %v2826_v14 = vadd.f32 %v3472_v9, %v2786_v12 }
 0x1de   :  { %2831 = vst [vmem:[%s4606_s3] sm:$0xff] %v2826_v14 }

</bundles_post_ra>
